<compile_context>
chip_gen: v6e
topology: v6e:2x2x1
jax: 0.10.0
libtpu: 0.0.40
codegen_flags: <defaults>
</compile_context>

<pallas_src>
import functools

import jax
import jax.numpy as jnp
from jax.experimental import pallas as pl
from jax.experimental.pallas import tpu as pltpu

LEAKY_SLOPE = 0.2
BN_EPS = 1e-5
Z_DIM = 16


def _round_up(x, m):
    return ((x + m - 1) // m) * m


def _pad2d(x, rows, cols):
    r, c = x.shape
    if r == rows and c == cols:
        return x
    return jnp.pad(x, ((0, rows - r), (0, cols - c)))


# ----------------------------- Pallas kernels -----------------------------

def _mm_leaky_kernel(a_ref, b_ref, o_ref, acc_ref):
    """Tiled matmul with fused LeakyReLU, f32 accumulation."""
    k = pl.program_id(2)

    @pl.when(k == 0)
    def _():
        acc_ref[...] = jnp.zeros_like(acc_ref)

    acc_ref[...] += jnp.dot(a_ref[...], b_ref[...],
                            preferred_element_type=jnp.float32)

    @pl.when(k == pl.num_programs(2) - 1)
    def _():
        y = acc_ref[...]
        o_ref[...] = jnp.where(y >= 0, y, LEAKY_SLOPE * y)


def _mm_leaky_stats_kernel(a_ref, b_ref, y_ref, stats_ref, acc_ref):
    """Tiled matmul + LeakyReLU, plus per-column sum / sum-of-squares.

    Grid is (j, i, k) so the stats block (index (0, j)) stays VMEM-resident
    while all row tiles i (and k steps) for that column tile are processed.
    """
    i = pl.program_id(1)
    k = pl.program_id(2)
    nk = pl.num_programs(2)

    @pl.when(k == 0)
    def _():
        acc_ref[...] = jnp.zeros_like(acc_ref)

    @pl.when(jnp.logical_and(i == 0, k == 0))
    def _():
        stats_ref[...] = jnp.zeros_like(stats_ref)

    acc_ref[...] += jnp.dot(a_ref[...], b_ref[...],
                            preferred_element_type=jnp.float32)

    @pl.when(k == nk - 1)
    def _():
        acc = acc_ref[...]
        y = jnp.where(acc >= 0, acc, LEAKY_SLOPE * acc)
        y_ref[...] = y
        s1 = jnp.broadcast_to(jnp.sum(y, axis=0, keepdims=True), stats_ref.shape)
        s2 = jnp.broadcast_to(jnp.sum(y * y, axis=0, keepdims=True), stats_ref.shape)
        row = jax.lax.broadcasted_iota(jnp.int32, stats_ref.shape, 0)
        upd = jnp.where(row == 0, s1, jnp.where(row == 1, s2, 0.0))
        stats_ref[...] += upd


def _bn_apply_kernel(y_ref, stats_ref, g_ref, b_ref, o_ref, *, count):
    """Apply batch-norm given precomputed per-column sum (row 0) / sumsq (row 1)."""
    inv_n = 1.0 / count
    mean = stats_ref[0:1, :] * inv_n
    var = stats_ref[1:2, :] * inv_n - mean * mean
    var = jnp.maximum(var, 0.0)
    scale = jax.lax.rsqrt(var + BN_EPS) * g_ref[...]
    o_ref[...] = (y_ref[...] - mean) * scale + b_ref[...]


def _tail_kernel(flat_ref, fcw_ref, fcb_ref, g_ref, b_ref, hw_ref, hb_ref,
                 o_ref, acc_ref, *, batch):
    """Fused tail: Linear(8192,128)+bias+LeakyReLU+BatchNorm1d+[mean|logvar] heads.

    K-tiled over the 8192-wide reduction; epilogue runs on the last K step.
    Rows >= `batch` are zero padding and are masked out of the BN statistics.
    """
    k = pl.program_id(0)
    nk = pl.num_programs(0)

    @pl.when(k == 0)
    def _():
        acc_ref[...] = jnp.zeros_like(acc_ref)

    acc_ref[...] += jnp.dot(flat_ref[...], fcw_ref[...],
                            preferred_element_type=jnp.float32)

    @pl.when(k == nk - 1)
    def _():
        y = acc_ref[...] + fcb_ref[...]
        y = jnp.where(y >= 0, y, LEAKY_SLOPE * y)
        rows = jax.lax.broadcasted_iota(jnp.int32, y.shape, 0)
        mask = (rows < batch).astype(jnp.float32)
        ym = y * mask
        inv_b = 1.0 / batch
        mean = jnp.sum(ym, axis=0, keepdims=True) * inv_b
        var = jnp.sum(ym * ym, axis=0, keepdims=True) * inv_b - mean * mean
        var = jnp.maximum(var, 0.0)
        h = (y - mean) * jax.lax.rsqrt(var + BN_EPS) * g_ref[...] + b_ref[...]
        o_ref[...] = jnp.dot(h, hw_ref[...],
                             preferred_element_type=jnp.float32) + hb_ref[...]


# --------------------------- pallas_call wrappers --------------------------

def conv_layer(patches, w_flat, gamma=None, beta=None, *, tm=256, tn=256, tk=512):
    """(patches @ w_flat) -> LeakyReLU -> [optional BatchNorm].  Returns (M, N) f32."""
    M, K = patches.shape
    _, N = w_flat.shape
    tm_e = min(tm, _round_up(M, 8))
    tn_e = min(tn, _round_up(N, 128))
    tk_e = min(tk, K)
    Mp, Np, Kp = _round_up(M, tm_e), _round_up(N, tn_e), _round_up(K, tk_e)
    a_p = _pad2d(patches, Mp, Kp).astype(jnp.bfloat16)
    w_p = _pad2d(w_flat, Kp, Np).astype(jnp.bfloat16)
    ni, nj, nk = Mp // tm_e, Np // tn_e, Kp // tk_e

    if gamma is None:
        y = pl.pallas_call(
            _mm_leaky_kernel,
            grid_spec=pltpu.PrefetchScalarGridSpec(
                num_scalar_prefetch=0,
                grid=(ni, nj, nk),
                in_specs=[
                    pl.BlockSpec((tm_e, tk_e), lambda i, j, k: (i, k)),
                    pl.BlockSpec((tk_e, tn_e), lambda i, j, k: (k, j)),
                ],
                out_specs=pl.BlockSpec((tm_e, tn_e), lambda i, j, k: (i, j)),
                scratch_shapes=[pltpu.VMEM((tm_e, tn_e), jnp.float32)],
            ),
            out_shape=jax.ShapeDtypeStruct((Mp, Np), jnp.float32),
            compiler_params=pltpu.CompilerParams(
                dimension_semantics=("parallel", "parallel", "arbitrary")),
        )(a_p, w_p)
        return y[:M, :N]

    # Fused matmul + LeakyReLU + per-column BN statistics.
    y, stats = pl.pallas_call(
        _mm_leaky_stats_kernel,
        grid_spec=pltpu.PrefetchScalarGridSpec(
            num_scalar_prefetch=0,
            grid=(nj, ni, nk),  # column-tile outermost -> stats block stays resident
            in_specs=[
                pl.BlockSpec((tm_e, tk_e), lambda j, i, k: (i, k)),
                pl.BlockSpec((tk_e, tn_e), lambda j, i, k: (k, j)),
            ],
            out_specs=[
                pl.BlockSpec((tm_e, tn_e), lambda j, i, k: (i, j)),
                pl.BlockSpec((8, tn_e), lambda j, i, k: (0, j)),
            ],
            scratch_shapes=[pltpu.VMEM((tm_e, tn_e), jnp.float32)],
        ),
        out_shape=(
            jax.ShapeDtypeStruct((Mp, Np), jnp.float32),
            jax.ShapeDtypeStruct((8, Np), jnp.float32),
        ),
        compiler_params=pltpu.CompilerParams(
            dimension_semantics=("parallel", "arbitrary", "arbitrary")),
    )(a_p, w_p)

    g_p = _pad2d(gamma, 1, Np)
    b_p = _pad2d(beta, 1, Np)
    y_bn = pl.pallas_call(
        functools.partial(_bn_apply_kernel, count=float(M)),
        grid_spec=pltpu.PrefetchScalarGridSpec(
            num_scalar_prefetch=0,
            grid=(ni, nj),
            in_specs=[
                pl.BlockSpec((tm_e, tn_e), lambda i, j: (i, j)),
                pl.BlockSpec((8, tn_e), lambda i, j: (0, j)),
                pl.BlockSpec((1, tn_e), lambda i, j: (0, j)),
                pl.BlockSpec((1, tn_e), lambda i, j: (0, j)),
            ],
            out_specs=pl.BlockSpec((tm_e, tn_e), lambda i, j: (i, j)),
        ),
        out_shape=jax.ShapeDtypeStruct((Mp, Np), jnp.float32),
        compiler_params=pltpu.CompilerParams(
            dimension_semantics=("parallel", "parallel")),
    )(y, stats, g_p, b_p)
    return y_bn[:M, :N]


def tail_forward(flat, fc_w, fc_b, g, b, head_w, head_b, *, tk=512):
    """Fused Linear+LeakyReLU+BatchNorm1d+heads.  flat: (B, 8192) -> (B, 2*z)."""
    B, K = flat.shape
    Bp = _round_up(B, 8)
    N1 = fc_w.shape[1]                 # 128
    Nh = head_w.shape[1]               # 2 * z_dim
    Nhp = _round_up(Nh, 128)
    tk_e = min(tk, K)
    Kp = _round_up(K, tk_e)
    nk = Kp // tk_e

    flat_p = _pad2d(flat, Bp, Kp).astype(jnp.bfloat16)
    fcw_p = _pad2d(fc_w, Kp, N1).astype(jnp.bfloat16)
    hw_p = _pad2d(head_w, N1, Nhp)
    hb_p = _pad2d(head_b, 1, Nhp)

    out = pl.pallas_call(
        functools.partial(_tail_kernel, batch=int(B)),
        grid_spec=pltpu.PrefetchScalarGridSpec(
            num_scalar_prefetch=0,
            grid=(nk,),
            in_specs=[
                pl.BlockSpec((Bp, tk_e), lambda k: (0, k)),
                pl.BlockSpec((tk_e, N1), lambda k: (k, 0)),
                pl.BlockSpec((1, N1), lambda k: (0, 0)),
                pl.BlockSpec((1, N1), lambda k: (0, 0)),
                pl.BlockSpec((1, N1), lambda k: (0, 0)),
                pl.BlockSpec((N1, Nhp), lambda k: (0, 0)),
                pl.BlockSpec((1, Nhp), lambda k: (0, 0)),
            ],
            out_specs=pl.BlockSpec((Bp, Nhp), lambda k: (0, 0)),
            scratch_shapes=[pltpu.VMEM((Bp, N1), jnp.float32)],
        ),
        out_shape=jax.ShapeDtypeStruct((Bp, Nhp), jnp.float32),
        compiler_params=pltpu.CompilerParams(
            dimension_semantics=("arbitrary",)),
    )(flat_p, fcw_p, fc_b, g, b, hw_p, hb_p)
    return out[:B, :Nh]


# ------------------------------- JAX glue ---------------------------------

def im2col_nhwc(x, k=4, s=2, p=1):
    """x: (B, H, W, C) -> (B*Ho*Wo, k*k*C), column order (kh, kw, c)."""
    B, H, W, C = x.shape
    xp = jnp.pad(x, ((0, 0), (p, p), (p, p), (0, 0)))
    Ho = (H + 2 * p - k) // s + 1
    Wo = (W + 2 * p - k) // s + 1
    cols = []
    for i in range(k):
        for j in range(k):
            cols.append(xp[:, i:i + Ho * s:s, j:j + Wo * s:s, :])  # (B,Ho,Wo,C)
    patches = jnp.stack(cols, axis=3)                 # (B, Ho, Wo, k*k, C)
    return patches.reshape(B * Ho * Wo, k * k * C), Ho, Wo


def dirac_conv_weight_flat(cout, cin, k):
    """nn.init.dirac_ for Conv2d (cout,cin,k,k), flattened to (k*k*cin, cout)
    matching the (kh, kw, c) im2col column order."""
    w = jnp.zeros((cout, cin, k, k), dtype=jnp.float32)
    n = min(cout, cin)
    idx = jnp.arange(n)
    w = w.at[idx, idx, k // 2, k // 2].set(1.0)
    return w.transpose(2, 3, 1, 0).reshape(k * k * cin, cout)


def xavier_uniform(key, fan_in, fan_out):
    bound = (6.0 / (fan_in + fan_out)) ** 0.5
    return jax.random.uniform(key, (fan_in, fan_out), jnp.float32, -bound, bound)


def init_params(key, z_dim):
    k_fc, k_mu, k_lv = jax.random.split(key, 3)

    fc_w = xavier_uniform(k_fc, 512 * 4 * 4, 128)     # rows in PyTorch NCHW-flatten order
    # Fold PyTorch's NCHW flatten permutation into the weight once, so the
    # forward can flatten NHWC activations directly (no per-step transpose).
    fc_w = fc_w.reshape(512, 4, 4, 128).transpose(1, 2, 0, 3).reshape(512 * 16, 128)

    head_w = jnp.concatenate(
        [xavier_uniform(k_mu, 128, z_dim), xavier_uniform(k_lv, 128, z_dim)], axis=1)

    return {
        "w1": dirac_conv_weight_flat(64, 3, 4),          # (48, 64)
        "w2": dirac_conv_weight_flat(256, 64, 4),        # (1024, 256)
        "w3": dirac_conv_weight_flat(512, 256, 4),       # (4096, 512)
        "bn2_g": jnp.ones((1, 256), jnp.float32),
        "bn2_b": jnp.zeros((1, 256), jnp.float32),
        "bn3_g": jnp.ones((1, 512), jnp.float32),
        "bn3_b": jnp.zeros((1, 512), jnp.float32),
        "fc_w": fc_w,                                    # (8192, 128), NHWC row order
        "fc_b": jnp.full((1, 128), 0.01, jnp.float32),
        "bn1d_g": jnp.ones((1, 128), jnp.float32),
        "bn1d_b": jnp.zeros((1, 128), jnp.float32),
        "head_w": head_w,                                # (128, 2*z)
        "head_b": jnp.full((1, 2 * z_dim), 0.01, jnp.float32),
    }


def encoder_forward(x, params):
    """x: (B, 3, 32, 32) float32 (NCHW). Returns (mean, variance_log)."""
    B = x.shape[0]
    z = params["head_w"].shape[1] // 2
    x = jnp.transpose(x, (0, 2, 3, 1))                        # NHWC, once

    # conv1: Conv2d(3, 64, 4, 2, 1) + LeakyReLU(0.2)
    p1, h1, w1 = im2col_nhwc(x)                               # (B*256, 48)
    a1 = conv_layer(p1, params["w1"]).reshape(B, h1, w1, 64)

    # conv2: Conv2d(64, 256, 4, 2, 1) + LeakyReLU + BatchNorm2d(256)
    p2, h2, w2 = im2col_nhwc(a1)                              # (B*64, 1024)
    a2 = conv_layer(p2, params["w2"], params["bn2_g"],
                    params["bn2_b"]).reshape(B, h2, w2, 256)

    # conv3: Conv2d(256, 512, 4, 2, 1) + LeakyReLU + BatchNorm2d(512)
    p3, h3, w3 = im2col_nhwc(a2)                              # (B*16, 4096)
    y3 = conv_layer(p3, params["w3"], params["bn3_g"], params["bn3_b"])

    # Flatten (NHWC order; the NCHW permutation is folded into fc_w at init).
    flat = y3.reshape(B, h3 * w3 * 512)                       # (B, 8192)

    # Fused Linear(8192,128)+LeakyReLU+BatchNorm1d(128)+mean/logvar heads.
    out = tail_forward(flat, params["fc_w"], params["fc_b"],
                       params["bn1d_g"], params["bn1d_b"],
                       params["head_w"], params["head_b"])    # (B, 2*z)
    return out[:, :z], out[:, z:]


if __name__ == "__main__":
    key = jax.random.PRNGKey(0)
    k_x, k_p = jax.random.split(key)
    # CIFAR-10 shaped input (required by the Linear(512*4*4, 128) in the module).
    x = jax.random.normal(k_x, (2, 3, 32, 32), dtype=jnp.float32)
    params = init_params(k_p, Z_DIM)

    fwd = jax.jit(encoder_forward)
    mu, logvar = fwd(x, params)
    jax.block_until_ready((mu, logvar))
    assert mu.shape == (2, Z_DIM) and logvar.shape == (2, Z_DIM)
    assert bool(jnp.all(jnp.isfinite(mu))) and bool(jnp.all(jnp.isfinite(logvar)))
    print("KERNEL_OK")
</pallas_src>

<mosaic_0001>
module attributes {stable_mosaic.version = 11 : i64} {
  func.func @_mm_leaky_kernel(%arg0: i32, %arg1: i32, %arg2: i32, %arg3: memref<256x48xbf16, #tpu.memory_space<vmem>>, %arg4: memref<48x128xbf16, #tpu.memory_space<vmem>>, %arg5: memref<256x128xf32, #tpu.memory_space<vmem>>, %arg6: memref<256x128xf32, #tpu.memory_space<vmem>>) attributes {dimension_semantics = [#tpu.dimension_semantics<parallel>, #tpu.dimension_semantics<parallel>, #tpu.dimension_semantics<arbitrary>], iteration_bounds = array<i64: 2, 1, 1>, scalar_prefetch = 0 : i64, scratch_operands = 1 : i64, tpu.core_type = #tpu.core_type<tc>, window_params = [{transform_indices = @transform_0, window_bounds = array<i64: 256, 48>}, {transform_indices = @transform_1, window_bounds = array<i64: 48, 128>}, {transform_indices = @transform_2, window_bounds = array<i64: 256, 128>}]} {
    %c0_i32 = arith.constant 0 : i32
    %0 = arith.cmpi eq, %arg2, %c0_i32 : i32
    %1 = arith.extui %0 : i1 to i32
    %c0_i32_0 = arith.constant 0 : i32
    %2 = arith.cmpi ne, %1, %c0_i32_0 : i32
    scf.if %2 {
      %cst_10 = arith.constant 0.000000e+00 : f32
      %12 = vector.broadcast %cst_10 : f32 to vector<256x128xf32>
      %c0_11 = arith.constant 0 : index
      %c0_12 = arith.constant 0 : index
      %13 = vector.load %arg6[%c0_11, %c0_12] : memref<256x128xf32, #tpu.memory_space<vmem>>, vector<256x128xf32>
      tpu.vector_store %arg6[%c0_11, %c0_12], %12 {strides = array<i32>} : memref<256x128xf32, #tpu.memory_space<vmem>>, vector<256x128xf32>,
    } else {
    }
    %c0 = arith.constant 0 : index
    %c0_1 = arith.constant 0 : index
    %3 = vector.load %arg6[%c0, %c0_1] : memref<256x128xf32, #tpu.memory_space<vmem>>, vector<256x128xf32>
    %c0_2 = arith.constant 0 : index
    %c0_3 = arith.constant 0 : index
    %4 = vector.load %arg3[%c0_2, %c0_3] : memref<256x48xbf16, #tpu.memory_space<vmem>>, vector<256x48xbf16>
    %c0_4 = arith.constant 0 : index
    %c0_5 = arith.constant 0 : index
    %5 = vector.load %arg4[%c0_4, %c0_5] : memref<48x128xbf16, #tpu.memory_space<vmem>>, vector<48x128xbf16>
    %cst = arith.constant dense<0.000000e+00> : vector<256x128xf32>
    %6 = tpu.matmul %4, %5, %cst {dimension_numbers = #tpu.dot_dimension_numbers<[1], [0], [0], [1], [0, 0, 1, 1], [], []>} : vector<256x48xbf16>, vector<48x128xbf16>, vector<256x128xf32> -> vector<256x128xf32>
    %7 = arith.addf %3, %6 : vector<256x128xf32>
    %c0_6 = arith.constant 0 : index
    %c0_7 = arith.constant 0 : index
    %8 = vector.load %arg6[%c0_6, %c0_7] : memref<256x128xf32, #tpu.memory_space<vmem>>, vector<256x128xf32>
    tpu.vector_store %arg6[%c0_6, %c0_7], %7 {strides = array<i32>} : memref<256x128xf32, #tpu.memory_space<vmem>>, vector<256x128xf32>,
    %c0_i32_8 = arith.constant 0 : i32
    %9 = arith.cmpi eq, %arg2, %c0_i32_8 : i32
    %10 = arith.extui %9 : i1 to i32
    %c0_i32_9 = arith.constant 0 : i32
    %11 = arith.cmpi ne, %10, %c0_i32_9 : i32
    scf.if %11 {
      %c0_10 = arith.constant 0 : index
      %c0_11 = arith.constant 0 : index
      %12 = vector.load %arg6[%c0_10, %c0_11] : memref<256x128xf32, #tpu.memory_space<vmem>>, vector<256x128xf32>
      %cst_12 = arith.constant 0.000000e+00 : f32
      %13 = vector.broadcast %cst_12 : f32 to vector<256x128xf32>
      %14 = arith.cmpf oge, %12, %13 : vector<256x128xf32>
      %cst_13 = arith.constant 2.000000e-01 : f32
      %15 = vector.broadcast %cst_13 : f32 to vector<256x128xf32>
      %16 = arith.mulf %15, %12 : vector<256x128xf32>
      %17 = arith.select %14, %12, %16 : vector<256x128xi1>, vector<256x128xf32>
      %c0_14 = arith.constant 0 : index
      %c0_15 = arith.constant 0 : index
      %18 = vector.load %arg5[%c0_14, %c0_15] : memref<256x128xf32, #tpu.memory_space<vmem>>, vector<256x128xf32>
      tpu.vector_store %arg5[%c0_14, %c0_15], %17 {strides = array<i32>} : memref<256x128xf32, #tpu.memory_space<vmem>>, vector<256x128xf32>,
    } else {
    }
    return
  }
  func.func @transform_0(%arg0: i32, %arg1: i32, %arg2: i32) -> (i32, i32) {
    %c0_i32 = arith.constant 0 : i32
    return %arg0, %arg2 : i32, i32
  }
  func.func @transform_1(%arg0: i32, %arg1: i32, %arg2: i32) -> (i32, i32) {
    %c0_i32 = arith.constant 0 : i32
    return %arg2, %arg1 : i32, i32
  }
  func.func @transform_2(%arg0: i32, %arg1: i32, %arg2: i32) -> (i32, i32) {
    %c0_i32 = arith.constant 0 : i32
    return %arg0, %arg1 : i32, i32
  }
}

module attributes {stable_mosaic.version = 11 : i64} {
  func.func @_mm_leaky_stats_kernel(%arg0: i32, %arg1: i32, %arg2: i32, %arg3: memref<128x512xbf16, #tpu.memory_space<vmem>>, %arg4: memref<512x256xbf16, #tpu.memory_space<vmem>>, %arg5: memref<128x256xf32, #tpu.memory_space<vmem>>, %arg6: memref<8x256xf32, #tpu.memory_space<vmem>>, %arg7: memref<128x256xf32, #tpu.memory_space<vmem>>) attributes {dimension_semantics = [#tpu.dimension_semantics<parallel>, #tpu.dimension_semantics<arbitrary>, #tpu.dimension_semantics<arbitrary>], iteration_bounds = array<i64: 1, 1, 2>, scalar_prefetch = 0 : i64, scratch_operands = 1 : i64, tpu.core_type = #tpu.core_type<tc>, window_params = [{transform_indices = @transform_0, window_bounds = array<i64: 128, 512>}, {transform_indices = @transform_1, window_bounds = array<i64: 512, 256>}, {transform_indices = @transform_2, window_bounds = array<i64: 128, 256>}, {transform_indices = @transform_3, window_bounds = array<i64: 8, 256>}]} {
    %c0_i32 = arith.constant 0 : i32
    %0 = arith.cmpi eq, %arg2, %c0_i32 : i32
    %1 = arith.extui %0 : i1 to i32
    %c0_i32_0 = arith.constant 0 : i32
    %2 = arith.cmpi ne, %1, %c0_i32_0 : i32
    scf.if %2 {
      %cst_12 = arith.constant 0.000000e+00 : f32
      %17 = vector.broadcast %cst_12 : f32 to vector<128x256xf32>
      %c0_13 = arith.constant 0 : index
      %c0_14 = arith.constant 0 : index
      %18 = vector.load %arg7[%c0_13, %c0_14] : memref<128x256xf32, #tpu.memory_space<vmem>>, vector<128x256xf32>
      tpu.vector_store %arg7[%c0_13, %c0_14], %17 {strides = array<i32>} : memref<128x256xf32, #tpu.memory_space<vmem>>, vector<128x256xf32>,
    } else {
    }
    %c0_i32_1 = arith.constant 0 : i32
    %3 = arith.cmpi eq, %arg1, %c0_i32_1 : i32
    %c0_i32_2 = arith.constant 0 : i32
    %4 = arith.cmpi eq, %arg2, %c0_i32_2 : i32
    %5 = arith.andi %3, %4 : i1
    %6 = arith.extui %5 : i1 to i32
    %c0_i32_3 = arith.constant 0 : i32
    %7 = arith.cmpi ne, %6, %c0_i32_3 : i32
    scf.if %7 {
      %cst_12 = arith.constant 0.000000e+00 : f32
      %17 = vector.broadcast %cst_12 : f32 to vector<8x256xf32>
      %c0_13 = arith.constant 0 : index
      %c0_14 = arith.constant 0 : index
      %18 = vector.load %arg6[%c0_13, %c0_14] : memref<8x256xf32, #tpu.memory_space<vmem>>, vector<8x256xf32>
      tpu.vector_store %arg6[%c0_13, %c0_14], %17 {strides = array<i32>} : memref<8x256xf32, #tpu.memory_space<vmem>>, vector<8x256xf32>,
    } else {
    }
    %c0 = arith.constant 0 : index
    %c0_4 = arith.constant 0 : index
    %8 = vector.load %arg7[%c0, %c0_4] : memref<128x256xf32, #tpu.memory_space<vmem>>, vector<128x256xf32>
    %c0_5 = arith.constant 0 : index
    %c0_6 = arith.constant 0 : index
    %9 = vector.load %arg3[%c0_5, %c0_6] : memref<128x512xbf16, #tpu.memory_space<vmem>>, vector<128x512xbf16>
    %c0_7 = arith.constant 0 : index
    %c0_8 = arith.constant 0 : index
    %10 = vector.load %arg4[%c0_7, %c0_8] : memref<512x256xbf16, #tpu.memory_space<vmem>>, vector<512x256xbf16>
    %cst = arith.constant dense<0.000000e+00> : vector<128x256xf32>
    %11 = tpu.matmul %9, %10, %cst {dimension_numbers = #tpu.dot_dimension_numbers<[1], [0], [0], [1], [0, 0, 1, 1], [], []>} : vector<128x512xbf16>, vector<512x256xbf16>, vector<128x256xf32> -> vector<128x256xf32>
    %12 = arith.addf %8, %11 : vector<128x256xf32>
    %c0_9 = arith.constant 0 : index
    %c0_10 = arith.constant 0 : index
    %13 = vector.load %arg7[%c0_9, %c0_10] : memref<128x256xf32, #tpu.memory_space<vmem>>, vector<128x256xf32>
    tpu.vector_store %arg7[%c0_9, %c0_10], %12 {strides = array<i32>} : memref<128x256xf32, #tpu.memory_space<vmem>>, vector<128x256xf32>,
    %c1_i32 = arith.constant 1 : i32
    %14 = arith.cmpi eq, %arg2, %c1_i32 : i32
    %15 = arith.extui %14 : i1 to i32
    %c0_i32_11 = arith.constant 0 : i32
    %16 = arith.cmpi ne, %15, %c0_i32_11 : i32
    scf.if %16 {
      %c0_12 = arith.constant 0 : index
      %c0_13 = arith.constant 0 : index
      %17 = vector.load %arg7[%c0_12, %c0_13] : memref<128x256xf32, #tpu.memory_space<vmem>>, vector<128x256xf32>
      %cst_14 = arith.constant 0.000000e+00 : f32
      %18 = vector.broadcast %cst_14 : f32 to vector<128x256xf32>
      %19 = arith.cmpf oge, %17, %18 : vector<128x256xf32>
      %cst_15 = arith.constant 2.000000e-01 : f32
      %20 = vector.broadcast %cst_15 : f32 to vector<128x256xf32>
      %21 = arith.mulf %20, %17 : vector<128x256xf32>
      %22 = arith.select %19, %17, %21 : vector<128x256xi1>, vector<128x256xf32>
      %c0_16 = arith.constant 0 : index
      %c0_17 = arith.constant 0 : index
      %23 = vector.load %arg5[%c0_16, %c0_17] : memref<128x256xf32, #tpu.memory_space<vmem>>, vector<128x256xf32>
      tpu.vector_store %arg5[%c0_16, %c0_17], %22 {strides = array<i32>} : memref<128x256xf32, #tpu.memory_space<vmem>>, vector<128x256xf32>,
      %cst_18 = arith.constant dense<0.000000e+00> : vector<256xf32>
      %24 = vector.multi_reduction <add>, %22, %cst_18 [0] : vector<128x256xf32> to vector<256xf32>
      %25 = vector.shape_cast %24 : vector<256xf32> to vector<1x256xf32>
      %26 = vector.shape_cast %25 : vector<1x256xf32> to vector<1x256xf32>
      %27 = vector.broadcast %26 : vector<1x256xf32> to vector<8x256xf32>
      %28 = arith.mulf %22, %22 : vector<128x256xf32>
      %cst_19 = arith.constant dense<0.000000e+00> : vector<256xf32>
      %29 = vector.multi_reduction <add>, %28, %cst_19 [0] : vector<128x256xf32> to vector<256xf32>
      %30 = vector.shape_cast %29 : vector<256xf32> to vector<1x256xf32>
      %31 = vector.shape_cast %30 : vector<1x256xf32> to vector<1x256xf32>
      %32 = vector.broadcast %31 : vector<1x256xf32> to vector<8x256xf32>
      %33 = tpu.iota {dimensions = array<i32: 0>} : vector<8x256xi32>
      %c0_i32_20 = arith.constant 0 : i32
      %34 = vector.broadcast %c0_i32_20 : i32 to vector<8x256xi32>
      %35 = arith.cmpi eq, %33, %34 : vector<8x256xi32>
      %c1_i32_21 = arith.constant 1 : i32
      %36 = vector.broadcast %c1_i32_21 : i32 to vector<8x256xi32>
      %37 = arith.cmpi eq, %33, %36 : vector<8x256xi32>
      %cst_22 = arith.constant 0.000000e+00 : f32
      %38 = vector.broadcast %cst_22 : f32 to vector<8x256xf32>
      %39 = arith.select %37, %32, %38 : vector<8x256xi1>, vector<8x256xf32>
      %40 = arith.select %35, %27, %39 : vector<8x256xi1>, vector<8x256xf32>
      %c0_23 = arith.constant 0 : index
      %c0_24 = arith.constant 0 : index
      %41 = vector.load %arg6[%c0_23, %c0_24] : memref<8x256xf32, #tpu.memory_space<vmem>>, vector<8x256xf32>
      %42 = arith.addf %41, %40 : vector<8x256xf32>
      %c0_25 = arith.constant 0 : index
      %c0_26 = arith.constant 0 : index
      %43 = vector.load %arg6[%c0_25, %c0_26] : memref<8x256xf32, #tpu.memory_space<vmem>>, vector<8x256xf32>
      tpu.vector_store %arg6[%c0_25, %c0_26], %42 {strides = array<i32>} : memref<8x256xf32, #tpu.memory_space<vmem>>, vector<8x256xf32>,
    } else {
    }
    return
  }
  func.func @transform_0(%arg0: i32, %arg1: i32, %arg2: i32) -> (i32, i32) {
    %c0_i32 = arith.constant 0 : i32
    return %arg1, %arg2 : i32, i32
  }
  func.func @transform_1(%arg0: i32, %arg1: i32, %arg2: i32) -> (i32, i32) {
    %c0_i32 = arith.constant 0 : i32
    return %arg2, %arg0 : i32, i32
  }
  func.func @transform_2(%arg0: i32, %arg1: i32, %arg2: i32) -> (i32, i32) {
    %c0_i32 = arith.constant 0 : i32
    return %arg1, %arg0 : i32, i32
  }
  func.func @transform_3(%arg0: i32, %arg1: i32, %arg2: i32) -> (i32, i32) {
    %c0_i32 = arith.constant 0 : i32
    %c0_i32_0 = arith.constant 0 : i32
    return %c0_i32, %arg0 : i32, i32
  }
}

module attributes {stable_mosaic.version = 11 : i64} {
  func.func @_bn_apply_kernel(%arg0: i32, %arg1: i32, %arg2: memref<128x256xf32, #tpu.memory_space<vmem>>, %arg3: memref<8x256xf32, #tpu.memory_space<vmem>>, %arg4: memref<1x256xf32, #tpu.memory_space<vmem>>, %arg5: memref<1x256xf32, #tpu.memory_space<vmem>>, %arg6: memref<128x256xf32, #tpu.memory_space<vmem>>) attributes {dimension_semantics = [#tpu.dimension_semantics<parallel>, #tpu.dimension_semantics<parallel>], iteration_bounds = array<i64: 1, 1>, scalar_prefetch = 0 : i64, scratch_operands = 0 : i64, tpu.core_type = #tpu.core_type<tc>, window_params = [{transform_indices = @transform_0, window_bounds = array<i64: 128, 256>}, {transform_indices = @transform_1, window_bounds = array<i64: 8, 256>}, {transform_indices = @transform_2, window_bounds = array<i64: 1, 256>}, {transform_indices = @transform_3, window_bounds = array<i64: 1, 256>}, {transform_indices = @transform_4, window_bounds = array<i64: 128, 256>}]} {
    %c0 = arith.constant 0 : index
    %c0_0 = arith.constant 0 : index
    %0 = vector.load %arg3[%c0, %c0_0] : memref<8x256xf32, #tpu.memory_space<vmem>>, vector<1x256xf32>
    %cst = arith.constant 7.812500e-03 : f32
    %1 = vector.broadcast %cst : f32 to vector<1x256xf32>
    %2 = arith.mulf %0, %1 : vector<1x256xf32>
    %c1 = arith.constant 1 : index
    %c0_1 = arith.constant 0 : index
    %3 = vector.load %arg3[%c1, %c0_1] : memref<8x256xf32, #tpu.memory_space<vmem>>, vector<1x256xf32>
    %cst_2 = arith.constant 7.812500e-03 : f32
    %4 = vector.broadcast %cst_2 : f32 to vector<1x256xf32>
    %5 = arith.mulf %3, %4 : vector<1x256xf32>
    %6 = arith.mulf %2, %2 : vector<1x256xf32>
    %7 = arith.subf %5, %6 : vector<1x256xf32>
    %cst_3 = arith.constant 0.000000e+00 : f32
    %8 = vector.broadcast %cst_3 : f32 to vector<1x256xf32>
    %9 = arith.maximumf %7, %8 : vector<1x256xf32>
    %cst_4 = arith.constant 9.99999974E-6 : f32
    %10 = vector.broadcast %cst_4 : f32 to vector<1x256xf32>
    %11 = arith.addf %9, %10 : vector<1x256xf32>
    %12 = math.rsqrt %11 : vector<1x256xf32>
    %c0_5 = arith.constant 0 : index
    %c0_6 = arith.constant 0 : index
    %13 = vector.load %arg4[%c0_5, %c0_6] : memref<1x256xf32, #tpu.memory_space<vmem>>, vector<1x256xf32>
    %14 = arith.mulf %12, %13 : vector<1x256xf32>
    %c0_7 = arith.constant 0 : index
    %c0_8 = arith.constant 0 : index
    %15 = vector.load %arg2[%c0_7, %c0_8] : memref<128x256xf32, #tpu.memory_space<vmem>>, vector<128x256xf32>
    %16 = vector.broadcast %2 : vector<1x256xf32> to vector<128x256xf32>
    %17 = arith.subf %15, %16 : vector<128x256xf32>
    %18 = vector.broadcast %14 : vector<1x256xf32> to vector<128x256xf32>
    %19 = arith.mulf %17, %18 : vector<128x256xf32>
    %c0_9 = arith.constant 0 : index
    %c0_10 = arith.constant 0 : index
    %20 = vector.load %arg5[%c0_9, %c0_10] : memref<1x256xf32, #tpu.memory_space<vmem>>, vector<1x256xf32>
    %21 = vector.broadcast %20 : vector<1x256xf32> to vector<128x256xf32>
    %22 = arith.addf %19, %21 : vector<128x256xf32>
    %c0_11 = arith.constant 0 : index
    %c0_12 = arith.constant 0 : index
    %23 = vector.load %arg6[%c0_11, %c0_12] : memref<128x256xf32, #tpu.memory_space<vmem>>, vector<128x256xf32>
    tpu.vector_store %arg6[%c0_11, %c0_12], %22 {strides = array<i32>} : memref<128x256xf32, #tpu.memory_space<vmem>>, vector<128x256xf32>,
    return
  }
  func.func @transform_0(%arg0: i32, %arg1: i32) -> (i32, i32) {
    %c0_i32 = arith.constant 0 : i32
    return %arg0, %arg1 : i32, i32
  }
  func.func @transform_1(%arg0: i32, %arg1: i32) -> (i32, i32) {
    %c0_i32 = arith.constant 0 : i32
    %c0_i32_0 = arith.constant 0 : i32
    return %c0_i32, %arg1 : i32, i32
  }
  func.func @transform_2(%arg0: i32, %arg1: i32) -> (i32, i32) {
    %c0_i32 = arith.constant 0 : i32
    %c0_i32_0 = arith.constant 0 : i32
    return %c0_i32, %arg1 : i32, i32
  }
  func.func @transform_3(%arg0: i32, %arg1: i32) -> (i32, i32) {
    %c0_i32 = arith.constant 0 : i32
    %c0_i32_0 = arith.constant 0 : i32
    return %c0_i32, %arg1 : i32, i32
  }
  func.func @transform_4(%arg0: i32, %arg1: i32) -> (i32, i32) {
    %c0_i32 = arith.constant 0 : i32
    return %arg0, %arg1 : i32, i32
  }
}

module attributes {stable_mosaic.version = 11 : i64} {
  func.func @_mm_leaky_stats_kernel(%arg0: i32, %arg1: i32, %arg2: i32, %arg3: memref<32x512xbf16, #tpu.memory_space<vmem>>, %arg4: memref<512x256xbf16, #tpu.memory_space<vmem>>, %arg5: memref<32x256xf32, #tpu.memory_space<vmem>>, %arg6: memref<8x256xf32, #tpu.memory_space<vmem>>, %arg7: memref<32x256xf32, #tpu.memory_space<vmem>>) attributes {dimension_semantics = [#tpu.dimension_semantics<parallel>, #tpu.dimension_semantics<arbitrary>, #tpu.dimension_semantics<arbitrary>], iteration_bounds = array<i64: 2, 1, 8>, scalar_prefetch = 0 : i64, scratch_operands = 1 : i64, tpu.core_type = #tpu.core_type<tc>, window_params = [{transform_indices = @transform_0, window_bounds = array<i64: 32, 512>}, {transform_indices = @transform_1, window_bounds = array<i64: 512, 256>}, {transform_indices = @transform_2, window_bounds = array<i64: 32, 256>}, {transform_indices = @transform_3, window_bounds = array<i64: 8, 256>}]} {
    %c0_i32 = arith.constant 0 : i32
    %0 = arith.cmpi eq, %arg2, %c0_i32 : i32
    %1 = arith.extui %0 : i1 to i32
    %c0_i32_0 = arith.constant 0 : i32
    %2 = arith.cmpi ne, %1, %c0_i32_0 : i32
    scf.if %2 {
      %cst_12 = arith.constant 0.000000e+00 : f32
      %17 = vector.broadcast %cst_12 : f32 to vector<32x256xf32>
      %c0_13 = arith.constant 0 : index
      %c0_14 = arith.constant 0 : index
      %18 = vector.load %arg7[%c0_13, %c0_14] : memref<32x256xf32, #tpu.memory_space<vmem>>, vector<32x256xf32>
      tpu.vector_store %arg7[%c0_13, %c0_14], %17 {strides = array<i32>} : memref<32x256xf32, #tpu.memory_space<vmem>>, vector<32x256xf32>,
    } else {
    }
    %c0_i32_1 = arith.constant 0 : i32
    %3 = arith.cmpi eq, %arg1, %c0_i32_1 : i32
    %c0_i32_2 = arith.constant 0 : i32
    %4 = arith.cmpi eq, %arg2, %c0_i32_2 : i32
    %5 = arith.andi %3, %4 : i1
    %6 = arith.extui %5 : i1 to i32
    %c0_i32_3 = arith.constant 0 : i32
    %7 = arith.cmpi ne, %6, %c0_i32_3 : i32
    scf.if %7 {
      %cst_12 = arith.constant 0.000000e+00 : f32
      %17 = vector.broadcast %cst_12 : f32 to vector<8x256xf32>
      %c0_13 = arith.constant 0 : index
      %c0_14 = arith.constant 0 : index
      %18 = vector.load %arg6[%c0_13, %c0_14] : memref<8x256xf32, #tpu.memory_space<vmem>>, vector<8x256xf32>
      tpu.vector_store %arg6[%c0_13, %c0_14], %17 {strides = array<i32>} : memref<8x256xf32, #tpu.memory_space<vmem>>, vector<8x256xf32>,
    } else {
    }
    %c0 = arith.constant 0 : index
    %c0_4 = arith.constant 0 : index
    %8 = vector.load %arg7[%c0, %c0_4] : memref<32x256xf32, #tpu.memory_space<vmem>>, vector<32x256xf32>
    %c0_5 = arith.constant 0 : index
    %c0_6 = arith.constant 0 : index
    %9 = vector.load %arg3[%c0_5, %c0_6] : memref<32x512xbf16, #tpu.memory_space<vmem>>, vector<32x512xbf16>
    %c0_7 = arith.constant 0 : index
    %c0_8 = arith.constant 0 : index
    %10 = vector.load %arg4[%c0_7, %c0_8] : memref<512x256xbf16, #tpu.memory_space<vmem>>, vector<512x256xbf16>
    %cst = arith.constant dense<0.000000e+00> : vector<32x256xf32>
    %11 = tpu.matmul %9, %10, %cst {dimension_numbers = #tpu.dot_dimension_numbers<[1], [0], [0], [1], [0, 0, 1, 1], [], []>} : vector<32x512xbf16>, vector<512x256xbf16>, vector<32x256xf32> -> vector<32x256xf32>
    %12 = arith.addf %8, %11 : vector<32x256xf32>
    %c0_9 = arith.constant 0 : index
    %c0_10 = arith.constant 0 : index
    %13 = vector.load %arg7[%c0_9, %c0_10] : memref<32x256xf32, #tpu.memory_space<vmem>>, vector<32x256xf32>
    tpu.vector_store %arg7[%c0_9, %c0_10], %12 {strides = array<i32>} : memref<32x256xf32, #tpu.memory_space<vmem>>, vector<32x256xf32>,
    %c7_i32 = arith.constant 7 : i32
    %14 = arith.cmpi eq, %arg2, %c7_i32 : i32
    %15 = arith.extui %14 : i1 to i32
    %c0_i32_11 = arith.constant 0 : i32
    %16 = arith.cmpi ne, %15, %c0_i32_11 : i32
    scf.if %16 {
      %c0_12 = arith.constant 0 : index
      %c0_13 = arith.constant 0 : index
      %17 = vector.load %arg7[%c0_12, %c0_13] : memref<32x256xf32, #tpu.memory_space<vmem>>, vector<32x256xf32>
      %cst_14 = arith.constant 0.000000e+00 : f32
      %18 = vector.broadcast %cst_14 : f32 to vector<32x256xf32>
      %19 = arith.cmpf oge, %17, %18 : vector<32x256xf32>
      %cst_15 = arith.constant 2.000000e-01 : f32
      %20 = vector.broadcast %cst_15 : f32 to vector<32x256xf32>
      %21 = arith.mulf %20, %17 : vector<32x256xf32>
      %22 = arith.select %19, %17, %21 : vector<32x256xi1>, vector<32x256xf32>
      %c0_16 = arith.constant 0 : index
      %c0_17 = arith.constant 0 : index
      %23 = vector.load %arg5[%c0_16, %c0_17] : memref<32x256xf32, #tpu.memory_space<vmem>>, vector<32x256xf32>
      tpu.vector_store %arg5[%c0_16, %c0_17], %22 {strides = array<i32>} : memref<32x256xf32, #tpu.memory_space<vmem>>, vector<32x256xf32>,
      %cst_18 = arith.constant dense<0.000000e+00> : vector<256xf32>
      %24 = vector.multi_reduction <add>, %22, %cst_18 [0] : vector<32x256xf32> to vector<256xf32>
      %25 = vector.shape_cast %24 : vector<256xf32> to vector<1x256xf32>
      %26 = vector.shape_cast %25 : vector<1x256xf32> to vector<1x256xf32>
      %27 = vector.broadcast %26 : vector<1x256xf32> to vector<8x256xf32>
      %28 = arith.mulf %22, %22 : vector<32x256xf32>
      %cst_19 = arith.constant dense<0.000000e+00> : vector<256xf32>
      %29 = vector.multi_reduction <add>, %28, %cst_19 [0] : vector<32x256xf32> to vector<256xf32>
      %30 = vector.shape_cast %29 : vector<256xf32> to vector<1x256xf32>
      %31 = vector.shape_cast %30 : vector<1x256xf32> to vector<1x256xf32>
      %32 = vector.broadcast %31 : vector<1x256xf32> to vector<8x256xf32>
      %33 = tpu.iota {dimensions = array<i32: 0>} : vector<8x256xi32>
      %c0_i32_20 = arith.constant 0 : i32
      %34 = vector.broadcast %c0_i32_20 : i32 to vector<8x256xi32>
      %35 = arith.cmpi eq, %33, %34 : vector<8x256xi32>
      %c1_i32 = arith.constant 1 : i32
      %36 = vector.broadcast %c1_i32 : i32 to vector<8x256xi32>
      %37 = arith.cmpi eq, %33, %36 : vector<8x256xi32>
      %cst_21 = arith.constant 0.000000e+00 : f32
      %38 = vector.broadcast %cst_21 : f32 to vector<8x256xf32>
      %39 = arith.select %37, %32, %38 : vector<8x256xi1>, vector<8x256xf32>
      %40 = arith.select %35, %27, %39 : vector<8x256xi1>, vector<8x256xf32>
      %c0_22 = arith.constant 0 : index
      %c0_23 = arith.constant 0 : index
      %41 = vector.load %arg6[%c0_22, %c0_23] : memref<8x256xf32, #tpu.memory_space<vmem>>, vector<8x256xf32>
      %42 = arith.addf %41, %40 : vector<8x256xf32>
      %c0_24 = arith.constant 0 : index
      %c0_25 = arith.constant 0 : index
      %43 = vector.load %arg6[%c0_24, %c0_25] : memref<8x256xf32, #tpu.memory_space<vmem>>, vector<8x256xf32>
      tpu.vector_store %arg6[%c0_24, %c0_25], %42 {strides = array<i32>} : memref<8x256xf32, #tpu.memory_space<vmem>>, vector<8x256xf32>,
    } else {
    }
    return
  }
  func.func @transform_0(%arg0: i32, %arg1: i32, %arg2: i32) -> (i32, i32) {
    %c0_i32 = arith.constant 0 : i32
    return %arg1, %arg2 : i32, i32
  }
  func.func @transform_1(%arg0: i32, %arg1: i32, %arg2: i32) -> (i32, i32) {
    %c0_i32 = arith.constant 0 : i32
    return %arg2, %arg0 : i32, i32
  }
  func.func @transform_2(%arg0: i32, %arg1: i32, %arg2: i32) -> (i32, i32) {
    %c0_i32 = arith.constant 0 : i32
    return %arg1, %arg0 : i32, i32
  }
  func.func @transform_3(%arg0: i32, %arg1: i32, %arg2: i32) -> (i32, i32) {
    %c0_i32 = arith.constant 0 : i32
    %c0_i32_0 = arith.constant 0 : i32
    return %c0_i32, %arg0 : i32, i32
  }
}

module attributes {stable_mosaic.version = 11 : i64} {
  func.func @_bn_apply_kernel(%arg0: i32, %arg1: i32, %arg2: memref<32x256xf32, #tpu.memory_space<vmem>>, %arg3: memref<8x256xf32, #tpu.memory_space<vmem>>, %arg4: memref<1x256xf32, #tpu.memory_space<vmem>>, %arg5: memref<1x256xf32, #tpu.memory_space<vmem>>, %arg6: memref<32x256xf32, #tpu.memory_space<vmem>>) attributes {dimension_semantics = [#tpu.dimension_semantics<parallel>, #tpu.dimension_semantics<parallel>], iteration_bounds = array<i64: 1, 2>, scalar_prefetch = 0 : i64, scratch_operands = 0 : i64, tpu.core_type = #tpu.core_type<tc>, window_params = [{transform_indices = @transform_0, window_bounds = array<i64: 32, 256>}, {transform_indices = @transform_1, window_bounds = array<i64: 8, 256>}, {transform_indices = @transform_2, window_bounds = array<i64: 1, 256>}, {transform_indices = @transform_3, window_bounds = array<i64: 1, 256>}, {transform_indices = @transform_4, window_bounds = array<i64: 32, 256>}]} {
    %c0 = arith.constant 0 : index
    %c0_0 = arith.constant 0 : index
    %0 = vector.load %arg3[%c0, %c0_0] : memref<8x256xf32, #tpu.memory_space<vmem>>, vector<1x256xf32>
    %cst = arith.constant 3.125000e-02 : f32
    %1 = vector.broadcast %cst : f32 to vector<1x256xf32>
    %2 = arith.mulf %0, %1 : vector<1x256xf32>
    %c1 = arith.constant 1 : index
    %c0_1 = arith.constant 0 : index
    %3 = vector.load %arg3[%c1, %c0_1] : memref<8x256xf32, #tpu.memory_space<vmem>>, vector<1x256xf32>
    %cst_2 = arith.constant 3.125000e-02 : f32
    %4 = vector.broadcast %cst_2 : f32 to vector<1x256xf32>
    %5 = arith.mulf %3, %4 : vector<1x256xf32>
    %6 = arith.mulf %2, %2 : vector<1x256xf32>
    %7 = arith.subf %5, %6 : vector<1x256xf32>
    %cst_3 = arith.constant 0.000000e+00 : f32
    %8 = vector.broadcast %cst_3 : f32 to vector<1x256xf32>
    %9 = arith.maximumf %7, %8 : vector<1x256xf32>
    %cst_4 = arith.constant 9.99999974E-6 : f32
    %10 = vector.broadcast %cst_4 : f32 to vector<1x256xf32>
    %11 = arith.addf %9, %10 : vector<1x256xf32>
    %12 = math.rsqrt %11 : vector<1x256xf32>
    %c0_5 = arith.constant 0 : index
    %c0_6 = arith.constant 0 : index
    %13 = vector.load %arg4[%c0_5, %c0_6] : memref<1x256xf32, #tpu.memory_space<vmem>>, vector<1x256xf32>
    %14 = arith.mulf %12, %13 : vector<1x256xf32>
    %c0_7 = arith.constant 0 : index
    %c0_8 = arith.constant 0 : index
    %15 = vector.load %arg2[%c0_7, %c0_8] : memref<32x256xf32, #tpu.memory_space<vmem>>, vector<32x256xf32>
    %16 = vector.broadcast %2 : vector<1x256xf32> to vector<32x256xf32>
    %17 = arith.subf %15, %16 : vector<32x256xf32>
    %18 = vector.broadcast %14 : vector<1x256xf32> to vector<32x256xf32>
    %19 = arith.mulf %17, %18 : vector<32x256xf32>
    %c0_9 = arith.constant 0 : index
    %c0_10 = arith.constant 0 : index
    %20 = vector.load %arg5[%c0_9, %c0_10] : memref<1x256xf32, #tpu.memory_space<vmem>>, vector<1x256xf32>
    %21 = vector.broadcast %20 : vector<1x256xf32> to vector<32x256xf32>
    %22 = arith.addf %19, %21 : vector<32x256xf32>
    %c0_11 = arith.constant 0 : index
    %c0_12 = arith.constant 0 : index
    %23 = vector.load %arg6[%c0_11, %c0_12] : memref<32x256xf32, #tpu.memory_space<vmem>>, vector<32x256xf32>
    tpu.vector_store %arg6[%c0_11, %c0_12], %22 {strides = array<i32>} : memref<32x256xf32, #tpu.memory_space<vmem>>, vector<32x256xf32>,
    return
  }
  func.func @transform_0(%arg0: i32, %arg1: i32) -> (i32, i32) {
    %c0_i32 = arith.constant 0 : i32
    return %arg0, %arg1 : i32, i32
  }
  func.func @transform_1(%arg0: i32, %arg1: i32) -> (i32, i32) {
    %c0_i32 = arith.constant 0 : i32
    %c0_i32_0 = arith.constant 0 : i32
    return %c0_i32, %arg1 : i32, i32
  }
  func.func @transform_2(%arg0: i32, %arg1: i32) -> (i32, i32) {
    %c0_i32 = arith.constant 0 : i32
    %c0_i32_0 = arith.constant 0 : i32
    return %c0_i32, %arg1 : i32, i32
  }
  func.func @transform_3(%arg0: i32, %arg1: i32) -> (i32, i32) {
    %c0_i32 = arith.constant 0 : i32
    %c0_i32_0 = arith.constant 0 : i32
    return %c0_i32, %arg1 : i32, i32
  }
  func.func @transform_4(%arg0: i32, %arg1: i32) -> (i32, i32) {
    %c0_i32 = arith.constant 0 : i32
    return %arg0, %arg1 : i32, i32
  }
}

module attributes {stable_mosaic.version = 11 : i64} {
  func.func @_tail_kernel(%arg0: i32, %arg1: memref<8x512xbf16, #tpu.memory_space<vmem>>, %arg2: memref<512x128xbf16, #tpu.memory_space<vmem>>, %arg3: memref<1x128xf32, #tpu.memory_space<vmem>>, %arg4: memref<1x128xf32, #tpu.memory_space<vmem>>, %arg5: memref<1x128xf32, #tpu.memory_space<vmem>>, %arg6: memref<128x128xf32, #tpu.memory_space<vmem>>, %arg7: memref<1x128xf32, #tpu.memory_space<vmem>>, %arg8: memref<8x128xf32, #tpu.memory_space<vmem>>, %arg9: memref<8x128xf32, #tpu.memory_space<vmem>>) attributes {dimension_semantics = [#tpu.dimension_semantics<arbitrary>], iteration_bounds = array<i64: 16>, scalar_prefetch = 0 : i64, scratch_operands = 1 : i64, tpu.core_type = #tpu.core_type<tc>, window_params = [{transform_indices = @transform_0, window_bounds = array<i64: 8, 512>}, {transform_indices = @transform_1, window_bounds = array<i64: 512, 128>}, {pipeline_mode = #tpu.pipeline_mode<synchronous>, transform_indices = @transform_2, window_bounds = array<i64: 1, 128>}, {pipeline_mode = #tpu.pipeline_mode<synchronous>, transform_indices = @transform_3, window_bounds = array<i64: 1, 128>}, {pipeline_mode = #tpu.pipeline_mode<synchronous>, transform_indices = @transform_4, window_bounds = array<i64: 1, 128>}, {pipeline_mode = #tpu.pipeline_mode<synchronous>, transform_indices = @transform_5, window_bounds = array<i64: 128, 128>}, {pipeline_mode = #tpu.pipeline_mode<synchronous>, transform_indices = @transform_6, window_bounds = array<i64: 1, 128>}, {pipeline_mode = #tpu.pipeline_mode<synchronous>, transform_indices = @transform_7, window_bounds = array<i64: 8, 128>}]} {
    %c0_i32 = arith.constant 0 : i32
    %0 = arith.cmpi eq, %arg0, %c0_i32 : i32
    %1 = arith.extui %0 : i1 to i32
    %c0_i32_0 = arith.constant 0 : i32
    %2 = arith.cmpi ne, %1, %c0_i32_0 : i32
    scf.if %2 {
      %cst_9 = arith.constant 0.000000e+00 : f32
      %12 = vector.broadcast %cst_9 : f32 to vector<8x128xf32>
      %c0_10 = arith.constant 0 : index
      %c0_11 = arith.constant 0 : index
      %13 = vector.load %arg9[%c0_10, %c0_11] : memref<8x128xf32, #tpu.memory_space<vmem>>, vector<8x128xf32>
      tpu.vector_store %arg9[%c0_10, %c0_11], %12 {strides = array<i32>} : memref<8x128xf32, #tpu.memory_space<vmem>>, vector<8x128xf32>,
    } else {
    }
    %c0 = arith.constant 0 : index
    %c0_1 = arith.constant 0 : index
    %3 = vector.load %arg9[%c0, %c0_1] : memref<8x128xf32, #tpu.memory_space<vmem>>, vector<8x128xf32>
    %c0_2 = arith.constant 0 : index
    %c0_3 = arith.constant 0 : index
    %4 = vector.load %arg1[%c0_2, %c0_3] : memref<8x512xbf16, #tpu.memory_space<vmem>>, vector<8x512xbf16>
    %c0_4 = arith.constant 0 : index
    %c0_5 = arith.constant 0 : index
    %5 = vector.load %arg2[%c0_4, %c0_5] : memref<512x128xbf16, #tpu.memory_space<vmem>>, vector<512x128xbf16>
    %cst = arith.constant dense<0.000000e+00> : vector<8x128xf32>
    %6 = tpu.matmul %4, %5, %cst {dimension_numbers = #tpu.dot_dimension_numbers<[1], [0], [0], [1], [0, 0, 1, 1], [], []>} : vector<8x512xbf16>, vector<512x128xbf16>, vector<8x128xf32> -> vector<8x128xf32>
    %7 = arith.addf %3, %6 : vector<8x128xf32>
    %c0_6 = arith.constant 0 : index
    %c0_7 = arith.constant 0 : index
    %8 = vector.load %arg9[%c0_6, %c0_7] : memref<8x128xf32, #tpu.memory_space<vmem>>, vector<8x128xf32>
    tpu.vector_store %arg9[%c0_6, %c0_7], %7 {strides = array<i32>} : memref<8x128xf32, #tpu.memory_space<vmem>>, vector<8x128xf32>,
    %c15_i32 = arith.constant 15 : i32
    %9 = arith.cmpi eq, %arg0, %c15_i32 : i32
    %10 = arith.extui %9 : i1 to i32
    %c0_i32_8 = arith.constant 0 : i32
    %11 = arith.cmpi ne, %10, %c0_i32_8 : i32
    scf.if %11 {
      %c0_9 = arith.constant 0 : index
      %c0_10 = arith.constant 0 : index
      %12 = vector.load %arg9[%c0_9, %c0_10] : memref<8x128xf32, #tpu.memory_space<vmem>>, vector<8x128xf32>
      %c0_11 = arith.constant 0 : index
      %c0_12 = arith.constant 0 : index
      %13 = vector.load %arg3[%c0_11, %c0_12] : memref<1x128xf32, #tpu.memory_space<vmem>>, vector<1x128xf32>
      %14 = vector.broadcast %13 : vector<1x128xf32> to vector<8x128xf32>
      %15 = arith.addf %12, %14 : vector<8x128xf32>
      %cst_13 = arith.constant 0.000000e+00 : f32
      %16 = vector.broadcast %cst_13 : f32 to vector<8x128xf32>
      %17 = arith.cmpf oge, %15, %16 : vector<8x128xf32>
      %cst_14 = arith.constant 2.000000e-01 : f32
      %18 = vector.broadcast %cst_14 : f32 to vector<8x128xf32>
      %19 = arith.mulf %18, %15 : vector<8x128xf32>
      %20 = arith.select %17, %15, %19 : vector<8x128xi1>, vector<8x128xf32>
      %21 = tpu.iota {dimensions = array<i32: 0>} : vector<8x128xi32>
      %c2_i32 = arith.constant 2 : i32
      %22 = vector.broadcast %c2_i32 : i32 to vector<8x128xi32>
      %23 = arith.cmpi slt, %21, %22 : vector<8x128xi32>
      %24 = arith.extui %23 : vector<8x128xi1> to vector<8x128xi32>
      %25 = arith.sitofp %24 : vector<8x128xi32> to vector<8x128xf32>
      %26 = arith.mulf %20, %25 : vector<8x128xf32>
      %cst_15 = arith.constant dense<0.000000e+00> : vector<128xf32>
      %27 = vector.multi_reduction <add>, %26, %cst_15 [0] : vector<8x128xf32> to vector<128xf32>
      %28 = vector.shape_cast %27 : vector<128xf32> to vector<1x128xf32>
      %cst_16 = arith.constant 5.000000e-01 : f32
      %29 = vector.broadcast %cst_16 : f32 to vector<1x128xf32>
      %30 = arith.mulf %28, %29 : vector<1x128xf32>
      %31 = arith.mulf %26, %26 : vector<8x128xf32>
      %cst_17 = arith.constant dense<0.000000e+00> : vector<128xf32>
      %32 = vector.multi_reduction <add>, %31, %cst_17 [0] : vector<8x128xf32> to vector<128xf32>
      %33 = vector.shape_cast %32 : vector<128xf32> to vector<1x128xf32>
      %cst_18 = arith.constant 5.000000e-01 : f32
      %34 = vector.broadcast %cst_18 : f32 to vector<1x128xf32>
      %35 = arith.mulf %33, %34 : vector<1x128xf32>
      %36 = arith.mulf %30, %30 : vector<1x128xf32>
      %37 = arith.subf %35, %36 : vector<1x128xf32>
      %cst_19 = arith.constant 0.000000e+00 : f32
      %38 = vector.broadcast %cst_19 : f32 to vector<1x128xf32>
      %39 = arith.maximumf %37, %38 : vector<1x128xf32>
      %40 = vector.broadcast %30 : vector<1x128xf32> to vector<8x128xf32>
      %41 = arith.subf %20, %40 : vector<8x128xf32>
      %cst_20 = arith.constant 9.99999974E-6 : f32
      %42 = vector.broadcast %cst_20 : f32 to vector<1x128xf32>
      %43 = arith.addf %39, %42 : vector<1x128xf32>
      %44 = math.rsqrt %43 : vector<1x128xf32>
      %45 = vector.broadcast %44 : vector<1x128xf32> to vector<8x128xf32>
      %46 = arith.mulf %41, %45 : vector<8x128xf32>
      %c0_21 = arith.constant 0 : index
      %c0_22 = arith.constant 0 : index
      %47 = vector.load %arg4[%c0_21, %c0_22] : memref<1x128xf32, #tpu.memory_space<vmem>>, vector<1x128xf32>
      %48 = vector.broadcast %47 : vector<1x128xf32> to vector<8x128xf32>
      %49 = arith.mulf %46, %48 : vector<8x128xf32>
      %c0_23 = arith.constant 0 : index
      %c0_24 = arith.constant 0 : index
      %50 = vector.load %arg5[%c0_23, %c0_24] : memref<1x128xf32, #tpu.memory_space<vmem>>, vector<1x128xf32>
      %51 = vector.broadcast %50 : vector<1x128xf32> to vector<8x128xf32>
      %52 = arith.addf %49, %51 : vector<8x128xf32>
      %c0_25 = arith.constant 0 : index
      %c0_26 = arith.constant 0 : index
      %53 = vector.load %arg6[%c0_25, %c0_26] : memref<128x128xf32, #tpu.memory_space<vmem>>, vector<128x128xf32>
      %cst_27 = arith.constant dense<0.000000e+00> : vector<8x128xf32>
      %54 = tpu.matmul %52, %53, %cst_27 {dimension_numbers = #tpu.dot_dimension_numbers<[1], [0], [0], [1], [0, 0, 1, 1], [], []>} : vector<8x128xf32>, vector<128x128xf32>, vector<8x128xf32> -> vector<8x128xf32>
      %c0_28 = arith.constant 0 : index
      %c0_29 = arith.constant 0 : index
      %55 = vector.load %arg7[%c0_28, %c0_29] : memref<1x128xf32, #tpu.memory_space<vmem>>, vector<1x128xf32>
      %56 = vector.broadcast %55 : vector<1x128xf32> to vector<8x128xf32>
      %57 = arith.addf %54, %56 : vector<8x128xf32>
      %c0_30 = arith.constant 0 : index
      %c0_31 = arith.constant 0 : index
      %58 = vector.load %arg8[%c0_30, %c0_31] : memref<8x128xf32, #tpu.memory_space<vmem>>, vector<8x128xf32>
      tpu.vector_store %arg8[%c0_30, %c0_31], %57 {strides = array<i32>} : memref<8x128xf32, #tpu.memory_space<vmem>>, vector<8x128xf32>,
    } else {
    }
    return
  }
  func.func @transform_0(%arg0: i32) -> (i32, i32) {
    %c0_i32 = arith.constant 0 : i32
    %c0_i32_0 = arith.constant 0 : i32
    return %c0_i32, %arg0 : i32, i32
  }
  func.func @transform_1(%arg0: i32) -> (i32, i32) {
    %c0_i32 = arith.constant 0 : i32
    %c0_i32_0 = arith.constant 0 : i32
    return %arg0, %c0_i32 : i32, i32
  }
  func.func @transform_2(%arg0: i32) -> (i32, i32) {
    %c0_i32 = arith.constant 0 : i32
    %c0_i32_0 = arith.constant 0 : i32
    %c0_i32_1 = arith.constant 0 : i32
    return %c0_i32, %c0_i32_0 : i32, i32
  }
  func.func @transform_3(%arg0: i32) -> (i32, i32) {
    %c0_i32 = arith.constant 0 : i32
    %c0_i32_0 = arith.constant 0 : i32
    %c0_i32_1 = arith.constant 0 : i32
    return %c0_i32, %c0_i32_0 : i32, i32
  }
  func.func @transform_4(%arg0: i32) -> (i32, i32) {
    %c0_i32 = arith.constant 0 : i32
    %c0_i32_0 = arith.constant 0 : i32
    %c0_i32_1 = arith.constant 0 : i32
    return %c0_i32, %c0_i32_0 : i32, i32
  }
  func.func @transform_5(%arg0: i32) -> (i32, i32) {
    %c0_i32 = arith.constant 0 : i32
    %c0_i32_0 = arith.constant 0 : i32
    %c0_i32_1 = arith.constant 0 : i32
    return %c0_i32, %c0_i32_0 : i32, i32
  }
  func.func @transform_6(%arg0: i32) -> (i32, i32) {
    %c0_i32 = arith.constant 0 : i32
    %c0_i32_0 = arith.constant 0 : i32
    %c0_i32_1 = arith.constant 0 : i32
    return %c0_i32, %c0_i32_0 : i32, i32
  }
  func.func @transform_7(%arg0: i32) -> (i32, i32) {
    %c0_i32 = arith.constant 0 : i32
    %c0_i32_0 = arith.constant 0 : i32
    %c0_i32_1 = arith.constant 0 : i32
    return %c0_i32, %c0_i32_0 : i32, i32
  }
}

</mosaic_0001>

<bundles_post_ra>
// kernel: encoder_forward.6
= control target key start
LH: loop header
LB: loop body
LE: loop exit
PB: predicated region body
PF: predicated region fallthrough
CT: control target
= control target key end

     0   :  { %s1151_s9 = smov 0   ;;  %s1153_s10 = smov 0   ;;  %s1265_s0 = inlined_call_operand.vmem [shape: bf16[512,48], index: 0, kind: input, shape index: {}]   ;;  %s1266_s1 = inlined_call_operand.vmem [shape: bf16[48,128], index: 1, kind: input, shape index: {}]   ;;  %s1267_s2 = inlined_call_operand.vmem [shape: f32[512,128], index: 2, kind: output, shape index: {}]  }
   0x1   :  { %s1155_s11 = smov 0  }
   0x2 LB: > { %s31_s12 = sadd.s32 1, %s1130_s10  ;;  %p964_p0 = scmp.ge.s32.totalorder %s1134_s11, 1  ;;  %s1134_s11 = sphi %s1155_s11, %s12_s11   ;;  %s1130_s10 = sphi %s1153_s10, %s1269_s10   ;;  %s1126_s9 = sphi %s1151_s9, %s1268_s9  }
   0x3   : > { %p33_p1 = scmp.ge.s32.totalorder %s31_s12, 2  ;;  %p155_p2 = scmp.lt.s32.totalorder %s1134_s11, 3 }
   0x5   : > { %s1271_s12 = smov (%p33_p1, %s31_s12), 0  ;;  %p156_p3 = pnand %p964_p0, %p155_p2 }
   0x6   : > { %s965_s15 = sshll.u32 (!%p156_p3), %s1126_s9, 5 }
   0x7   : > { %159 = sbr.rel (%p156_p3) target bundleno = 253 (0xfd), region = 28  ;;  %p192_p4 = scmp.lt.s32.totalorder (!%p156_p3), %s965_s15, 63 }
   0xc   : > { %v1093_v0 = vld [vmem:[%s1266_s1 + $0x10] sm:$0xff]   ;;  %v1094_v1 = vld [vmem:[%s1266_s1 + $0x8] sm:$0xff]   ;;  %s1273_s15 = smov (!%p192_p4, %s965_s15), 63  ;;  %v1095_v2 = vld [vmem:[%s1266_s1] sm:$0xff]   ;;  %vm423_vm0 = vcmask 392192  }
   0xd   : > { %1025 = vmatprep.subr.bf16.mxu0 %v1093_v0  ;;  %1063 = vmatprep.subr.bf16.mxu1 %v1093_v0  ;;  %s966_s20 = sshll.u32 %s1273_s15, 2  ;;  %s968_s24 = sshll.u32 %s1273_s15, 3 }
   0xe   : > { %1026 = vmatpush3.bf16.msra.mxu0 %v1093_v0  ;;  %1066 = vmatpush3.bf16.msra.mxu1 %v1093_v0  ;;  %s1184_s23 = scalar_lea.vmem %s1265_s0, %s966_s20  ;;  %s1222_s27 = scalar_lea.vmem %s1267_s2, %s968_s24 }
   0xf   : > { %1027 = vmatprep.subr.bf16.mxu0 %v1094_v1  ;;  %1064 = vmatprep.subr.bf16.mxu1 %v1094_v1  ;;  %v1096_v3 = vld [vmem:[%s1184_s23] sm:$0xff]   ;;  %v1098_v5 = vld [vmem:[%s1184_s23 + $0x8] sm:$0xff]   ;;  %v1100_v7 = vld [vmem:[%s1184_s23 + $0x10] sm:$0xff]  }
  0x10   : > { %v1097_v4 = vld [vmem:[%s1184_s23 + $0x40] sm:$0xff]   ;;  %1031 = vmatprep.mubr.msk.bf16.mxu0 %vm423_vm0, %v1096_v3  ;;  %v1099_v6 = vld [vmem:[%s1184_s23 + $0x48] sm:$0xff]   ;;  %v1101_v8 = vld [vmem:[%s1184_s23 + $0x50] sm:$0xff]  }
  0x11   : > { %1047 = vmatprep.mubr.msk.bf16.mxu1 %vm423_vm0, %v1097_v4  ;;  %v1102_v9 = vld [vmem:[%s1184_s23 + $0x18] sm:$0xff]   ;;  %v1104_v11 = vld [vmem:[%s1184_s23 + $0x20] sm:$0xff]   ;;  %v1106_v13 = vld [vmem:[%s1184_s23 + $0x28] sm:$0xff]  }
  0x12   : > { %1028 = vmatpush3.bf16.msra.mxu0 %v1094_v1  ;;  %1067 = vmatpush3.bf16.msra.mxu1 %v1094_v1  ;;  %v1103_v10 = vld [vmem:[%s1184_s23 + $0x58] sm:$0xff]   ;;  %v1105_v12 = vld [vmem:[%s1184_s23 + $0x60] sm:$0xff]   ;;  %v1107_v14 = vld [vmem:[%s1184_s23 + $0x68] sm:$0xff]  }
  0x13   : > { %1029 = vmatprep.subr.bf16.mxu0 %v1095_v2  ;;  %1065 = vmatprep.subr.bf16.mxu1 %v1095_v2  ;;  %v1108_v15 = vld [vmem:[%s1184_s23 + $0x30] sm:$0xff]   ;;  %v1110_v17 = vld [vmem:[%s1184_s23 + $0x38] sm:$0xff]  }
  0x14   : > { %v1109_v16 = vld [vmem:[%s1184_s23 + $0x70] sm:$0xff]   ;;  %v1111_v18 = vld [vmem:[%s1184_s23 + $0x78] sm:$0xff]  }
  0x16   : > { %1030 = vmatpush3.bf16.msra.mxu0 %v1095_v2  ;;  %1068 = vmatpush3.bf16.msra.mxu1 %v1095_v2 }
  0x19   : > { %1032 = vmatmul.mubr.msk.bf16.vlgmr.msra.gmra.mxu0 %vm423_vm0, %v1098_v5  ;;  %1048 = vmatmul.mubr.msk.bf16.vlgmr.msra.gmra.mxu1 %vm423_vm0, %v1099_v6 }
  0x1a   : > { %1035 = vmatprep.mubr.msk.bf16.mxu0 %vm423_vm0, %v1100_v7  ;;  %1051 = vmatprep.mubr.msk.bf16.mxu1 %vm423_vm0, %v1101_v8 }
  0x21   : > { %1036 = vmatmul.mubr.msk.bf16.gmra.mxu0 %vm423_vm0, %v1102_v9  ;;  %1052 = vmatmul.mubr.msk.bf16.gmra.mxu1 %vm423_vm0, %v1103_v10 }
  0x22   : > { %1039 = vmatprep.mubr.msk.bf16.mxu0 %vm423_vm0, %v1104_v11  ;;  %1055 = vmatprep.mubr.msk.bf16.mxu1 %vm423_vm0, %v1105_v12 }
  0x29   : > { %1040 = vmatmul.mubr.msk.bf16.gmra.mxu0 %vm423_vm0, %v1106_v13  ;;  %1056 = vmatmul.mubr.msk.bf16.gmra.mxu1 %vm423_vm0, %v1107_v14 }
  0x2a   : > { %1043 = vmatprep.mubr.msk.bf16.mxu0 %vm423_vm0, %v1108_v15  ;;  %1059 = vmatprep.mubr.msk.bf16.mxu1 %vm423_vm0, %v1109_v16 }
  0x31   : > { %1044 = vmatmul.mubr.msk.bf16.gmra.mxu0 %vm423_vm0, %v1110_v17  ;;  %1060 = vmatmul.mubr.msk.bf16.gmra.mxu1 %vm423_vm0, %v1111_v18 }
  0xd9   : > { %v1033_v19 = vpop.f32.mrf.mxu0  ;;  %v1049_v20 = vpop.f32.mrf.mxu1 }
  0xda   : > { %vm734_vm1 = vcmp.ge.f32.partialorder %v1033_v19, 0.0  ;;  %v766_v21 = vmul.f32 0.2, %v1033_v19  ;;  %vm750_vm2 = vcmp.ge.f32.partialorder %v1049_v20, 0.0  ;;  %v782_v22 = vmul.f32 0.2, %v1049_v20 }
  0xdb   : > { %v506_v23 = vpop.f32.mrf.mxu0  ;;  %v570_v24 = vpop.f32.mrf.mxu1 }
  0xdc   : > { %v798_v25 = vsel %vm734_vm1, %v1033_v19, %v766_v21  ;;  %v814_v26 = vsel %vm750_vm2, %v1049_v20, %v782_v22  ;;  %vm732_vm3 = vcmp.ge.f32.partialorder %v506_v23, 0.0  ;;  %v764_v27 = vmul.f32 0.2, %v506_v23 }
  0xdd   : > { %830 = vst [vmem:[%s1222_s27 + $0x10] sm:$0xff] %v798_v25  ;;  %846 = vst [vmem:[%s1222_s27 + $0x90] sm:$0xff] %v814_v26  ;;  %vm748_vm4 = vcmp.ge.f32.partialorder %v570_v24, 0.0  ;;  %v780_v28 = vmul.f32 0.2, %v570_v24  ;;  %v1034_v29 = vpop.f32.mrf.mxu0  ;;  %v1050_v30 = vpop.f32.mrf.mxu1 }
  0xde   : > { %v796_v31 = vsel %vm732_vm3, %v506_v23, %v764_v27  ;;  %vm735_vm5 = vcmp.ge.f32.partialorder %v1034_v29, 0.0  ;;  %v767_v32 = vmul.f32 0.2, %v1034_v29  ;;  %vm751_vm6 = vcmp.ge.f32.partialorder %v1050_v30, 0.0 }
  0xdf   : > { %828 = vst [vmem:[%s1222_s27] sm:$0xff] %v796_v31  ;;  %v812_v33 = vsel %vm748_vm4, %v570_v24, %v780_v28  ;;  %v783_v34 = vmul.f32 0.2, %v1050_v30  ;;  %v509_v35 = vpop.f32.mrf.mxu0  ;;  %v573_v36 = vpop.f32.mrf.mxu1 }
  0xe0   : > { %844 = vst [vmem:[%s1222_s27 + $0x80] sm:$0xff] %v812_v33  ;;  %v799_v37 = vsel %vm735_vm5, %v1034_v29, %v767_v32  ;;  %vm733_vm7 = vcmp.ge.f32.partialorder %v509_v35, 0.0  ;;  %v765_v38 = vmul.f32 0.2, %v509_v35  ;;  %vm749_vm8 = vcmp.ge.f32.partialorder %v573_v36, 0.0 }
  0xe1   : > { %831 = vst [vmem:[%s1222_s27 + $0x18] sm:$0xff] %v799_v37  ;;  %v815_v39 = vsel %vm751_vm6, %v1050_v30, %v783_v34  ;;  %v781_v40 = vmul.f32 0.2, %v573_v36  ;;  %v1037_v41 = vpop.f32.mrf.mxu0  ;;  %v1053_v42 = vpop.f32.mrf.mxu1 }
  0xe2   : > { %847 = vst [vmem:[%s1222_s27 + $0x98] sm:$0xff] %v815_v39  ;;  %v797_v43 = vsel %vm733_vm7, %v509_v35, %v765_v38  ;;  %vm738_vm9 = vcmp.ge.f32.partialorder %v1037_v41, 0.0  ;;  %v770_v44 = vmul.f32 0.2, %v1037_v41  ;;  %vm754_vm10 = vcmp.ge.f32.partialorder %v1053_v42, 0.0 }
  0xe3   : > { %829 = vst [vmem:[%s1222_s27 + $0x8] sm:$0xff] %v797_v43  ;;  %v813_v45 = vsel %vm749_vm8, %v573_v36, %v781_v40  ;;  %v786_v46 = vmul.f32 0.2, %v1053_v42  ;;  %v522_v47 = vpop.f32.mrf.mxu0  ;;  %v586_v48 = vpop.f32.mrf.mxu1 }
  0xe4   : > { %845 = vst [vmem:[%s1222_s27 + $0x88] sm:$0xff] %v813_v45  ;;  %v802_v49 = vsel %vm738_vm9, %v1037_v41, %v770_v44  ;;  %vm736_vm11 = vcmp.ge.f32.partialorder %v522_v47, 0.0  ;;  %v768_v50 = vmul.f32 0.2, %v522_v47  ;;  %vm752_vm12 = vcmp.ge.f32.partialorder %v586_v48, 0.0 }
  0xe5   : > { %834 = vst [vmem:[%s1222_s27 + $0x30] sm:$0xff] %v802_v49  ;;  %v818_v51 = vsel %vm754_vm10, %v1053_v42, %v786_v46  ;;  %v784_v52 = vmul.f32 0.2, %v586_v48  ;;  %v1038_v53 = vpop.f32.mrf.mxu0  ;;  %v1054_v54 = vpop.f32.mrf.mxu1 }
  0xe6   : > { %850 = vst [vmem:[%s1222_s27 + $0xb0] sm:$0xff] %v818_v51  ;;  %v800_v55 = vsel %vm736_vm11, %v522_v47, %v768_v50  ;;  %vm739_vm13 = vcmp.ge.f32.partialorder %v1038_v53, 0.0  ;;  %v771_v56 = vmul.f32 0.2, %v1038_v53  ;;  %vm755_vm14 = vcmp.ge.f32.partialorder %v1054_v54, 0.0 }
  0xe7   : > { %832 = vst [vmem:[%s1222_s27 + $0x20] sm:$0xff] %v800_v55  ;;  %v816_v57 = vsel %vm752_vm12, %v586_v48, %v784_v52  ;;  %v787_v58 = vmul.f32 0.2, %v1054_v54  ;;  %v525_v59 = vpop.f32.mrf.mxu0  ;;  %v589_v60 = vpop.f32.mrf.mxu1 }
  0xe8   : > { %848 = vst [vmem:[%s1222_s27 + $0xa0] sm:$0xff] %v816_v57  ;;  %v803_v61 = vsel %vm739_vm13, %v1038_v53, %v771_v56  ;;  %vm737_vm15 = vcmp.ge.f32.partialorder %v525_v59, 0.0  ;;  %v769_v62 = vmul.f32 0.2, %v525_v59  ;;  %vm753_vm0 = vcmp.ge.f32.partialorder %v589_v60, 0.0 }
  0xe9   : > { %835 = vst [vmem:[%s1222_s27 + $0x38] sm:$0xff] %v803_v61  ;;  %v819_v63 = vsel %vm755_vm14, %v1054_v54, %v787_v58  ;;  %v785_v0 = vmul.f32 0.2, %v589_v60  ;;  %v1041_v1 = vpop.f32.mrf.mxu0  ;;  %v1057_v2 = vpop.f32.mrf.mxu1 }
  0xea   : > { %851 = vst [vmem:[%s1222_s27 + $0xb8] sm:$0xff] %v819_v63  ;;  %v801_v3 = vsel %vm737_vm15, %v525_v59, %v769_v62  ;;  %vm742_vm1 = vcmp.ge.f32.partialorder %v1041_v1, 0.0  ;;  %v774_v4 = vmul.f32 0.2, %v1041_v1  ;;  %vm758_vm2 = vcmp.ge.f32.partialorder %v1057_v2, 0.0 }
  0xeb   : > { %833 = vst [vmem:[%s1222_s27 + $0x28] sm:$0xff] %v801_v3  ;;  %v817_v5 = vsel %vm753_vm0, %v589_v60, %v785_v0  ;;  %v790_v6 = vmul.f32 0.2, %v1057_v2  ;;  %v538_v7 = vpop.f32.mrf.mxu0  ;;  %v602_v8 = vpop.f32.mrf.mxu1 }
  0xec   : > { %849 = vst [vmem:[%s1222_s27 + $0xa8] sm:$0xff] %v817_v5  ;;  %v806_v9 = vsel %vm742_vm1, %v1041_v1, %v774_v4  ;;  %vm740_vm3 = vcmp.ge.f32.partialorder %v538_v7, 0.0  ;;  %v772_v10 = vmul.f32 0.2, %v538_v7  ;;  %vm756_vm4 = vcmp.ge.f32.partialorder %v602_v8, 0.0 }
  0xed   : > { %838 = vst [vmem:[%s1222_s27 + $0x50] sm:$0xff] %v806_v9  ;;  %v822_v11 = vsel %vm758_vm2, %v1057_v2, %v790_v6  ;;  %v788_v12 = vmul.f32 0.2, %v602_v8  ;;  %v1042_v13 = vpop.f32.mrf.mxu0  ;;  %v1058_v14 = vpop.f32.mrf.mxu1 }
  0xee   : > { %854 = vst [vmem:[%s1222_s27 + $0xd0] sm:$0xff] %v822_v11  ;;  %v804_v15 = vsel %vm740_vm3, %v538_v7, %v772_v10  ;;  %vm743_vm5 = vcmp.ge.f32.partialorder %v1042_v13, 0.0  ;;  %v775_v16 = vmul.f32 0.2, %v1042_v13  ;;  %vm759_vm6 = vcmp.ge.f32.partialorder %v1058_v14, 0.0 }
  0xef   : > { %836 = vst [vmem:[%s1222_s27 + $0x40] sm:$0xff] %v804_v15  ;;  %v820_v17 = vsel %vm756_vm4, %v602_v8, %v788_v12  ;;  %v791_v18 = vmul.f32 0.2, %v1058_v14  ;;  %v541_v19 = vpop.f32.mrf.mxu0  ;;  %v605_v20 = vpop.f32.mrf.mxu1 }
  0xf0   : > { %852 = vst [vmem:[%s1222_s27 + $0xc0] sm:$0xff] %v820_v17  ;;  %v807_v21 = vsel %vm743_vm5, %v1042_v13, %v775_v16  ;;  %vm741_vm7 = vcmp.ge.f32.partialorder %v541_v19, 0.0  ;;  %v773_v22 = vmul.f32 0.2, %v541_v19  ;;  %vm757_vm8 = vcmp.ge.f32.partialorder %v605_v20, 0.0 }
  0xf1   : > { %839 = vst [vmem:[%s1222_s27 + $0x58] sm:$0xff] %v807_v21  ;;  %v823_v23 = vsel %vm759_vm6, %v1058_v14, %v791_v18  ;;  %v789_v24 = vmul.f32 0.2, %v605_v20  ;;  %v1045_v25 = vpop.f32.mrf.mxu0  ;;  %v1061_v26 = vpop.f32.mrf.mxu1 }
  0xf2   : > { %855 = vst [vmem:[%s1222_s27 + $0xd8] sm:$0xff] %v823_v23  ;;  %v805_v27 = vsel %vm741_vm7, %v541_v19, %v773_v22  ;;  %vm746_vm9 = vcmp.ge.f32.partialorder %v1045_v25, 0.0  ;;  %v778_v28 = vmul.f32 0.2, %v1045_v25  ;;  %vm762_vm10 = vcmp.ge.f32.partialorder %v1061_v26, 0.0 }
  0xf3   : > { %837 = vst [vmem:[%s1222_s27 + $0x48] sm:$0xff] %v805_v27  ;;  %v821_v29 = vsel %vm757_vm8, %v605_v20, %v789_v24  ;;  %v794_v30 = vmul.f32 0.2, %v1061_v26  ;;  %v554_v31 = vpop.f32.mrf.mxu0  ;;  %v618_v32 = vpop.f32.mrf.mxu1 }
  0xf4   : > { %853 = vst [vmem:[%s1222_s27 + $0xc8] sm:$0xff] %v821_v29  ;;  %v810_v33 = vsel %vm746_vm9, %v1045_v25, %v778_v28  ;;  %vm744_vm11 = vcmp.ge.f32.partialorder %v554_v31, 0.0  ;;  %v776_v34 = vmul.f32 0.2, %v554_v31  ;;  %vm760_vm12 = vcmp.ge.f32.partialorder %v618_v32, 0.0 }
  0xf5   : > { %842 = vst [vmem:[%s1222_s27 + $0x70] sm:$0xff] %v810_v33  ;;  %v826_v35 = vsel %vm762_vm10, %v1061_v26, %v794_v30  ;;  %v792_v36 = vmul.f32 0.2, %v618_v32  ;;  %v1046_v37 = vpop.f32.mrf.mxu0  ;;  %v1062_v38 = vpop.f32.mrf.mxu1 }
  0xf6   : > { %858 = vst [vmem:[%s1222_s27 + $0xf0] sm:$0xff] %v826_v35  ;;  %v808_v39 = vsel %vm744_vm11, %v554_v31, %v776_v34  ;;  %vm747_vm13 = vcmp.ge.f32.partialorder %v1046_v37, 0.0  ;;  %v779_v40 = vmul.f32 0.2, %v1046_v37  ;;  %vm763_vm14 = vcmp.ge.f32.partialorder %v1062_v38, 0.0 }
  0xf7   : > { %840 = vst [vmem:[%s1222_s27 + $0x60] sm:$0xff] %v808_v39  ;;  %v824_v41 = vsel %vm760_vm12, %v618_v32, %v792_v36  ;;  %v795_v42 = vmul.f32 0.2, %v1062_v38  ;;  %v557_v43 = vpop.f32.mrf.mxu0  ;;  %v621_v44 = vpop.f32.mrf.mxu1 }
  0xf8   : > { %856 = vst [vmem:[%s1222_s27 + $0xe0] sm:$0xff] %v824_v41  ;;  %v811_v45 = vsel %vm747_vm13, %v1046_v37, %v779_v40  ;;  %vm745_vm15 = vcmp.ge.f32.partialorder %v557_v43, 0.0  ;;  %v777_v46 = vmul.f32 0.2, %v557_v43  ;;  %vm761_vm0 = vcmp.ge.f32.partialorder %v621_v44, 0.0 }
  0xf9   : > { %843 = vst [vmem:[%s1222_s27 + $0x78] sm:$0xff] %v811_v45  ;;  %v827_v47 = vsel %vm763_vm14, %v1062_v38, %v795_v42  ;;  %v793_v48 = vmul.f32 0.2, %v621_v44 }
  0xfa   : > { %859 = vst [vmem:[%s1222_s27 + $0xf8] sm:$0xff] %v827_v47  ;;  %v809_v49 = vsel %vm745_vm15, %v557_v43, %v777_v46 }
  0xfb   : > { %841 = vst [vmem:[%s1222_s27 + $0x68] sm:$0xff] %v809_v49  ;;  %v825_v50 = vsel %vm761_vm0, %v621_v44, %v793_v48 }
  0xfc   : > { %857 = vst [vmem:[%s1222_s27 + $0xe8] sm:$0xff] %v825_v50 }
  0xfd PF: > { %s12_s11 = sadd.s32 1, %s1134_s11   ;;  %s1268_s9 = smov %s1130_s10 }
  0xfe   : > { %p9_p5 = scmp.ge.s32.totalorder %s12_s11, 4   ;;  %s1269_s10 = smov %s1271_s12 }
 0x100   :  { %11 = sbr.rel (!%p9_p5) target bundleno = 2 (0x2), region = 69 }

// kernel: encoder_forward.7
= control target key start
LH: loop header
LB: loop body
LE: loop exit
PB: predicated region body
PF: predicated region fallthrough
CT: control target
= control target key end

     0   :  { %s2092_s12 = smov 0   ;;  %s2094_s13 = smov 0   ;;  %s2454_s0 = inlined_call_operand.vmem [shape: bf16[128,1024], index: 0, kind: input, shape index: {}]   ;;  %s2455_s1 = inlined_call_operand.vmem [shape: bf16[1024,256], index: 1, kind: input, shape index: {}]   ;;  %s2456_s2 = inlined_call_operand.vmem [shape: f32[128,256], index: 2, kind: output, shape index: {0}]   ;;  %s2457_s3 = inlined_call_operand.vmem [shape: f32[8,256], index: 3, kind: output, shape index: {1}]  }
   0x1   :  { %s2096_s14 = smov 0   ;;  %s2098_s15 = smov 0  }
   0x2   :  { %s2100_s16 = smov 0  }
   0x3 LB: > { %s26_s17 = sadd.s32 1, %s2064_s15  ;;  %p49_p1 = scmp.ne.s32.totalorder %s2056_s13, %s2052_s12  ;;  %s2068_s16 = sphi %s2100_s16, %s14_s16   ;;  %s2064_s15 = sphi %s2098_s15, %s2461_s15   ;;  %s2060_s14 = sphi %s2096_s14, %s2460_s14   ;;  %s2056_s13 = sphi %s2094_s13, %s2459_s13   ;;  %s2052_s12 = sphi %s2092_s12, %s2458_s12  }
   0x4   : > { %p27_p0 = scmp.ge.s32.totalorder %s26_s17, 2  ;;  %p50_p2 = scmp.eq.s32.totalorder %s2068_s16, 0 }
   0x5   : > { %s42_s19 = sadd.s32 1, %s2056_s13  ;;  %p1727_p5 = scmp.ge.s32.totalorder %s2068_s16, 2 }
   0x6   : > { %s2463_s17 = smov (%p27_p0, %s26_s17), 0  ;;  %p51_p3 = por %p50_p2, %p49_p1 }
   0x7   : > { %s38_s18 = ssub.s32 %s2064_s15, %s2463_s17  ;;  %157 = sbr.rel (%p1727_p5) target bundleno = 32 (0x20), region = 16 }
   0x8   : > { %p40_p4 = scmp.eq.s32.totalorder %s38_s18, 0 }
   0xa   : > { %s2127_s20 = scalar_select %p40_p4, %s2056_s13, %s42_s19  }
   0xc   : > { %160 = sbr.rel (!%p51_p3) target bundleno = 32 (0x20), region = 20  ;;  %s162_s21 = sand.u32 (%p51_p3), 1, %s2056_s13  }
   0xd   : > { %s1841_s22 = sshll.u32 (%p51_p3), %s2064_s15, 4  ;;  %s1728_s23 = sshll.u32 (%p51_p3), %s162_s21, 8 }
   0xe   : > { %s2135_s26 = scalar_lea.vmem (%p51_p3), %s2454_s0, %s1841_s22  ;;  %s2140_s27 = scalar_lea.vmem (%p51_p3), [#allocation3], %s1728_s23 }
   0xf   : > { %v183_v0 = vld [vmem:[%s2135_s26] sm:$0xff] (%p51_p3)  ;;  %v185_v1 = vld [vmem:[%s2135_s26 + $0x8] sm:$0xff] (%p51_p3) }
  0x10   : > { %v187_v2 = vld [vmem:[%s2135_s26 + $0x20] sm:$0xff] (%p51_p3)  ;;  %184 = vst [vmem:[%s2140_s27] sm:$0xff] (%p51_p3), %v183_v0  ;;  %186 = vst [vmem:[%s2140_s27 + $0x8] sm:$0xff] (%p51_p3), %v185_v1  ;;  %v189_v3 = vld [vmem:[%s2135_s26 + $0x28] sm:$0xff] (%p51_p3) }
  0x11   : > { %188 = vst [vmem:[%s2140_s27 + $0x10] sm:$0xff] %v187_v2  ;;  %v191_v4 = vld [vmem:[%s2135_s26 + $0x40] sm:$0xff]  ;;  %v193_v5 = vld [vmem:[%s2135_s26 + $0x48] sm:$0xff]  ;;  %190 = vst [vmem:[%s2140_s27 + $0x18] sm:$0xff] %v189_v3 }
  0x12   : > { %192 = vst [vmem:[%s2140_s27 + $0x20] sm:$0xff] %v191_v4  ;;  %194 = vst [vmem:[%s2140_s27 + $0x28] sm:$0xff] %v193_v5  ;;  %v195_v6 = vld [vmem:[%s2135_s26 + $0x60] sm:$0xff]  ;;  %v197_v7 = vld [vmem:[%s2135_s26 + $0x68] sm:$0xff] }
  0x13   : > { %v199_v8 = vld [vmem:[%s2135_s26 + $0x80] sm:$0xff]  ;;  %196 = vst [vmem:[%s2140_s27 + $0x30] sm:$0xff] %v195_v6  ;;  %198 = vst [vmem:[%s2140_s27 + $0x38] sm:$0xff] %v197_v7  ;;  %v201_v9 = vld [vmem:[%s2135_s26 + $0x88] sm:$0xff] }
  0x14   : > { %200 = vst [vmem:[%s2140_s27 + $0x40] sm:$0xff] %v199_v8  ;;  %v203_v10 = vld [vmem:[%s2135_s26 + $0xa0] sm:$0xff]  ;;  %v205_v11 = vld [vmem:[%s2135_s26 + $0xa8] sm:$0xff]  ;;  %202 = vst [vmem:[%s2140_s27 + $0x48] sm:$0xff] %v201_v9 }
  0x15   : > { %204 = vst [vmem:[%s2140_s27 + $0x50] sm:$0xff] %v203_v10  ;;  %206 = vst [vmem:[%s2140_s27 + $0x58] sm:$0xff] %v205_v11  ;;  %v207_v12 = vld [vmem:[%s2135_s26 + $0xc0] sm:$0xff]  ;;  %v209_v13 = vld [vmem:[%s2135_s26 + $0xc8] sm:$0xff] }
  0x16   : > { %v211_v14 = vld [vmem:[%s2135_s26 + $0xe0] sm:$0xff]  ;;  %208 = vst [vmem:[%s2140_s27 + $0x60] sm:$0xff] %v207_v12  ;;  %210 = vst [vmem:[%s2140_s27 + $0x68] sm:$0xff] %v209_v13  ;;  %v213_v15 = vld [vmem:[%s2135_s26 + $0xe8] sm:$0xff] }
  0x17   : > { %212 = vst [vmem:[%s2140_s27 + $0x70] sm:$0xff] %v211_v14  ;;  %v215_v16 = vld [vmem:[%s2135_s26 + $0x100] sm:$0xff]  ;;  %v217_v17 = vld [vmem:[%s2135_s26 + $0x108] sm:$0xff]  ;;  %214 = vst [vmem:[%s2140_s27 + $0x78] sm:$0xff] %v213_v15 }
  0x18   : > { %216 = vst [vmem:[%s2140_s27 + $0x80] sm:$0xff] %v215_v16  ;;  %218 = vst [vmem:[%s2140_s27 + $0x88] sm:$0xff] %v217_v17  ;;  %v219_v18 = vld [vmem:[%s2135_s26 + $0x120] sm:$0xff]  ;;  %v221_v19 = vld [vmem:[%s2135_s26 + $0x128] sm:$0xff] }
  0x19   : > { %v223_v20 = vld [vmem:[%s2135_s26 + $0x140] sm:$0xff]  ;;  %220 = vst [vmem:[%s2140_s27 + $0x90] sm:$0xff] %v219_v18  ;;  %222 = vst [vmem:[%s2140_s27 + $0x98] sm:$0xff] %v221_v19  ;;  %v225_v21 = vld [vmem:[%s2135_s26 + $0x148] sm:$0xff] }
  0x1a   : > { %224 = vst [vmem:[%s2140_s27 + $0xa0] sm:$0xff] %v223_v20  ;;  %v227_v22 = vld [vmem:[%s2135_s26 + $0x160] sm:$0xff]  ;;  %v229_v23 = vld [vmem:[%s2135_s26 + $0x168] sm:$0xff]  ;;  %226 = vst [vmem:[%s2140_s27 + $0xa8] sm:$0xff] %v225_v21 }
  0x1b   : > { %228 = vst [vmem:[%s2140_s27 + $0xb0] sm:$0xff] %v227_v22  ;;  %230 = vst [vmem:[%s2140_s27 + $0xb8] sm:$0xff] %v229_v23  ;;  %v231_v24 = vld [vmem:[%s2135_s26 + $0x180] sm:$0xff]  ;;  %v233_v25 = vld [vmem:[%s2135_s26 + $0x188] sm:$0xff] }
  0x1c   : > { %v235_v26 = vld [vmem:[%s2135_s26 + $0x1a0] sm:$0xff]  ;;  %232 = vst [vmem:[%s2140_s27 + $0xc0] sm:$0xff] %v231_v24  ;;  %234 = vst [vmem:[%s2140_s27 + $0xc8] sm:$0xff] %v233_v25  ;;  %v237_v27 = vld [vmem:[%s2135_s26 + $0x1a8] sm:$0xff] }
  0x1d   : > { %236 = vst [vmem:[%s2140_s27 + $0xd0] sm:$0xff] %v235_v26  ;;  %v239_v28 = vld [vmem:[%s2135_s26 + $0x1c0] sm:$0xff]  ;;  %v241_v29 = vld [vmem:[%s2135_s26 + $0x1c8] sm:$0xff]  ;;  %238 = vst [vmem:[%s2140_s27 + $0xd8] sm:$0xff] %v237_v27 }
  0x1e   : > { %240 = vst [vmem:[%s2140_s27 + $0xe0] sm:$0xff] %v239_v28  ;;  %242 = vst [vmem:[%s2140_s27 + $0xe8] sm:$0xff] %v241_v29  ;;  %v243_v30 = vld [vmem:[%s2135_s26 + $0x1e0] sm:$0xff]  ;;  %v245_v31 = vld [vmem:[%s2135_s26 + $0x1e8] sm:$0xff] }
  0x1f   : > { %244 = vst [vmem:[%s2140_s27 + $0xf0] sm:$0xff] %v243_v30  ;;  %246 = vst [vmem:[%s2140_s27 + $0xf8] sm:$0xff] %v245_v31 }
  0x20 PF: > { %p1731_p6 = scmp.ge.s32.totalorder %s2068_s16, 1  ;;  %p266_p7 = scmp.lt.s32.totalorder %s2068_s16, 3 }
  0x22   : > { %p267_p8 = pnand %p1731_p6, %p266_p7 }
  0x23   : > { %s273_s28 = sand.u32 (!%p267_p8), 1, %s2052_s12   ;;  %s1733_s29 = sshll.u32 (!%p267_p8), %s2060_s14, 6 }
  0x24   : > { %270 = sbr.rel (%p267_p8) target bundleno = 464 (0x1d0), region = 47  ;;  %s1732_s30 = sshll.u32 (!%p267_p8), %s273_s28, 8 }
  0x25   : > { %p320_p9 = scmp.lt.s32.totalorder (!%p267_p8), %s1733_s29, 127  ;;  %p348_p10 = scmp.eq.s32.totalorder (!%p267_p8), %s2060_s14, 0 }
  0x26   : > { %s2213_s8 = scalar_lea.vmem (!%p267_p8), [#allocation3], %s1732_s30  ;;  %p1736_p11 = scmp.ne.s32.totalorder (!%p267_p8), %s2060_s14, 0 }
  0x29   : > { %s2465_s29 = smov (!%p320_p9, %s1733_s29), 127  ;;  %351 = sbr.rel (%p1736_p11) target bundleno = 63 (0x3f), region = 55 }
  0x2a   : > { %s1842_s4 = sshll.u32 %s2465_s29, 3 }
  0x2b   : > { %s2211_s7 = scalar_lea.vmem %s2455_s1, %s1842_s4 }
  0x2e   : > { %v2070_v32 = vmov 0.0  }
  0x2f   : > { %352 = vst [vmem:[#allocation2 + $0xb0] sm:$0xff] %v2070_v32  ;;  %353 = vst [vmem:[#allocation2] sm:$0xff] %v2070_v32 }
  0x30   : > { %354 = vst [vmem:[#allocation2 + $0xd8] sm:$0xff] %v2070_v32  ;;  %355 = vst [vmem:[#allocation2 + $0x18] sm:$0xff] %v2070_v32 }
  0x31   : > { %356 = vst [vmem:[#allocation2 + $0x50] sm:$0xff] %v2070_v32  ;;  %357 = vst [vmem:[#allocation2 + $0x68] sm:$0xff] %v2070_v32 }
  0x32   : > { %358 = vst [vmem:[#allocation2 + $0x30] sm:$0xff] %v2070_v32  ;;  %359 = vst [vmem:[#allocation2 + $0x48] sm:$0xff] %v2070_v32 }
  0x33   : > { %360 = vst [vmem:[#allocation2 + $0x80] sm:$0xff] %v2070_v32  ;;  %361 = vst [vmem:[#allocation2 + $0x88] sm:$0xff] %v2070_v32 }
  0x34   : > { %362 = vst [vmem:[#allocation2 + $0xe8] sm:$0xff] %v2070_v32  ;;  %363 = vst [vmem:[#allocation2 + $0xb8] sm:$0xff] %v2070_v32 }
  0x35   : > { %364 = vst [vmem:[#allocation2 + $0x60] sm:$0xff] %v2070_v32  ;;  %365 = vst [vmem:[#allocation2 + $0xf0] sm:$0xff] %v2070_v32 }
  0x36   : > { %366 = vst [vmem:[#allocation2 + $0x8] sm:$0xff] %v2070_v32  ;;  %367 = vst [vmem:[#allocation2 + $0x78] sm:$0xff] %v2070_v32 }
  0x37   : > { %368 = vst [vmem:[#allocation2 + $0x38] sm:$0xff] %v2070_v32  ;;  %369 = vst [vmem:[#allocation2 + $0x58] sm:$0xff] %v2070_v32 }
  0x38   : > { %370 = vst [vmem:[#allocation2 + $0x40] sm:$0xff] %v2070_v32  ;;  %371 = vst [vmem:[#allocation2 + $0xc8] sm:$0xff] %v2070_v32 }
  0x39   : > { %372 = vst [vmem:[#allocation2 + $0xe0] sm:$0xff] %v2070_v32  ;;  %373 = vst [vmem:[#allocation2 + $0x90] sm:$0xff] %v2070_v32 }
  0x3a   : > { %374 = vst [vmem:[#allocation2 + $0x70] sm:$0xff] %v2070_v32  ;;  %375 = vst [vmem:[#allocation2 + $0xc0] sm:$0xff] %v2070_v32 }
  0x3b   : > { %376 = vst [vmem:[#allocation2 + $0xa8] sm:$0xff] %v2070_v32  ;;  %377 = vst [vmem:[#allocation2 + $0xd0] sm:$0xff] %v2070_v32 }
  0x3c   : > { %378 = vst [vmem:[#allocation2 + $0x10] sm:$0xff] %v2070_v32  ;;  %379 = vst [vmem:[#allocation2 + $0x28] sm:$0xff] %v2070_v32 }
  0x3d   : > { %380 = vst [vmem:[#allocation2 + $0xa0] sm:$0xff] %v2070_v32  ;;  %381 = vst [vmem:[#allocation2 + $0xf8] sm:$0xff] %v2070_v32 }
  0x3e   : > { %382 = vst [vmem:[#allocation2 + $0x20] sm:$0xff] %v2070_v32  ;;  %383 = vst [vmem:[#allocation2 + $0x98] sm:$0xff] %v2070_v32 }
  0x3f PF: > { %388 = sbr.rel (!%p348_p10) target bundleno = 68 (0x44), region = 59  ;;  %v2071_v33 = vmov (%p348_p10), 0.0  }
  0x40   : > { %389 = vst [vmem:[%s2457_s3] sm:$0xff] (%p348_p10), %v2071_v33  ;;  %390 = vst [vmem:[%s2457_s3 + $0x8] sm:$0xff] (%p348_p10), %v2071_v33 }
  0x44 PF: > { %v1886_v34 = vld [vmem:[%s2211_s7 + $0x74] ss:$8 sps:$4 sm:$0xff]   ;;  %v1890_v36 = vld [vmem:[%s2211_s7 + $0x70] ss:$8 sps:$4 sm:$0xff]   ;;  %v1892_v38 = vld [vmem:[%s2211_s7 + $0x64] ss:$8 sps:$4 sm:$0xff]  }
  0x45   : > { %v1888_v35 = vld [vmem:[%s2211_s7 + $0x174] ss:$8 sps:$4 sm:$0xff]   ;;  %999 = vmatprep.subr.bf16.mxu0 %v1886_v34  ;;  %v1891_v37 = vld [vmem:[%s2211_s7 + $0x170] ss:$8 sps:$4 sm:$0xff]   ;;  %v1894_v39 = vld [vmem:[%s2211_s7 + $0x164] ss:$8 sps:$4 sm:$0xff]  }
  0x46   : > { %1112 = vmatprep.subr.bf16.mxu1 %v1888_v35  ;;  %1000 = vmatpush1.bf16.msra.mxu0 %v1890_v36  ;;  %v1896_v40 = vld [vmem:[%s2211_s7 + $0x60] ss:$8 sps:$4 sm:$0xff]   ;;  %v1898_v42 = vld [vmem:[%s2211_s7 + $0x54] ss:$8 sps:$4 sm:$0xff]   ;;  %v1902_v44 = vld [vmem:[%s2211_s7 + $0x50] ss:$8 sps:$4 sm:$0xff]  }
  0x47   : > { %1113 = vmatpush1.bf16.msra.mxu1 %v1891_v37  ;;  %1001 = vmatprep.subr.bf16.mxu0 %v1892_v38  ;;  %v1897_v41 = vld [vmem:[%s2211_s7 + $0x160] ss:$8 sps:$4 sm:$0xff]   ;;  %v1900_v43 = vld [vmem:[%s2211_s7 + $0x154] ss:$8 sps:$4 sm:$0xff]   ;;  %v1903_v45 = vld [vmem:[%s2211_s7 + $0x150] ss:$8 sps:$4 sm:$0xff]  }
  0x48   : > { %1114 = vmatprep.subr.bf16.mxu1 %v1894_v39  ;;  %v1904_v46 = vld [vmem:[%s2211_s7 + $0x44] ss:$8 sps:$4 sm:$0xff]   ;;  %v1908_v48 = vld [vmem:[%s2211_s7 + $0x40] ss:$8 sps:$4 sm:$0xff]   ;;  %v1910_v50 = vld [vmem:[%s2211_s7 + $0x34] ss:$8 sps:$4 sm:$0xff]  }
  0x49   : > { %v1906_v47 = vld [vmem:[%s2211_s7 + $0x144] ss:$8 sps:$4 sm:$0xff]   ;;  %v1909_v49 = vld [vmem:[%s2211_s7 + $0x140] ss:$8 sps:$4 sm:$0xff]   ;;  %v1912_v51 = vld [vmem:[%s2211_s7 + $0x134] ss:$8 sps:$4 sm:$0xff]  }
  0x4a   : > { %1002 = vmatpush1.bf16.msra.mxu0 %v1896_v40  ;;  %v1914_v52 = vld [vmem:[%s2211_s7 + $0x30] ss:$8 sps:$4 sm:$0xff]   ;;  %v1916_v54 = vld [vmem:[%s2211_s7 + $0x24] ss:$8 sps:$4 sm:$0xff]   ;;  %v1920_v56 = vld [vmem:[%s2211_s7 + $0x20] ss:$8 sps:$4 sm:$0xff]  }
  0x4b   : > { %1115 = vmatpush1.bf16.msra.mxu1 %v1897_v41  ;;  %1003 = vmatprep.subr.bf16.mxu0 %v1898_v42  ;;  %v1915_v53 = vld [vmem:[%s2211_s7 + $0x130] ss:$8 sps:$4 sm:$0xff]   ;;  %v1918_v55 = vld [vmem:[%s2211_s7 + $0x124] ss:$8 sps:$4 sm:$0xff]   ;;  %v1921_v57 = vld [vmem:[%s2211_s7 + $0x120] ss:$8 sps:$4 sm:$0xff]  }
  0x4c   : > { %1116 = vmatprep.subr.bf16.mxu1 %v1900_v43  ;;  %v1922_v58 = vld [vmem:[%s2211_s7 + $0x14] ss:$8 sps:$4 sm:$0xff]   ;;  %v1926_v60 = vld [vmem:[%s2211_s7 + $0x10] ss:$8 sps:$4 sm:$0xff]   ;;  %v1928_v62 = vld [vmem:[%s2211_s7 + $0x4] ss:$8 sps:$4 sm:$0xff]  }
  0x4d   : > { %v1924_v59 = vld [vmem:[%s2211_s7 + $0x114] ss:$8 sps:$4 sm:$0xff]   ;;  %v1927_v61 = vld [vmem:[%s2211_s7 + $0x110] ss:$8 sps:$4 sm:$0xff]   ;;  %v1930_v63 = vld [vmem:[%s2211_s7 + $0x104] ss:$8 sps:$4 sm:$0xff]  }
  0x4e   : > { %1004 = vmatpush1.bf16.msra.mxu0 %v1902_v44  ;;  %v1932_v0 = vld [vmem:[%s2211_s7] ss:$8 sps:$4 sm:$0xff]   ;;  %v1934_v2 = vld [vmem:[%s2211_s7 + $0xf4] ss:$8 sps:$4 sm:$0xff]   ;;  %v1938_v4 = vld [vmem:[%s2211_s7 + $0xf0] ss:$8 sps:$4 sm:$0xff]  }
  0x4f   : > { %1117 = vmatpush1.bf16.msra.mxu1 %v1903_v45  ;;  %1005 = vmatprep.subr.bf16.mxu0 %v1904_v46  ;;  %v1933_v1 = vld [vmem:[%s2211_s7 + $0x100] ss:$8 sps:$4 sm:$0xff]   ;;  %v1936_v3 = vld [vmem:[%s2211_s7 + $0x1f4] ss:$8 sps:$4 sm:$0xff]   ;;  %v1939_v5 = vld [vmem:[%s2211_s7 + $0x1f0] ss:$8 sps:$4 sm:$0xff]  }
  0x50   : > { %1118 = vmatprep.subr.bf16.mxu1 %v1906_v47  ;;  %v1940_v6 = vld [vmem:[%s2211_s7 + $0xe4] ss:$8 sps:$4 sm:$0xff]   ;;  %v1944_v8 = vld [vmem:[%s2211_s7 + $0xe0] ss:$8 sps:$4 sm:$0xff]   ;;  %v1946_v10 = vld [vmem:[%s2211_s7 + $0xd4] ss:$8 sps:$4 sm:$0xff]  }
  0x51   : > { %v1942_v7 = vld [vmem:[%s2211_s7 + $0x1e4] ss:$8 sps:$4 sm:$0xff]   ;;  %v1945_v9 = vld [vmem:[%s2211_s7 + $0x1e0] ss:$8 sps:$4 sm:$0xff]   ;;  %v1948_v11 = vld [vmem:[%s2211_s7 + $0x1d4] ss:$8 sps:$4 sm:$0xff]  }
  0x52   : > { %1006 = vmatpush1.bf16.msra.mxu0 %v1908_v48  ;;  %v1950_v12 = vld [vmem:[%s2211_s7 + $0xd0] ss:$8 sps:$4 sm:$0xff]   ;;  %v1952_v14 = vld [vmem:[%s2211_s7 + $0xc4] ss:$8 sps:$4 sm:$0xff]   ;;  %v1956_v16 = vld [vmem:[%s2211_s7 + $0xc0] ss:$8 sps:$4 sm:$0xff]  }
  0x53   : > { %1119 = vmatpush1.bf16.msra.mxu1 %v1909_v49  ;;  %1007 = vmatprep.subr.bf16.mxu0 %v1910_v50  ;;  %v1951_v13 = vld [vmem:[%s2211_s7 + $0x1d0] ss:$8 sps:$4 sm:$0xff]   ;;  %v1954_v15 = vld [vmem:[%s2211_s7 + $0x1c4] ss:$8 sps:$4 sm:$0xff]   ;;  %v1957_v17 = vld [vmem:[%s2211_s7 + $0x1c0] ss:$8 sps:$4 sm:$0xff]  }
  0x54   : > { %1120 = vmatprep.subr.bf16.mxu1 %v1912_v51  ;;  %v1958_v18 = vld [vmem:[%s2211_s7 + $0xb4] ss:$8 sps:$4 sm:$0xff]   ;;  %v1962_v22 = vld [vmem:[%s2211_s7 + $0xb0] ss:$8 sps:$4 sm:$0xff]   ;;  %v1964_v24 = vld [vmem:[%s2211_s7 + $0xa4] ss:$8 sps:$4 sm:$0xff]  }
  0x55   : > { %v1984_v19 = vld [vmem:[%s2213_s8 + $0x4] ss:$16 sps:$4 sm:$0xff]   ;;  %v1987_v21 = vld [vmem:[%s2213_s8 + $0xc] ss:$16 sps:$4 sm:$0xff]   ;;  %v1963_v23 = vld [vmem:[%s2211_s7 + $0x1b0] ss:$8 sps:$4 sm:$0xff]  }
  0x56   : > { %1008 = vmatpush1.bf16.msra.mxu0 %v1914_v52  ;;  %v1960_v20 = vld [vmem:[%s2211_s7 + $0x1b4] ss:$8 sps:$4 sm:$0xff]   ;;  %1031 = vmatprep.mubr.bf16.mxu0 %v1984_v19  ;;  %v1966_v25 = vld [vmem:[%s2211_s7 + $0x1a4] ss:$8 sps:$4 sm:$0xff]   ;;  %v1968_v26 = vld [vmem:[%s2211_s7 + $0xa0] ss:$8 sps:$4 sm:$0xff]  }
  0x57   : > { %1121 = vmatpush1.bf16.msra.mxu1 %v1915_v53  ;;  %1009 = vmatprep.subr.bf16.mxu0 %v1916_v54  ;;  %v1969_v27 = vld [vmem:[%s2211_s7 + $0x1a0] ss:$8 sps:$4 sm:$0xff]   ;;  %v1970_v28 = vld [vmem:[%s2211_s7 + $0x94] ss:$8 sps:$4 sm:$0xff]   ;;  %v1974_v30 = vld [vmem:[%s2211_s7 + $0x90] ss:$8 sps:$4 sm:$0xff]  }
  0x58   : > { %1122 = vmatprep.subr.bf16.mxu1 %v1918_v55  ;;  %1144 = vmatprep.mubr.bf16.mxu1 %v1987_v21  ;;  %v1972_v29 = vld [vmem:[%s2211_s7 + $0x194] ss:$8 sps:$4 sm:$0xff]   ;;  %v1975_v31 = vld [vmem:[%s2211_s7 + $0x190] ss:$8 sps:$4 sm:$0xff]   ;;  %v1976_v32 = vld [vmem:[%s2211_s7 + $0x84] ss:$8 sps:$4 sm:$0xff]  }
  0x59   : > { %v1978_v33 = vld [vmem:[%s2211_s7 + $0x184] ss:$8 sps:$4 sm:$0xff]   ;;  %v1980_v34 = vld [vmem:[%s2211_s7 + $0x80] ss:$8 sps:$4 sm:$0xff]   ;;  %p1834_p12 = scmp.ne.s32.totalorder %s2060_s14, 1 }
  0x5a   : > { %1010 = vmatpush1.bf16.msra.mxu0 %v1920_v56  ;;  %v1981_v35 = vld [vmem:[%s2211_s7 + $0x180] ss:$8 sps:$4 sm:$0xff]   ;;  %v1988_v38 = vld [vmem:[%s2213_s8 + $0x24] ss:$16 sps:$4 sm:$0xff]   ;;  %v1990_v39 = vld [vmem:[%s2213_s8 + $0x2c] ss:$16 sps:$4 sm:$0xff]  }
  0x5b   : > { %1123 = vmatpush1.bf16.msra.mxu1 %v1921_v57  ;;  %1011 = vmatprep.subr.bf16.mxu0 %v1922_v58  ;;  %v1982_v36 = vld [vmem:[%s2213_s8] ss:$16 sps:$4 sm:$0xff]   ;;  %v1985_v37 = vld [vmem:[%s2213_s8 + $0x8] ss:$16 sps:$4 sm:$0xff]   ;;  %v1994_v42 = vld [vmem:[%s2213_s8 + $0x44] ss:$16 sps:$4 sm:$0xff]  }
  0x5c   : > { %1124 = vmatprep.subr.bf16.mxu1 %v1924_v59  ;;  %v1992_v40 = vld [vmem:[%s2213_s8 + $0x20] ss:$16 sps:$4 sm:$0xff]   ;;  %v1993_v41 = vld [vmem:[%s2213_s8 + $0x28] ss:$16 sps:$4 sm:$0xff]   ;;  %v1996_v43 = vld [vmem:[%s2213_s8 + $0x4c] ss:$16 sps:$4 sm:$0xff]  }
  0x5d   : > { %v1998_v44 = vld [vmem:[%s2213_s8 + $0x40] ss:$16 sps:$4 sm:$0xff]   ;;  %v1999_v45 = vld [vmem:[%s2213_s8 + $0x48] ss:$16 sps:$4 sm:$0xff]   ;;  %v2000_v46 = vld [vmem:[%s2213_s8 + $0x64] ss:$16 sps:$4 sm:$0xff]  }
  0x5e   : > { %1012 = vmatpush1.bf16.msra.mxu0 %v1926_v60  ;;  %v2002_v47 = vld [vmem:[%s2213_s8 + $0x6c] ss:$16 sps:$4 sm:$0xff]   ;;  %v2004_v48 = vld [vmem:[%s2213_s8 + $0x60] ss:$16 sps:$4 sm:$0xff]   ;;  %v2005_v49 = vld [vmem:[%s2213_s8 + $0x68] ss:$16 sps:$4 sm:$0xff]  }
  0x5f   : > { %1125 = vmatpush1.bf16.msra.mxu1 %v1927_v61  ;;  %1013 = vmatprep.subr.bf16.mxu0 %v1928_v62  ;;  %v2006_v50 = vld [vmem:[%s2213_s8 + $0x84] ss:$16 sps:$4 sm:$0xff]   ;;  %v2008_v51 = vld [vmem:[%s2213_s8 + $0x8c] ss:$16 sps:$4 sm:$0xff]   ;;  %v2010_v52 = vld [vmem:[%s2213_s8 + $0x80] ss:$16 sps:$4 sm:$0xff]  }
  0x60   : > { %1126 = vmatprep.subr.bf16.mxu1 %v1930_v63  ;;  %v2011_v53 = vld [vmem:[%s2213_s8 + $0x88] ss:$16 sps:$4 sm:$0xff]   ;;  %v2012_v54 = vld [vmem:[%s2213_s8 + $0xa4] ss:$16 sps:$4 sm:$0xff]   ;;  %v2014_v55 = vld [vmem:[%s2213_s8 + $0xac] ss:$16 sps:$4 sm:$0xff]  }
  0x61   : > { %v2016_v56 = vld [vmem:[%s2213_s8 + $0xa0] ss:$16 sps:$4 sm:$0xff]   ;;  %v2017_v57 = vld [vmem:[%s2213_s8 + $0xa8] ss:$16 sps:$4 sm:$0xff]   ;;  %v2018_v58 = vld [vmem:[%s2213_s8 + $0xc4] ss:$16 sps:$4 sm:$0xff]  }
  0x62   : > { %1014 = vmatpush1.bf16.msra.mxu0 %v1932_v0  ;;  %v2020_v59 = vld [vmem:[%s2213_s8 + $0xcc] ss:$16 sps:$4 sm:$0xff]   ;;  %v2022_v60 = vld [vmem:[%s2213_s8 + $0xc0] ss:$16 sps:$4 sm:$0xff]   ;;  %v2023_v61 = vld [vmem:[%s2213_s8 + $0xc8] ss:$16 sps:$4 sm:$0xff]  }
  0x63   : > { %1127 = vmatpush1.bf16.msra.mxu1 %v1933_v1  ;;  %1015 = vmatprep.subr.bf16.mxu0 %v1934_v2  ;;  %v2024_v62 = vld [vmem:[%s2213_s8 + $0xe4] ss:$16 sps:$4 sm:$0xff]   ;;  %v2026_v63 = vld [vmem:[%s2213_s8 + $0xec] ss:$16 sps:$4 sm:$0xff]   ;;  %v2028_v0 = vld [vmem:[%s2213_s8 + $0xe0] ss:$16 sps:$4 sm:$0xff]  }
  0x64   : > { %1128 = vmatprep.subr.bf16.mxu1 %v1936_v3  ;;  %v2029_v1 = vld [vmem:[%s2213_s8 + $0xe8] ss:$16 sps:$4 sm:$0xff]   ;;  %v391_v3 = vld [vmem:[#allocation2 + $0xb0] sm:$0xff] }
  0x66   : > { %1016 = vmatpush2.bf16.msra.mxu0 %v1938_v4 }
  0x67   : > { %1129 = vmatpush2.bf16.msra.mxu1 %v1939_v5  ;;  %1017 = vmatprep.subr.bf16.mxu0 %v1940_v6 }
  0x68   : > { %1130 = vmatprep.subr.bf16.mxu1 %v1942_v7  ;;  %v392_v7 = vld [vmem:[#allocation2] sm:$0xff] }
  0x6a   : > { %1018 = vmatpush2.bf16.msra.mxu0 %v1944_v8 }
  0x6b   : > { %1131 = vmatpush2.bf16.msra.mxu1 %v1945_v9  ;;  %1019 = vmatprep.subr.bf16.mxu0 %v1946_v10 }
  0x6c   : > { %1132 = vmatprep.subr.bf16.mxu1 %v1948_v11 }
  0x6e   : > { %1020 = vmatpush2.bf16.msra.mxu0 %v1950_v12  ;;  %v393_v12 = vld [vmem:[#allocation2 + $0xd8] sm:$0xff] }
  0x6f   : > { %1133 = vmatpush2.bf16.msra.mxu1 %v1951_v13  ;;  %1021 = vmatprep.subr.bf16.mxu0 %v1952_v14 }
  0x70   : > { %1134 = vmatprep.subr.bf16.mxu1 %v1954_v15 }
  0x72   : > { %1022 = vmatpush2.bf16.msra.mxu0 %v1956_v16 }
  0x73   : > { %1135 = vmatpush2.bf16.msra.mxu1 %v1957_v17  ;;  %1023 = vmatprep.subr.bf16.mxu0 %v1958_v18  ;;  %v394_v17 = vld [vmem:[#allocation2 + $0x18] sm:$0xff] }
  0x74   : > { %1136 = vmatprep.subr.bf16.mxu1 %v1960_v20 }
  0x76   : > { %1024 = vmatpush2.bf16.msra.mxu0 %v1962_v22  ;;  %v395_v22 = vld [vmem:[#allocation2 + $0x50] sm:$0xff] }
  0x77   : > { %1137 = vmatpush2.bf16.msra.mxu1 %v1963_v23  ;;  %1025 = vmatprep.subr.bf16.mxu0 %v1964_v24 }
  0x78   : > { %1138 = vmatprep.subr.bf16.mxu1 %v1966_v25 }
  0x7a   : > { %1026 = vmatpush2.bf16.msra.mxu0 %v1968_v26 }
  0x7b   : > { %1139 = vmatpush2.bf16.msra.mxu1 %v1969_v27  ;;  %1027 = vmatprep.subr.bf16.mxu0 %v1970_v28  ;;  %v396_v27 = vld [vmem:[#allocation2 + $0x68] sm:$0xff] }
  0x7c   : > { %1140 = vmatprep.subr.bf16.mxu1 %v1972_v29 }
  0x7e   : > { %1028 = vmatpush2.bf16.msra.mxu0 %v1974_v30 }
  0x7f   : > { %1141 = vmatpush2.bf16.msra.mxu1 %v1975_v31  ;;  %1029 = vmatprep.subr.bf16.mxu0 %v1976_v32  ;;  %v397_v32 = vld [vmem:[#allocation2 + $0x30] sm:$0xff] }
  0x80   : > { %1142 = vmatprep.subr.bf16.mxu1 %v1978_v33 }
  0x82   : > { %1030 = vmatpush2.bf16.msra.mxu0 %v1980_v34 }
  0x83   : > { %1143 = vmatpush2.bf16.msra.mxu1 %v1981_v35 }
  0x85   : > { %1032 = vmatmul.mubr.bf16.vlgmr.msra.gmra.mxu0 %v1982_v36 }
  0x86   : > { %1145 = vmatmul.mubr.bf16.vlgmr.msra.gmra.mxu1 %v1985_v37  ;;  %1041 = vmatprep.mubr.bf16.mxu0 %v1988_v38  ;;  %v398_v37 = vld [vmem:[#allocation2 + $0x48] sm:$0xff] }
  0x87   : > { %1154 = vmatprep.mubr.bf16.mxu1 %v1990_v39 }
  0x8d   : > { %1042 = vmatmul.mubr.bf16.gmra.mxu0 %v1992_v40 }
  0x8e   : > { %1155 = vmatmul.mubr.bf16.gmra.mxu1 %v1993_v41  ;;  %1051 = vmatprep.mubr.bf16.mxu0 %v1994_v42  ;;  %v399_v42 = vld [vmem:[#allocation2 + $0x80] sm:$0xff] }
  0x8f   : > { %1164 = vmatprep.mubr.bf16.mxu1 %v1996_v43 }
  0x95   : > { %1052 = vmatmul.mubr.bf16.gmra.mxu0 %v1998_v44 }
  0x96   : > { %1165 = vmatmul.mubr.bf16.gmra.mxu1 %v1999_v45  ;;  %1061 = vmatprep.mubr.bf16.mxu0 %v2000_v46 }
  0x97   : > { %1174 = vmatprep.mubr.bf16.mxu1 %v2002_v47  ;;  %v400_v47 = vld [vmem:[#allocation2 + $0x88] sm:$0xff] }
  0x9d   : > { %1062 = vmatmul.mubr.bf16.gmra.mxu0 %v2004_v48 }
  0x9e   : > { %1175 = vmatmul.mubr.bf16.gmra.mxu1 %v2005_v49  ;;  %1071 = vmatprep.mubr.bf16.mxu0 %v2006_v50 }
  0x9f   : > { %1184 = vmatprep.mubr.bf16.mxu1 %v2008_v51 }
  0xa5   : > { %1072 = vmatmul.mubr.bf16.gmra.mxu0 %v2010_v52  ;;  %v401_v52 = vld [vmem:[#allocation2 + $0xe8] sm:$0xff] }
  0xa6   : > { %1185 = vmatmul.mubr.bf16.gmra.mxu1 %v2011_v53  ;;  %1081 = vmatprep.mubr.bf16.mxu0 %v2012_v54 }
  0xa7   : > { %1194 = vmatprep.mubr.bf16.mxu1 %v2014_v55 }
  0xad   : > { %1082 = vmatmul.mubr.bf16.gmra.mxu0 %v2016_v56 }
  0xae   : > { %1195 = vmatmul.mubr.bf16.gmra.mxu1 %v2017_v57  ;;  %1091 = vmatprep.mubr.bf16.mxu0 %v2018_v58  ;;  %v402_v57 = vld [vmem:[#allocation2 + $0xb8] sm:$0xff] }
  0xaf   : > { %1204 = vmatprep.mubr.bf16.mxu1 %v2020_v59 }
  0xb5   : > { %1092 = vmatmul.mubr.bf16.gmra.mxu0 %v2022_v60 }
  0xb6   : > { %1205 = vmatmul.mubr.bf16.gmra.mxu1 %v2023_v61  ;;  %1101 = vmatprep.mubr.bf16.mxu0 %v2024_v62  ;;  %v403_v62 = vld [vmem:[#allocation2 + $0x60] sm:$0xff] }
  0xb7   : > { %1214 = vmatprep.mubr.bf16.mxu1 %v2026_v63 }
  0xbd   : > { %1102 = vmatmul.mubr.bf16.gmra.mxu0 %v2028_v0 }
  0xbe   : > { %1215 = vmatmul.mubr.bf16.gmra.mxu1 %v2029_v1 }
 0x145   : > { %v1033_v2 = vpop.f32.mrf.mxu0 }
 0x146   : > { %v1146_v4 = vpop.f32.mrf.mxu1 }
 0x147   : > { %v1147_v5 = vadd.f32 %v1146_v4, %v1033_v2  ;;  %v1035_v6 = vpop.f32.mrf.mxu0 }
 0x148   : > { %v1148_v8 = vpop.f32.mrf.mxu1 }
 0x149   : > { %v1225_v9 = vadd.f32 %v1147_v5, %v391_v3  ;;  %v1149_v10 = vadd.f32 %v1148_v8, %v1035_v6  ;;  %v1037_v11 = vpop.f32.mrf.mxu0  ;;  %v404_v3 = vld [vmem:[#allocation2 + $0xf0] sm:$0xff]  ;;  %v405_v8 = vld [vmem:[#allocation2 + $0x8] sm:$0xff] }
 0x14a   : > { %v1150_v13 = vpop.f32.mrf.mxu1 }
 0x14b   : > { %1257 = vst [vmem:[#allocation2 + $0xb0] sm:$0xff] %v1225_v9  ;;  %v1226_v14 = vadd.f32 %v1149_v10, %v392_v7  ;;  %v1151_v15 = vadd.f32 %v1150_v13, %v1037_v11  ;;  %v1039_v16 = vpop.f32.mrf.mxu0  ;;  %v406_v13 = vld [vmem:[#allocation2 + $0x78] sm:$0xff] }
 0x14c   : > { %v1152_v18 = vpop.f32.mrf.mxu1 }
 0x14d   : > { %1258 = vst [vmem:[#allocation2] sm:$0xff] %v1226_v14  ;;  %v1227_v19 = vadd.f32 %v1151_v15, %v393_v12  ;;  %v1153_v20 = vadd.f32 %v1152_v18, %v1039_v16  ;;  %v1043_v21 = vpop.f32.mrf.mxu0  ;;  %v407_v18 = vld [vmem:[#allocation2 + $0x38] sm:$0xff] }
 0x14e   : > { %v1156_v23 = vpop.f32.mrf.mxu1 }
 0x14f   : > { %1259 = vst [vmem:[#allocation2 + $0xd8] sm:$0xff] %v1227_v19  ;;  %v1228_v24 = vadd.f32 %v1153_v20, %v394_v17  ;;  %v1157_v25 = vadd.f32 %v1156_v23, %v1043_v21  ;;  %v1045_v26 = vpop.f32.mrf.mxu0  ;;  %v408_v23 = vld [vmem:[#allocation2 + $0x58] sm:$0xff] }
 0x150   : > { %v1158_v28 = vpop.f32.mrf.mxu1 }
 0x151   : > { %1260 = vst [vmem:[#allocation2 + $0x18] sm:$0xff] %v1228_v24  ;;  %v1229_v29 = vadd.f32 %v1157_v25, %v395_v22  ;;  %v1159_v30 = vadd.f32 %v1158_v28, %v1045_v26  ;;  %v1047_v31 = vpop.f32.mrf.mxu0  ;;  %v409_v28 = vld [vmem:[#allocation2 + $0x40] sm:$0xff] }
 0x152   : > { %v1160_v33 = vpop.f32.mrf.mxu1 }
 0x153   : > { %1261 = vst [vmem:[#allocation2 + $0x50] sm:$0xff] %v1229_v29  ;;  %v1230_v34 = vadd.f32 %v1159_v30, %v396_v27  ;;  %v1161_v35 = vadd.f32 %v1160_v33, %v1047_v31  ;;  %v1049_v36 = vpop.f32.mrf.mxu0  ;;  %v410_v33 = vld [vmem:[#allocation2 + $0xc8] sm:$0xff] }
 0x154   : > { %v1162_v38 = vpop.f32.mrf.mxu1 }
 0x155   : > { %1262 = vst [vmem:[#allocation2 + $0x68] sm:$0xff] %v1230_v34  ;;  %v1231_v39 = vadd.f32 %v1161_v35, %v397_v32  ;;  %v1163_v40 = vadd.f32 %v1162_v38, %v1049_v36  ;;  %v1053_v41 = vpop.f32.mrf.mxu0  ;;  %v411_v38 = vld [vmem:[#allocation2 + $0xe0] sm:$0xff] }
 0x156   : > { %v1166_v43 = vpop.f32.mrf.mxu1 }
 0x157   : > { %1263 = vst [vmem:[#allocation2 + $0x30] sm:$0xff] %v1231_v39  ;;  %v1232_v44 = vadd.f32 %v1163_v40, %v398_v37  ;;  %v1167_v45 = vadd.f32 %v1166_v43, %v1053_v41  ;;  %v1055_v46 = vpop.f32.mrf.mxu0  ;;  %v412_v43 = vld [vmem:[#allocation2 + $0x90] sm:$0xff] }
 0x158   : > { %v1168_v48 = vpop.f32.mrf.mxu1 }
 0x159   : > { %1264 = vst [vmem:[#allocation2 + $0x48] sm:$0xff] %v1232_v44  ;;  %v1233_v49 = vadd.f32 %v1167_v45, %v399_v42  ;;  %v1169_v50 = vadd.f32 %v1168_v48, %v1055_v46  ;;  %v1057_v51 = vpop.f32.mrf.mxu0  ;;  %v413_v48 = vld [vmem:[#allocation2 + $0x70] sm:$0xff] }
 0x15a   : > { %v1170_v53 = vpop.f32.mrf.mxu1 }
 0x15b   : > { %1265 = vst [vmem:[#allocation2 + $0x80] sm:$0xff] %v1233_v49  ;;  %v1234_v54 = vadd.f32 %v1169_v50, %v400_v47  ;;  %v1171_v55 = vadd.f32 %v1170_v53, %v1057_v51  ;;  %v1059_v56 = vpop.f32.mrf.mxu0  ;;  %v414_v53 = vld [vmem:[#allocation2 + $0xc0] sm:$0xff] }
 0x15c   : > { %v1172_v58 = vpop.f32.mrf.mxu1 }
 0x15d   : > { %1266 = vst [vmem:[#allocation2 + $0x88] sm:$0xff] %v1234_v54  ;;  %v1235_v59 = vadd.f32 %v1171_v55, %v401_v52  ;;  %v1173_v60 = vadd.f32 %v1172_v58, %v1059_v56  ;;  %v1063_v61 = vpop.f32.mrf.mxu0  ;;  %v415_v58 = vld [vmem:[#allocation2 + $0xa8] sm:$0xff] }
 0x15e   : > { %v1176_v63 = vpop.f32.mrf.mxu1 }
 0x15f   : > { %1267 = vst [vmem:[#allocation2 + $0xe8] sm:$0xff] %v1235_v59  ;;  %v1236_v0 = vadd.f32 %v1173_v60, %v402_v57  ;;  %v1177_v1 = vadd.f32 %v1176_v63, %v1063_v61  ;;  %v1065_v2 = vpop.f32.mrf.mxu0  ;;  %v416_v63 = vld [vmem:[#allocation2 + $0xd0] sm:$0xff] }
 0x160   : > { %v1178_v4 = vpop.f32.mrf.mxu1 }
 0x161   : > { %1268 = vst [vmem:[#allocation2 + $0xb8] sm:$0xff] %v1236_v0  ;;  %v1237_v5 = vadd.f32 %v1177_v1, %v403_v62  ;;  %v1179_v6 = vadd.f32 %v1178_v4, %v1065_v2  ;;  %v1067_v7 = vpop.f32.mrf.mxu0  ;;  %v417_v4 = vld [vmem:[#allocation2 + $0x10] sm:$0xff] }
 0x162   : > { %v1180_v9 = vpop.f32.mrf.mxu1 }
 0x163   : > { %1269 = vst [vmem:[#allocation2 + $0x60] sm:$0xff] %v1237_v5  ;;  %v1238_v10 = vadd.f32 %v1179_v6, %v404_v3  ;;  %v1181_v11 = vadd.f32 %v1180_v9, %v1067_v7  ;;  %v1069_v12 = vpop.f32.mrf.mxu0  ;;  %v418_v9 = vld [vmem:[#allocation2 + $0x28] sm:$0xff] }
 0x164   : > { %v1182_v14 = vpop.f32.mrf.mxu1 }
 0x165   : > { %1270 = vst [vmem:[#allocation2 + $0xf0] sm:$0xff] %v1238_v10  ;;  %v1239_v15 = vadd.f32 %v1181_v11, %v405_v8  ;;  %v1183_v16 = vadd.f32 %v1182_v14, %v1069_v12  ;;  %v1073_v17 = vpop.f32.mrf.mxu0  ;;  %v419_v14 = vld [vmem:[#allocation2 + $0xa0] sm:$0xff] }
 0x166   : > { %v1186_v19 = vpop.f32.mrf.mxu1 }
 0x167   : > { %1271 = vst [vmem:[#allocation2 + $0x8] sm:$0xff] %v1239_v15  ;;  %v1240_v20 = vadd.f32 %v1183_v16, %v406_v13  ;;  %v1187_v21 = vadd.f32 %v1186_v19, %v1073_v17  ;;  %v1075_v22 = vpop.f32.mrf.mxu0  ;;  %v420_v19 = vld [vmem:[#allocation2 + $0xf8] sm:$0xff] }
 0x168   : > { %v1188_v24 = vpop.f32.mrf.mxu1 }
 0x169   : > { %1272 = vst [vmem:[#allocation2 + $0x78] sm:$0xff] %v1240_v20  ;;  %v1241_v25 = vadd.f32 %v1187_v21, %v407_v18  ;;  %v1189_v26 = vadd.f32 %v1188_v24, %v1075_v22  ;;  %v1077_v27 = vpop.f32.mrf.mxu0  ;;  %v421_v24 = vld [vmem:[#allocation2 + $0x20] sm:$0xff] }
 0x16a   : > { %v1190_v29 = vpop.f32.mrf.mxu1 }
 0x16b   : > { %1273 = vst [vmem:[#allocation2 + $0x38] sm:$0xff] %v1241_v25  ;;  %v1242_v30 = vadd.f32 %v1189_v26, %v408_v23  ;;  %v1191_v31 = vadd.f32 %v1190_v29, %v1077_v27  ;;  %v1079_v32 = vpop.f32.mrf.mxu0  ;;  %v422_v29 = vld [vmem:[#allocation2 + $0x98] sm:$0xff] }
 0x16c   : > { %v1192_v34 = vpop.f32.mrf.mxu1 }
 0x16d   : > { %1274 = vst [vmem:[#allocation2 + $0x58] sm:$0xff] %v1242_v30  ;;  %v1243_v35 = vadd.f32 %v1191_v31, %v409_v28  ;;  %v1193_v36 = vadd.f32 %v1192_v34, %v1079_v32  ;;  %v1083_v37 = vpop.f32.mrf.mxu0 }
 0x16e   : > { %v1196_v39 = vpop.f32.mrf.mxu1 }
 0x16f   : > { %1275 = vst [vmem:[#allocation2 + $0x40] sm:$0xff] %v1243_v35  ;;  %v1244_v40 = vadd.f32 %v1193_v36, %v410_v33  ;;  %v1197_v41 = vadd.f32 %v1196_v39, %v1083_v37  ;;  %v1085_v42 = vpop.f32.mrf.mxu0 }
 0x170   : > { %v1198_v44 = vpop.f32.mrf.mxu1 }
 0x171   : > { %1276 = vst [vmem:[#allocation2 + $0xc8] sm:$0xff] %v1244_v40  ;;  %v1245_v45 = vadd.f32 %v1197_v41, %v411_v38  ;;  %v1199_v46 = vadd.f32 %v1198_v44, %v1085_v42  ;;  %v1087_v47 = vpop.f32.mrf.mxu0 }
 0x172   : > { %v1200_v49 = vpop.f32.mrf.mxu1 }
 0x173   : > { %1277 = vst [vmem:[#allocation2 + $0xe0] sm:$0xff] %v1245_v45  ;;  %v1246_v50 = vadd.f32 %v1199_v46, %v412_v43  ;;  %v1201_v51 = vadd.f32 %v1200_v49, %v1087_v47  ;;  %v1089_v52 = vpop.f32.mrf.mxu0 }
 0x174   : > { %v1202_v54 = vpop.f32.mrf.mxu1 }
 0x175   : > { %1278 = vst [vmem:[#allocation2 + $0x90] sm:$0xff] %v1246_v50  ;;  %v1247_v55 = vadd.f32 %v1201_v51, %v413_v48  ;;  %v1203_v56 = vadd.f32 %v1202_v54, %v1089_v52  ;;  %v1093_v57 = vpop.f32.mrf.mxu0 }
 0x176   : > { %v1206_v59 = vpop.f32.mrf.mxu1 }
 0x177   : > { %1279 = vst [vmem:[#allocation2 + $0x70] sm:$0xff] %v1247_v55  ;;  %v1248_v60 = vadd.f32 %v1203_v56, %v414_v53  ;;  %v1207_v61 = vadd.f32 %v1206_v59, %v1093_v57  ;;  %v1095_v62 = vpop.f32.mrf.mxu0 }
 0x178   : > { %v1208_v0 = vpop.f32.mrf.mxu1 }
 0x179   : > { %1280 = vst [vmem:[#allocation2 + $0xc0] sm:$0xff] %v1248_v60  ;;  %v1249_v1 = vadd.f32 %v1207_v61, %v415_v58  ;;  %v1209_v2 = vadd.f32 %v1208_v0, %v1095_v62  ;;  %v1097_v3 = vpop.f32.mrf.mxu0 }
 0x17a   : > { %v1210_v5 = vpop.f32.mrf.mxu1 }
 0x17b   : > { %1281 = vst [vmem:[#allocation2 + $0xa8] sm:$0xff] %v1249_v1  ;;  %v1250_v6 = vadd.f32 %v1209_v2, %v416_v63  ;;  %v1211_v7 = vadd.f32 %v1210_v5, %v1097_v3  ;;  %v1099_v8 = vpop.f32.mrf.mxu0 }
 0x17c   : > { %v1212_v10 = vpop.f32.mrf.mxu1 }
 0x17d   : > { %1282 = vst [vmem:[#allocation2 + $0xd0] sm:$0xff] %v1250_v6  ;;  %v1251_v11 = vadd.f32 %v1211_v7, %v417_v4  ;;  %v1213_v12 = vadd.f32 %v1212_v10, %v1099_v8  ;;  %v1103_v13 = vpop.f32.mrf.mxu0 }
 0x17e   : > { %v1216_v15 = vpop.f32.mrf.mxu1 }
 0x17f   : > { %1283 = vst [vmem:[#allocation2 + $0x10] sm:$0xff] %v1251_v11  ;;  %v1252_v16 = vadd.f32 %v1213_v12, %v418_v9  ;;  %v1217_v17 = vadd.f32 %v1216_v15, %v1103_v13  ;;  %v1105_v18 = vpop.f32.mrf.mxu0 }
 0x180   : > { %v1218_v20 = vpop.f32.mrf.mxu1 }
 0x181   : > { %1284 = vst [vmem:[#allocation2 + $0x28] sm:$0xff] %v1252_v16  ;;  %v1253_v21 = vadd.f32 %v1217_v17, %v419_v14  ;;  %v1219_v22 = vadd.f32 %v1218_v20, %v1105_v18  ;;  %v1107_v23 = vpop.f32.mrf.mxu0 }
 0x182   : > { %v1220_v25 = vpop.f32.mrf.mxu1 }
 0x183   : > { %1285 = vst [vmem:[#allocation2 + $0xa0] sm:$0xff] %v1253_v21  ;;  %v1254_v26 = vadd.f32 %v1219_v22, %v420_v19  ;;  %v1221_v27 = vadd.f32 %v1220_v25, %v1107_v23  ;;  %v1109_v28 = vpop.f32.mrf.mxu0 }
 0x184   : > { %v1222_v30 = vpop.f32.mrf.mxu1 }
 0x185   : > { %1286 = vst [vmem:[#allocation2 + $0xf8] sm:$0xff] %v1254_v26  ;;  %v1255_v31 = vadd.f32 %v1221_v27, %v421_v24  ;;  %v1223_v32 = vadd.f32 %v1222_v30, %v1109_v28  ;;  %1292 = sbr.rel (%p1834_p12) target bundleno = 464 (0x1d0), region = 63 }
 0x187   : > { %1287 = vst [vmem:[#allocation2 + $0x20] sm:$0xff] %v1255_v31  ;;  %v1256_v33 = vadd.f32 %v1223_v32, %v422_v29 }
 0x189   : > { %1288 = vst [vmem:[#allocation2 + $0x98] sm:$0xff] %v1256_v33 }
 0x18a   : > { %v1293_v34 = vld [vmem:[#allocation2 + $0xb0] sm:$0xff]  ;;  %v1294_v35 = vld [vmem:[#allocation2] sm:$0xff]  ;;  %v1295_v36 = vld [vmem:[#allocation2 + $0xd8] sm:$0xff] }
 0x18b   : > { %vm1325_vm0 = vcmp.ge.f32.partialorder %v1293_v34, 0.0  ;;  %v1357_v37 = vmul.f32 0.2, %v1293_v34  ;;  %vm1326_vm1 = vcmp.ge.f32.partialorder %v1294_v35, 0.0  ;;  %v1358_v38 = vmul.f32 0.2, %v1294_v35 }
 0x18c   : > { %vm1327_vm2 = vcmp.ge.f32.partialorder %v1295_v36, 0.0  ;;  %v1359_v39 = vmul.f32 0.2, %v1295_v36  ;;  %v1296_v40 = vld [vmem:[#allocation2 + $0x18] sm:$0xff]  ;;  %v1297_v41 = vld [vmem:[#allocation2 + $0x50] sm:$0xff]  ;;  %v1298_v45 = vld [vmem:[#allocation2 + $0x68] sm:$0xff] }
 0x18d   : > { %v1389_v42 = vsel %vm1325_vm0, %v1293_v34, %v1357_v37  ;;  %v1390_v43 = vsel %vm1326_vm1, %v1294_v35, %v1358_v38  ;;  %vm1328_vm3 = vcmp.ge.f32.partialorder %v1296_v40, 0.0  ;;  %v1360_v44 = vmul.f32 0.2, %v1296_v40  ;;  %v1299_v49 = vld [vmem:[#allocation2 + $0x30] sm:$0xff]  ;;  %v1300_v57 = vld [vmem:[#allocation2 + $0x48] sm:$0xff]  ;;  %v1301_v1 = vld [vmem:[#allocation2 + $0x80] sm:$0xff] }
 0x18e   : > { %1421 = vst [vmem:[%s2456_s2] sm:$0xff] %v1389_v42  ;;  %v1495_v46 = vmul.f32 %v1389_v42, %v1389_v42  ;;  %1422 = vst [vmem:[%s2456_s2 + $0x8] sm:$0xff] %v1390_v43  ;;  %v1496_v47 = vmul.f32 %v1390_v43, %v1390_v43  ;;  %v1391_v48 = vsel %vm1327_vm2, %v1295_v36, %v1359_v39  ;;  %vm1329_vm4 = vcmp.ge.f32.partialorder %v1297_v41, 0.0  ;;  %v1302_v2 = vld [vmem:[#allocation2 + $0x88] sm:$0xff]  ;;  %v1304_v13 = vld [vmem:[#allocation2 + $0xb8] sm:$0xff] }
 0x18f   : > { %1423 = vst [vmem:[%s2456_s2 + $0x10] sm:$0xff] %v1391_v48  ;;  %v1453_v50 = vadd.f32 %v1391_v48, %v1389_v42  ;;  %v1497_v51 = vmul.f32 %v1391_v48, %v1391_v48  ;;  %v1392_v52 = vsel %vm1328_vm3, %v1296_v40, %v1360_v44  ;;  %v1361_v53 = vmul.f32 0.2, %v1297_v41  ;;  %v1303_v6 = vld [vmem:[#allocation2 + $0xe8] sm:$0xff]  ;;  %v1305_v24 = vld [vmem:[#allocation2 + $0x60] sm:$0xff]  ;;  %v1306_v25 = vld [vmem:[#allocation2 + $0xf0] sm:$0xff] }
 0x190   : > { %1424 = vst [vmem:[%s2456_s2 + $0x18] sm:$0xff] %v1392_v52  ;;  %v1474_v54 = vadd.f32 %v1392_v52, %v1390_v43  ;;  %v1498_v55 = vmul.f32 %v1392_v52, %v1392_v52  ;;  %vm1330_vm5 = vcmp.ge.f32.partialorder %v1298_v45, 0.0  ;;  %v1362_v56 = vmul.f32 0.2, %v1298_v45  ;;  %v1307_v30 = vld [vmem:[#allocation2 + $0x8] sm:$0xff]  ;;  %v1308_v37 = vld [vmem:[#allocation2 + $0x78] sm:$0xff] }
 0x191   : > { %v1527_v58 = vadd.f32 %v1497_v51, %v1495_v46  ;;  %v1393_v59 = vsel %vm1329_vm4, %v1297_v41, %v1361_v53  ;;  %vm1331_vm6 = vcmp.ge.f32.partialorder %v1299_v49, 0.0  ;;  %v1363_v60 = vmul.f32 0.2, %v1299_v49  ;;  %v1309_v48 = vld [vmem:[#allocation2 + $0x38] sm:$0xff] }
 0x192   : > { %v1548_v61 = vadd.f32 %v1498_v55, %v1496_v47  ;;  %1425 = vst [vmem:[%s2456_s2 + $0x20] sm:$0xff] %v1393_v59  ;;  %v1454_v62 = vadd.f32 %v1453_v50, %v1393_v59  ;;  %v1499_v63 = vmul.f32 %v1393_v59, %v1393_v59  ;;  %v1394_v0 = vsel %vm1330_vm5, %v1298_v45, %v1362_v56 }
 0x193   : > { %1426 = vst [vmem:[%s2456_s2 + $0x28] sm:$0xff] %v1394_v0  ;;  %v1475_v3 = vadd.f32 %v1474_v54, %v1394_v0  ;;  %v1500_v4 = vmul.f32 %v1394_v0, %v1394_v0  ;;  %v1395_v5 = vsel %vm1331_vm6, %v1299_v49, %v1363_v60  ;;  %vm1332_vm7 = vcmp.ge.f32.partialorder %v1300_v57, 0.0  ;;  %v1310_v49 = vld [vmem:[#allocation2 + $0x58] sm:$0xff]  ;;  %v1311_v54 = vld [vmem:[#allocation2 + $0x40] sm:$0xff] }
 0x194   : > { %v1528_v7 = vadd.f32 %v1527_v58, %v1499_v63  ;;  %1427 = vst [vmem:[%s2456_s2 + $0x30] sm:$0xff] %v1395_v5  ;;  %v1455_v8 = vadd.f32 %v1454_v62, %v1395_v5  ;;  %v1501_v9 = vmul.f32 %v1395_v5, %v1395_v5  ;;  %v1364_v10 = vmul.f32 0.2, %v1300_v57 }
 0x195   : > { %v1549_v11 = vadd.f32 %v1548_v61, %v1500_v4  ;;  %vm1333_vm8 = vcmp.ge.f32.partialorder %v1301_v1, 0.0  ;;  %v1365_v12 = vmul.f32 0.2, %v1301_v1  ;;  %vm1334_vm9 = vcmp.ge.f32.partialorder %v1302_v2, 0.0  ;;  %v1312_v61 = vld [vmem:[#allocation2 + $0xc8] sm:$0xff] }
 0x196   : > { %v1529_v14 = vadd.f32 %v1528_v7, %v1501_v9  ;;  %v1396_v15 = vsel %vm1332_vm7, %v1300_v57, %v1364_v10  ;;  %v1366_v16 = vmul.f32 0.2, %v1302_v2  ;;  %vm1335_vm10 = vcmp.ge.f32.partialorder %v1303_v6, 0.0  ;;  %v1314_v9 = vld [vmem:[#allocation2 + $0x90] sm:$0xff] }
 0x197   : > { %1428 = vst [vmem:[%s2456_s2 + $0x38] sm:$0xff] %v1396_v15  ;;  %v1476_v17 = vadd.f32 %v1475_v3, %v1396_v15  ;;  %v1502_v18 = vmul.f32 %v1396_v15, %v1396_v15  ;;  %v1397_v19 = vsel %vm1333_vm8, %v1301_v1, %v1365_v12  ;;  %v1367_v20 = vmul.f32 0.2, %v1303_v6 }
 0x198   : > { %1429 = vst [vmem:[%s2456_s2 + $0x40] sm:$0xff] %v1397_v19  ;;  %v1456_v21 = vadd.f32 %v1455_v8, %v1397_v19  ;;  %v1503_v22 = vmul.f32 %v1397_v19, %v1397_v19  ;;  %v1398_v23 = vsel %vm1334_vm9, %v1302_v2, %v1366_v16  ;;  %vm1336_vm11 = vcmp.ge.f32.partialorder %v1304_v13, 0.0  ;;  %v1313_v8 = vld [vmem:[#allocation2 + $0xe0] sm:$0xff] }
 0x199   : > { %v1550_v26 = vadd.f32 %v1549_v11, %v1502_v18  ;;  %1430 = vst [vmem:[%s2456_s2 + $0x48] sm:$0xff] %v1398_v23  ;;  %v1477_v27 = vadd.f32 %v1476_v17, %v1398_v23  ;;  %v1504_v28 = vmul.f32 %v1398_v23, %v1398_v23  ;;  %v1399_v29 = vsel %vm1335_vm10, %v1303_v6, %v1367_v20 }
 0x19a   : > { %v1530_v31 = vadd.f32 %v1529_v14, %v1503_v22  ;;  %1431 = vst [vmem:[%s2456_s2 + $0x50] sm:$0xff] %v1399_v29  ;;  %v1457_v32 = vadd.f32 %v1456_v21, %v1399_v29  ;;  %v1505_v33 = vmul.f32 %v1399_v29, %v1399_v29  ;;  %v1368_v34 = vmul.f32 0.2, %v1304_v13  ;;  %v1315_v14 = vld [vmem:[#allocation2 + $0x70] sm:$0xff]  ;;  %v1316_v21 = vld [vmem:[#allocation2 + $0xc0] sm:$0xff] }
 0x19b   : > { %v1551_v35 = vadd.f32 %v1550_v26, %v1504_v28  ;;  %vm1337_vm12 = vcmp.ge.f32.partialorder %v1305_v24, 0.0  ;;  %v1369_v36 = vmul.f32 0.2, %v1305_v24  ;;  %vm1338_vm13 = vcmp.ge.f32.partialorder %v1306_v25, 0.0 }
 0x19c   : > { %v1531_v38 = vadd.f32 %v1530_v31, %v1505_v33  ;;  %v1400_v39 = vsel %vm1336_vm11, %v1304_v13, %v1368_v34  ;;  %v1370_v40 = vmul.f32 0.2, %v1306_v25  ;;  %vm1339_vm14 = vcmp.ge.f32.partialorder %v1307_v30, 0.0  ;;  %v1318_v33 = vld [vmem:[#allocation2 + $0xd0] sm:$0xff] }
 0x19d   : > { %1432 = vst [vmem:[%s2456_s2 + $0x58] sm:$0xff] %v1400_v39  ;;  %v1478_v41 = vadd.f32 %v1477_v27, %v1400_v39  ;;  %v1506_v42 = vmul.f32 %v1400_v39, %v1400_v39  ;;  %v1401_v43 = vsel %vm1337_vm12, %v1305_v24, %v1369_v36  ;;  %v1371_v44 = vmul.f32 0.2, %v1307_v30 }
 0x19e   : > { %1433 = vst [vmem:[%s2456_s2 + $0x60] sm:$0xff] %v1401_v43  ;;  %v1458_v45 = vadd.f32 %v1457_v32, %v1401_v43  ;;  %v1507_v46 = vmul.f32 %v1401_v43, %v1401_v43  ;;  %v1402_v47 = vsel %vm1338_vm13, %v1306_v25, %v1370_v40  ;;  %vm1340_vm15 = vcmp.ge.f32.partialorder %v1308_v37, 0.0  ;;  %v1317_v32 = vld [vmem:[#allocation2 + $0xa8] sm:$0xff] }
 0x19f   : > { %v1552_v50 = vadd.f32 %v1551_v35, %v1506_v42  ;;  %1434 = vst [vmem:[%s2456_s2 + $0x68] sm:$0xff] %v1402_v47  ;;  %v1479_v51 = vadd.f32 %v1478_v41, %v1402_v47  ;;  %v1508_v52 = vmul.f32 %v1402_v47, %v1402_v47  ;;  %v1403_v53 = vsel %vm1339_vm14, %v1307_v30, %v1371_v44 }
 0x1a0   : > { %v1532_v55 = vadd.f32 %v1531_v38, %v1507_v46  ;;  %1435 = vst [vmem:[%s2456_s2 + $0x70] sm:$0xff] %v1403_v53  ;;  %v1459_v56 = vadd.f32 %v1458_v45, %v1403_v53  ;;  %v1509_v57 = vmul.f32 %v1403_v53, %v1403_v53  ;;  %v1372_v58 = vmul.f32 0.2, %v1308_v37  ;;  %v1319_v38 = vld [vmem:[#allocation2 + $0x10] sm:$0xff]  ;;  %v1320_v45 = vld [vmem:[#allocation2 + $0x28] sm:$0xff] }
 0x1a1   : > { %v1553_v59 = vadd.f32 %v1552_v50, %v1508_v52  ;;  %vm1341_vm0 = vcmp.ge.f32.partialorder %v1309_v48, 0.0  ;;  %v1373_v60 = vmul.f32 0.2, %v1309_v48  ;;  %vm1342_vm1 = vcmp.ge.f32.partialorder %v1310_v49, 0.0 }
 0x1a2   : > { %v1533_v62 = vadd.f32 %v1532_v55, %v1509_v57  ;;  %v1404_v63 = vsel %vm1340_vm15, %v1308_v37, %v1372_v58  ;;  %v1374_v0 = vmul.f32 0.2, %v1310_v49  ;;  %vm1343_vm2 = vcmp.ge.f32.partialorder %v1311_v54, 0.0  ;;  %v1322_v57 = vld [vmem:[#allocation2 + $0xf8] sm:$0xff] }
 0x1a3   : > { %1436 = vst [vmem:[%s2456_s2 + $0x78] sm:$0xff] %v1404_v63  ;;  %v1480_v1 = vadd.f32 %v1479_v51, %v1404_v63  ;;  %v1510_v2 = vmul.f32 %v1404_v63, %v1404_v63  ;;  %v1405_v3 = vsel %vm1341_vm0, %v1309_v48, %v1373_v60  ;;  %v1375_v4 = vmul.f32 0.2, %v1311_v54 }
 0x1a4   : > { %1437 = vst [vmem:[%s2456_s2 + $0x80] sm:$0xff] %v1405_v3  ;;  %v1460_v5 = vadd.f32 %v1459_v56, %v1405_v3  ;;  %v1511_v6 = vmul.f32 %v1405_v3, %v1405_v3  ;;  %v1406_v7 = vsel %vm1342_vm1, %v1310_v49, %v1374_v0  ;;  %vm1344_vm3 = vcmp.ge.f32.partialorder %v1312_v61, 0.0  ;;  %v1321_v56 = vld [vmem:[#allocation2 + $0xa0] sm:$0xff] }
 0x1a5   : > { %v1554_v10 = vadd.f32 %v1553_v59, %v1510_v2  ;;  %1438 = vst [vmem:[%s2456_s2 + $0x88] sm:$0xff] %v1406_v7  ;;  %v1481_v11 = vadd.f32 %v1480_v1, %v1406_v7  ;;  %v1512_v12 = vmul.f32 %v1406_v7, %v1406_v7  ;;  %v1407_v13 = vsel %vm1343_vm2, %v1311_v54, %v1375_v4 }
 0x1a6   : > { %v1534_v15 = vadd.f32 %v1533_v62, %v1511_v6  ;;  %1439 = vst [vmem:[%s2456_s2 + $0x90] sm:$0xff] %v1407_v13  ;;  %v1461_v16 = vadd.f32 %v1460_v5, %v1407_v13  ;;  %v1513_v17 = vmul.f32 %v1407_v13, %v1407_v13  ;;  %v1376_v18 = vmul.f32 0.2, %v1312_v61  ;;  %v1323_v62 = vld [vmem:[#allocation2 + $0x20] sm:$0xff]  ;;  %v1324_v5 = vld [vmem:[#allocation2 + $0x98] sm:$0xff] }
 0x1a7   : > { %v1555_v19 = vadd.f32 %v1554_v10, %v1512_v12  ;;  %vm1345_vm4 = vcmp.ge.f32.partialorder %v1313_v8, 0.0  ;;  %v1377_v20 = vmul.f32 0.2, %v1313_v8  ;;  %vm1346_vm5 = vcmp.ge.f32.partialorder %v1314_v9, 0.0 }
 0x1a8   : > { %v1535_v22 = vadd.f32 %v1534_v15, %v1513_v17  ;;  %v1408_v23 = vsel %vm1344_vm3, %v1312_v61, %v1376_v18  ;;  %v1378_v24 = vmul.f32 0.2, %v1314_v9  ;;  %vm1347_vm6 = vcmp.ge.f32.partialorder %v1315_v14, 0.0 }
 0x1a9   : > { %1440 = vst [vmem:[%s2456_s2 + $0x98] sm:$0xff] %v1408_v23  ;;  %v1482_v25 = vadd.f32 %v1481_v11, %v1408_v23  ;;  %v1514_v26 = vmul.f32 %v1408_v23, %v1408_v23  ;;  %v1409_v27 = vsel %vm1345_vm4, %v1313_v8, %v1377_v20  ;;  %v1379_v28 = vmul.f32 0.2, %v1315_v14 }
 0x1aa   : > { %1441 = vst [vmem:[%s2456_s2 + $0xa0] sm:$0xff] %v1409_v27  ;;  %v1462_v29 = vadd.f32 %v1461_v16, %v1409_v27  ;;  %v1515_v30 = vmul.f32 %v1409_v27, %v1409_v27  ;;  %v1410_v31 = vsel %vm1346_vm5, %v1314_v9, %v1378_v24  ;;  %vm1348_vm7 = vcmp.ge.f32.partialorder %v1316_v21, 0.0 }
 0x1ab   : > { %v1556_v34 = vadd.f32 %v1555_v19, %v1514_v26  ;;  %1442 = vst [vmem:[%s2456_s2 + $0xa8] sm:$0xff] %v1410_v31  ;;  %v1483_v35 = vadd.f32 %v1482_v25, %v1410_v31  ;;  %v1516_v36 = vmul.f32 %v1410_v31, %v1410_v31  ;;  %v1411_v37 = vsel %vm1347_vm6, %v1315_v14, %v1379_v28 }
 0x1ac   : > { %v1536_v39 = vadd.f32 %v1535_v22, %v1515_v30  ;;  %1443 = vst [vmem:[%s2456_s2 + $0xb0] sm:$0xff] %v1411_v37  ;;  %v1463_v40 = vadd.f32 %v1462_v29, %v1411_v37  ;;  %v1517_v41 = vmul.f32 %v1411_v37, %v1411_v37  ;;  %v1380_v42 = vmul.f32 0.2, %v1316_v21 }
 0x1ad   : > { %v1557_v43 = vadd.f32 %v1556_v34, %v1516_v36  ;;  %vm1349_vm8 = vcmp.ge.f32.partialorder %v1317_v32, 0.0  ;;  %v1381_v44 = vmul.f32 0.2, %v1317_v32  ;;  %vm1350_vm9 = vcmp.ge.f32.partialorder %v1318_v33, 0.0 }
 0x1ae   : > { %v1537_v46 = vadd.f32 %v1536_v39, %v1517_v41  ;;  %v1412_v47 = vsel %vm1348_vm7, %v1316_v21, %v1380_v42  ;;  %v1382_v48 = vmul.f32 0.2, %v1318_v33  ;;  %vm1351_vm10 = vcmp.ge.f32.partialorder %v1319_v38, 0.0 }
 0x1af   : > { %1444 = vst [vmem:[%s2456_s2 + $0xb8] sm:$0xff] %v1412_v47  ;;  %v1484_v49 = vadd.f32 %v1483_v35, %v1412_v47  ;;  %v1518_v50 = vmul.f32 %v1412_v47, %v1412_v47  ;;  %v1413_v51 = vsel %vm1349_vm8, %v1317_v32, %v1381_v44  ;;  %v1383_v52 = vmul.f32 0.2, %v1319_v38 }
 0x1b0   : > { %1445 = vst [vmem:[%s2456_s2 + $0xc0] sm:$0xff] %v1413_v51  ;;  %v1464_v53 = vadd.f32 %v1463_v40, %v1413_v51  ;;  %v1519_v54 = vmul.f32 %v1413_v51, %v1413_v51  ;;  %v1414_v55 = vsel %vm1350_vm9, %v1318_v33, %v1382_v48  ;;  %vm1352_vm11 = vcmp.ge.f32.partialorder %v1320_v45, 0.0 }
 0x1b1   : > { %v1558_v58 = vadd.f32 %v1557_v43, %v1518_v50  ;;  %1446 = vst [vmem:[%s2456_s2 + $0xc8] sm:$0xff] %v1414_v55  ;;  %v1485_v59 = vadd.f32 %v1484_v49, %v1414_v55  ;;  %v1520_v60 = vmul.f32 %v1414_v55, %v1414_v55  ;;  %v1415_v61 = vsel %vm1351_vm10, %v1319_v38, %v1383_v52 }
 0x1b2   : > { %v1538_v63 = vadd.f32 %v1537_v46, %v1519_v54  ;;  %1447 = vst [vmem:[%s2456_s2 + $0xd0] sm:$0xff] %v1415_v61  ;;  %v1465_v0 = vadd.f32 %v1464_v53, %v1415_v61  ;;  %v1521_v1 = vmul.f32 %v1415_v61, %v1415_v61  ;;  %v1384_v2 = vmul.f32 0.2, %v1320_v45  ;;  %v1577_v53 = vld [vmem:[%s2457_s3] sm:$0xff] }
 0x1b3   : > { %v1559_v3 = vadd.f32 %v1558_v58, %v1520_v60  ;;  %vm1353_vm12 = vcmp.ge.f32.partialorder %v1321_v56, 0.0  ;;  %v1385_v4 = vmul.f32 0.2, %v1321_v56  ;;  %vm1354_vm13 = vcmp.ge.f32.partialorder %v1322_v57, 0.0  ;;  %v1578_v60 = vld [vmem:[%s2457_s3 + $0x8] sm:$0xff] }
 0x1b4   : > { %v1539_v6 = vadd.f32 %v1538_v63, %v1521_v1  ;;  %v1416_v7 = vsel %vm1352_vm11, %v1320_v45, %v1384_v2  ;;  %v1386_v8 = vmul.f32 0.2, %v1322_v57  ;;  %vm1355_vm14 = vcmp.ge.f32.partialorder %v1323_v62, 0.0 }
 0x1b5   : > { %1448 = vst [vmem:[%s2456_s2 + $0xd8] sm:$0xff] %v1416_v7  ;;  %v1486_v9 = vadd.f32 %v1485_v59, %v1416_v7  ;;  %v1522_v10 = vmul.f32 %v1416_v7, %v1416_v7  ;;  %v1417_v11 = vsel %vm1353_vm12, %v1321_v56, %v1385_v4  ;;  %v1387_v12 = vmul.f32 0.2, %v1323_v62 }
 0x1b6   : > { %1449 = vst [vmem:[%s2456_s2 + $0xe0] sm:$0xff] %v1417_v11  ;;  %v1466_v13 = vadd.f32 %v1465_v0, %v1417_v11  ;;  %v1523_v14 = vmul.f32 %v1417_v11, %v1417_v11  ;;  %v1418_v15 = vsel %vm1354_vm13, %v1322_v57, %v1386_v8  ;;  %vm1356_vm15 = vcmp.ge.f32.partialorder %v1324_v5, 0.0 }
 0x1b7   : > { %v1560_v16 = vadd.f32 %v1559_v3, %v1522_v10  ;;  %1450 = vst [vmem:[%s2456_s2 + $0xe8] sm:$0xff] %v1418_v15  ;;  %v1487_v17 = vadd.f32 %v1486_v9, %v1418_v15  ;;  %v1524_v18 = vmul.f32 %v1418_v15, %v1418_v15  ;;  %v1419_v19 = vsel %vm1355_vm14, %v1323_v62, %v1387_v12 }
 0x1b8   : > { %v1540_v20 = vadd.f32 %v1539_v6, %v1523_v14  ;;  %1451 = vst [vmem:[%s2456_s2 + $0xf0] sm:$0xff] %v1419_v19  ;;  %v1467_v21 = vadd.f32 %v1466_v13, %v1419_v19  ;;  %v1525_v22 = vmul.f32 %v1419_v19, %v1419_v19  ;;  %v1388_v23 = vmul.f32 0.2, %v1324_v5 }
 0x1b9   : > { %v1561_v24 = vadd.f32 %v1560_v16, %v1524_v18  ;;  %v1569_v34 = vlaneseq }
 0x1ba   : > { %v1468_v25 = vrot.slane %v1467_v21, 4  ;;  %v1541_v26 = vadd.f32 %v1540_v20, %v1525_v22  ;;  %v1420_v27 = vsel %vm1356_vm15, %v1324_v5, %v1388_v23 }
 0x1bb   : > { %1452 = vst [vmem:[%s2456_s2 + $0xf8] sm:$0xff] %v1420_v27  ;;  %v1488_v28 = vadd.f32 %v1487_v17, %v1420_v27  ;;  %v1526_v29 = vmul.f32 %v1420_v27, %v1420_v27  ;;  %v1570_v43 = vshrl.u32 %v1569_v34, 7 }
 0x1bc   : > { %v1469_v30 = vadd.f32 %v1468_v25, %v1467_v21  ;;  %v1542_v31 = vrot.slane %v1541_v26, 4 }
 0x1bd   : > { %v1489_v32 = vrot.slane %v1488_v28, 4  ;;  %v1562_v33 = vadd.f32 %v1561_v24, %v1526_v29  ;;  %vm1572_vm0 = vcmp.eq.s32.totalorder %v1570_v43, 1  ;;  %vm1571_vm1 = vcmp.eq.s32.totalorder %v1570_v43, 0 }
 0x1be   : > { %v1470_v35 = vrot.slane %v1469_v30, 2  ;;  %v1543_v36 = vadd.f32 %v1542_v31, %v1541_v26 }
 0x1bf   : > { %v1490_v37 = vadd.f32 %v1489_v32, %v1488_v28  ;;  %v1563_v38 = vrot.slane %v1562_v33, 4 }
 0x1c0   : > { %v1471_v39 = vadd.f32 %v1470_v35, %v1469_v30  ;;  %v1544_v40 = vrot.slane %v1543_v36, 2 }
 0x1c1   : > { %v1491_v41 = vrot.slane %v1490_v37, 2  ;;  %v1564_v42 = vadd.f32 %v1563_v38, %v1562_v33 }
 0x1c2   : > { %v1472_v44 = vrot.slane %v1471_v39, 1  ;;  %v1545_v45 = vadd.f32 %v1544_v40, %v1543_v36 }
 0x1c3   : > { %v1492_v46 = vadd.f32 %v1491_v41, %v1490_v37  ;;  %v1565_v47 = vrot.slane %v1564_v42, 2 }
 0x1c4   : > { %v1546_v48 = vrot.slane %v1545_v45, 1  ;;  %v1473_v49 = vadd.f32 %v1472_v44, %v1471_v39 }
 0x1c5   : > { %v1493_v50 = vrot.slane %v1492_v46, 1  ;;  %v1566_v51 = vadd.f32 %v1565_v47, %v1564_v42 }
 0x1c6   : > { %v1547_v52 = vadd.f32 %v1546_v48, %v1545_v45 }
 0x1c7   : > { %v1567_v54 = vrot.slane %v1566_v51, 1  ;;  %v1494_v56 = vadd.f32 %v1493_v50, %v1492_v46 }
 0x1c8   : > { %v1573_v55 = vsel %vm1572_vm0, %v1547_v52, 0.0 }
 0x1c9   : > { %v1575_v57 = vsel %vm1571_vm1, %v1473_v49, %v1573_v55  ;;  %v1568_v58 = vadd.f32 %v1567_v54, %v1566_v51 }
 0x1ca   : > { %v1579_v59 = vadd.f32 %v1577_v53, %v1575_v57 }
 0x1cb   : > { %v1574_v61 = vsel %vm1572_vm0, %v1568_v58, 0.0 }
 0x1cc   : > { %1581 = vst [vmem:[%s2457_s3] sm:$0xff] %v1579_v59  ;;  %v1576_v62 = vsel %vm1571_vm1, %v1494_v56, %v1574_v61 }
 0x1cd   : > { %v1580_v63 = vadd.f32 %v1578_v60, %v1576_v62 }
 0x1cf   : > { %1582 = vst [vmem:[%s2457_s3 + $0x8] sm:$0xff] %v1580_v63 }
 0x1d0 PF: > { %s14_s16 = sadd.s32 1, %s2068_s16   ;;  %s2458_s12 = smov %s2056_s13 }
 0x1d1   : > { %p11_p13 = scmp.ge.s32.totalorder %s14_s16, 4   ;;  %s2459_s13 = smov %s2127_s20 }
 0x1d2   : > { %s2460_s14 = smov %s2064_s15  ;;  %s2461_s15 = smov %s2463_s17 }
 0x1d3   :  { %13 = sbr.rel (!%p11_p13) target bundleno = 3 (0x3), region = 113 }

// kernel: encoder_forward.8
= control target key start
LH: loop header
LB: loop body
LE: loop exit
PB: predicated region body
PF: predicated region fallthrough
CT: control target
= control target key end

     0   :  { %v62_v5 = vlaneseq  ;;  %s721_s1 = inlined_call_operand.vmem [shape: f32[8,256], index: 1, kind: input, shape index: {}]   ;;  %s722_s0 = inlined_call_operand.vmem [shape: f32[128,256], index: 0, kind: input, shape index: {}]   ;;  %s723_s3 = inlined_call_operand.vmem [shape: f32[1,256], index: 3, kind: input, shape index: {}]   ;;  %s724_s2 = inlined_call_operand.vmem [shape: f32[1,256], index: 2, kind: input, shape index: {}]   ;;  %s725_s4 = inlined_call_operand.vmem [shape: f32[128,256], index: 4, kind: output, shape index: {}]  }
   0x1   :  { %v17_v0 = vld [vmem:[%s721_s1] ss:$8 sm:$0x3]  ;;  %v227_v1 = vld [vmem:[%s721_s1 + $0x1] ss:$8 sm:$0x3] }
   0x2   :  { %v18_v2 = vmul.f32 0.0078125, %v17_v0  ;;  %v21_v3 = vmul.f32 0.0078125, %v227_v1  ;;  %v63_v8 = vshrl.u32 %v62_v5, 7  ;;  %v268_v12 = vld [vmem:[%s722_s0] sm:$0xff]  ;;  %v276_v14 = vld [vmem:[%s722_s0 + $0x8] sm:$0xff]  ;;  %v287_v17 = vld [vmem:[%s722_s0 + $0x10] sm:$0xff] }
   0x3   :  { %v147_v13 = vld [vmem:[%s723_s3] sm:$0x3]  ;;  %v292_v18 = vld [vmem:[%s722_s0 + $0x18] sm:$0xff]  ;;  %v302_v20 = vld [vmem:[%s722_s0 + $0x28] sm:$0xff] }
   0x4   :  { %v22_v4 = vmul.f32 %v18_v2, %v18_v2  ;;  %v261_v10 = vsub.s32 0, %v63_v8  ;;  %v263_v11 = vsub.s32 1, %v63_v8  ;;  %v297_v19 = vld [vmem:[%s722_s0 + $0x20] sm:$0xff]  ;;  %v307_v21 = vld [vmem:[%s722_s0 + $0x30] sm:$0xff]  ;;  %v312_v22 = vld [vmem:[%s722_s0 + $0x38] sm:$0xff] }
   0x5   :  { %v317_v23 = vld [vmem:[%s722_s0 + $0x40] sm:$0xff]  ;;  %v322_v24 = vld [vmem:[%s722_s0 + $0x48] sm:$0xff]  ;;  %v327_v25 = vld [vmem:[%s722_s0 + $0x50] sm:$0xff] }
   0x6   :  { %v23_v6 = vsub.f32 %v21_v3, %v22_v4  ;;  %v279_v15 = vrot.slane %v18_v2, %v261_v10  ;;  %v282_v16 = vrot.slane %v18_v2, %v263_v11  ;;  %v330_v26 = vrot.slane %v147_v13, %v261_v10  ;;  %v335_v27 = vld [vmem:[%s722_s0 + $0x58] sm:$0xff]  ;;  %v340_v28 = vld [vmem:[%s722_s0 + $0x60] sm:$0xff]  ;;  %v345_v29 = vld [vmem:[%s722_s0 + $0x68] sm:$0xff] }
   0x7   :  { %v27_v30 = vld [vmem:[%s724_s2] sm:$0x3]  ;;  %v355_v33 = vrot.slane %v147_v13, %v263_v11  ;;  %v362_v35 = vld [vmem:[%s722_s0 + $0x70] sm:$0xff]  ;;  %v367_v36 = vld [vmem:[%s722_s0 + $0x78] sm:$0xff] }
   0x8   :  { %v24_v7 = vmax.f32 %v23_v6, 0.0  ;;  %v72_v31 = vsub.f32 %v268_v12, %v279_v15  ;;  %v73_v32 = vsub.f32 %v276_v14, %v282_v16  ;;  %v74_v34 = vsub.f32 %v287_v17, %v279_v15  ;;  %v372_v37 = vld [vmem:[%s722_s0 + $0x80] sm:$0xff]  ;;  %v385_v42 = vld [vmem:[%s722_s0 + $0x88] sm:$0xff]  ;;  %v390_v43 = vld [vmem:[%s722_s0 + $0x90] sm:$0xff] }
   0x9   :  { %v75_v38 = vsub.f32 %v292_v18, %v282_v16  ;;  %v76_v39 = vsub.f32 %v297_v19, %v279_v15  ;;  %v77_v40 = vsub.f32 %v302_v20, %v282_v16  ;;  %v78_v41 = vsub.f32 %v307_v21, %v279_v15  ;;  %v395_v44 = vld [vmem:[%s722_s0 + $0x98] sm:$0xff]  ;;  %v408_v49 = vld [vmem:[%s722_s0 + $0xa0] sm:$0xff]  ;;  %v413_v50 = vld [vmem:[%s722_s0 + $0xa8] sm:$0xff] }
   0xa   :  { %v25_v9 = vadd.f32 1e-05, %v24_v7  ;;  %v79_v45 = vsub.f32 %v312_v22, %v282_v16  ;;  %v80_v46 = vsub.f32 %v317_v23, %v279_v15  ;;  %v81_v47 = vsub.f32 %v322_v24, %v282_v16  ;;  %v418_v51 = vld [vmem:[%s722_s0 + $0xb0] sm:$0xff]  ;;  %v431_v56 = vld [vmem:[%s722_s0 + $0xb8] sm:$0xff]  ;;  %v436_v57 = vld [vmem:[%s722_s0 + $0xc0] sm:$0xff] }
   0xb   :  { %v82_v48 = vsub.f32 %v327_v25, %v279_v15  ;;  %v83_v52 = vsub.f32 %v335_v27, %v282_v16  ;;  %v84_v53 = vsub.f32 %v340_v28, %v279_v15  ;;  %v85_v54 = vsub.f32 %v345_v29, %v282_v16  ;;  %v441_v58 = vld [vmem:[%s722_s0 + $0xc8] sm:$0xff]  ;;  %v454_v0 = vld [vmem:[%s722_s0 + $0xd0] sm:$0xff]  ;;  %v459_v1 = vld [vmem:[%s722_s0 + $0xd8] sm:$0xff] }
   0xc   :  { %228 = vrsqrt.f32 %v25_v9  ;;  %v86_v55 = vsub.f32 %v362_v35, %v279_v15  ;;  %v87_v60 = vsub.f32 %v367_v36, %v282_v16  ;;  %v88_v61 = vsub.f32 %v372_v37, %v279_v15  ;;  %v464_v2 = vld [vmem:[%s722_s0 + $0xe0] sm:$0xff]  ;;  %v475_v7 = vld [vmem:[%s722_s0 + $0xe8] sm:$0xff]  ;;  %v480_v8 = vld [vmem:[%s722_s0 + $0xf0] sm:$0xff] }
   0xd   :  { %v89_v62 = vsub.f32 %v385_v42, %v282_v16  ;;  %v90_v63 = vsub.f32 %v390_v43, %v279_v15  ;;  %v91_v4 = vsub.f32 %v395_v44, %v282_v16  ;;  %v92_v5 = vsub.f32 %v408_v49, %v279_v15  ;;  %v485_v9 = vld [vmem:[%s722_s0 + $0xf8] sm:$0xff] }
   0xe   :  { %v93_v6 = vsub.f32 %v413_v50, %v282_v16  ;;  %v94_v12 = vsub.f32 %v418_v51, %v279_v15  ;;  %v95_v13 = vsub.f32 %v431_v56, %v282_v16  ;;  %v96_v14 = vsub.f32 %v436_v57, %v279_v15 }
   0xf   :  { %v97_v17 = vsub.f32 %v441_v58, %v282_v16  ;;  %v98_v20 = vsub.f32 %v454_v0, %v279_v15  ;;  %v99_v21 = vsub.f32 %v459_v1, %v282_v16  ;;  %v100_v22 = vsub.f32 %v464_v2, %v279_v15 }
  0x10   :  { %v101_v23 = vsub.f32 %v475_v7, %v282_v16  ;;  %v102_v24 = vsub.f32 %v480_v8, %v279_v15 }
  0x19   :  { %v229_v59 = vpop.eup %228 }
  0x1a   :  { %v28_v3 = vmul.f32 %v229_v59, %v27_v30 }
  0x1c   :  { %v496_v18 = vrot.slane %v28_v3, %v261_v10  ;;  %v499_v19 = vrot.slane %v28_v3, %v263_v11  ;;  %v103_v10 = vsub.f32 %v485_v9, %v282_v16 }
  0x1e   :  { %v115_v11 = vmul.f32 %v496_v18, %v72_v31  ;;  %v116_v25 = vmul.f32 %v499_v19, %v73_v32  ;;  %v117_v27 = vmul.f32 %v496_v18, %v74_v34  ;;  %v118_v28 = vmul.f32 %v499_v19, %v75_v38 }
  0x1f   :  { %v119_v29 = vmul.f32 %v496_v18, %v76_v39  ;;  %v120_v30 = vmul.f32 %v499_v19, %v77_v40  ;;  %v121_v35 = vmul.f32 %v496_v18, %v78_v41  ;;  %v122_v36 = vmul.f32 %v499_v19, %v79_v45 }
  0x20   :  { %v159_v59 = vadd.f32 %v330_v26, %v115_v11  ;;  %v160_v3 = vadd.f32 %v355_v33, %v116_v25  ;;  %v161_v31 = vadd.f32 %v330_v26, %v117_v27  ;;  %v162_v32 = vadd.f32 %v355_v33, %v118_v28 }
  0x21   :  { %v163_v34 = vadd.f32 %v330_v26, %v119_v29  ;;  %v164_v38 = vadd.f32 %v355_v33, %v120_v30  ;;  %v165_v39 = vadd.f32 %v330_v26, %v121_v35  ;;  %v166_v40 = vadd.f32 %v355_v33, %v122_v36 }
  0x22   :  { %191 = vst [vmem:[%s725_s4] sm:$0xff] %v159_v59  ;;  %192 = vst [vmem:[%s725_s4 + $0x8] sm:$0xff] %v160_v3  ;;  %v123_v41 = vmul.f32 %v496_v18, %v80_v46  ;;  %v124_v45 = vmul.f32 %v499_v19, %v81_v47  ;;  %v125_v11 = vmul.f32 %v496_v18, %v82_v48 }
  0x23   :  { %193 = vst [vmem:[%s725_s4 + $0x10] sm:$0xff] %v161_v31  ;;  %194 = vst [vmem:[%s725_s4 + $0x18] sm:$0xff] %v162_v32  ;;  %v126_v25 = vmul.f32 %v499_v19, %v83_v52  ;;  %v127_v46 = vmul.f32 %v496_v18, %v84_v53  ;;  %v128_v47 = vmul.f32 %v499_v19, %v85_v54 }
  0x24   :  { %195 = vst [vmem:[%s725_s4 + $0x20] sm:$0xff] %v163_v34  ;;  %196 = vst [vmem:[%s725_s4 + $0x28] sm:$0xff] %v164_v38  ;;  %v129_v48 = vmul.f32 %v496_v18, %v86_v55  ;;  %v130_v52 = vmul.f32 %v499_v19, %v87_v60  ;;  %v167_v27 = vadd.f32 %v330_v26, %v123_v41 }
  0x25   :  { %197 = vst [vmem:[%s725_s4 + $0x30] sm:$0xff] %v165_v39  ;;  %198 = vst [vmem:[%s725_s4 + $0x38] sm:$0xff] %v166_v40  ;;  %v168_v28 = vadd.f32 %v355_v33, %v124_v45  ;;  %v169_v29 = vadd.f32 %v330_v26, %v125_v11  ;;  %v170_v30 = vadd.f32 %v355_v33, %v126_v25 }
  0x26   :  { %v171_v35 = vadd.f32 %v330_v26, %v127_v46  ;;  %v172_v36 = vadd.f32 %v355_v33, %v128_v47  ;;  %v173_v53 = vadd.f32 %v330_v26, %v129_v48  ;;  %v174_v54 = vadd.f32 %v355_v33, %v130_v52  ;;  %199 = vst [vmem:[%s725_s4 + $0x40] sm:$0xff] %v167_v27 }
  0x27   :  { %200 = vst [vmem:[%s725_s4 + $0x48] sm:$0xff] %v168_v28  ;;  %201 = vst [vmem:[%s725_s4 + $0x50] sm:$0xff] %v169_v29  ;;  %v131_v55 = vmul.f32 %v496_v18, %v88_v61  ;;  %v132_v60 = vmul.f32 %v499_v19, %v89_v62  ;;  %v133_v59 = vmul.f32 %v496_v18, %v90_v63 }
  0x28   :  { %202 = vst [vmem:[%s725_s4 + $0x58] sm:$0xff] %v170_v30  ;;  %v134_v3 = vmul.f32 %v499_v19, %v91_v4  ;;  %203 = vst [vmem:[%s725_s4 + $0x60] sm:$0xff] %v171_v35  ;;  %v135_v37 = vmul.f32 %v496_v18, %v92_v5  ;;  %v136_v42 = vmul.f32 %v499_v19, %v93_v6 }
  0x29   :  { %204 = vst [vmem:[%s725_s4 + $0x68] sm:$0xff] %v172_v36  ;;  %205 = vst [vmem:[%s725_s4 + $0x70] sm:$0xff] %v173_v53  ;;  %v137_v43 = vmul.f32 %v496_v18, %v94_v12  ;;  %v138_v44 = vmul.f32 %v499_v19, %v95_v13  ;;  %v175_v61 = vadd.f32 %v330_v26, %v131_v55 }
  0x2a   :  { %206 = vst [vmem:[%s725_s4 + $0x78] sm:$0xff] %v174_v54  ;;  %v176_v49 = vadd.f32 %v355_v33, %v132_v60  ;;  %v177_v62 = vadd.f32 %v330_v26, %v133_v59  ;;  %v178_v50 = vadd.f32 %v355_v33, %v134_v3  ;;  %v179_v63 = vadd.f32 %v330_v26, %v135_v37 }
  0x2b   :  { %v180_v4 = vadd.f32 %v355_v33, %v136_v42  ;;  %v181_v51 = vadd.f32 %v330_v26, %v137_v43  ;;  %v182_v5 = vadd.f32 %v355_v33, %v138_v44  ;;  %207 = vst [vmem:[%s725_s4 + $0x80] sm:$0xff] %v175_v61  ;;  %v139_v56 = vmul.f32 %v496_v18, %v96_v14 }
  0x2c   :  { %208 = vst [vmem:[%s725_s4 + $0x88] sm:$0xff] %v176_v49  ;;  %209 = vst [vmem:[%s725_s4 + $0x90] sm:$0xff] %v177_v62  ;;  %v140_v6 = vmul.f32 %v499_v19, %v97_v17  ;;  %v141_v12 = vmul.f32 %v496_v18, %v98_v20  ;;  %v142_v13 = vmul.f32 %v499_v19, %v99_v21 }
  0x2d   :  { %210 = vst [vmem:[%s725_s4 + $0x98] sm:$0xff] %v178_v50  ;;  %211 = vst [vmem:[%s725_s4 + $0xa0] sm:$0xff] %v179_v63  ;;  %v143_v57 = vmul.f32 %v496_v18, %v100_v22  ;;  %v144_v58 = vmul.f32 %v499_v19, %v101_v23  ;;  %v145_v0 = vmul.f32 %v496_v18, %v102_v24 }
  0x2e   :  { %212 = vst [vmem:[%s725_s4 + $0xa8] sm:$0xff] %v180_v4  ;;  %213 = vst [vmem:[%s725_s4 + $0xb0] sm:$0xff] %v181_v51  ;;  %v146_v1 = vmul.f32 %v499_v19, %v103_v10  ;;  %v183_v14 = vadd.f32 %v330_v26, %v139_v56  ;;  %v184_v2 = vadd.f32 %v355_v33, %v140_v6 }
  0x2f   :  { %214 = vst [vmem:[%s725_s4 + $0xb8] sm:$0xff] %v182_v5  ;;  %v185_v17 = vadd.f32 %v330_v26, %v141_v12  ;;  %v186_v7 = vadd.f32 %v355_v33, %v142_v13  ;;  %v187_v20 = vadd.f32 %v330_v26, %v143_v57  ;;  %v188_v21 = vadd.f32 %v355_v33, %v144_v58 }
  0x30   :  { %v189_v15 = vadd.f32 %v330_v26, %v145_v0  ;;  %v190_v8 = vadd.f32 %v355_v33, %v146_v1  ;;  %215 = vst [vmem:[%s725_s4 + $0xc0] sm:$0xff] %v183_v14  ;;  %216 = vst [vmem:[%s725_s4 + $0xc8] sm:$0xff] %v184_v2 }
  0x31   :  { %217 = vst [vmem:[%s725_s4 + $0xd0] sm:$0xff] %v185_v17  ;;  %218 = vst [vmem:[%s725_s4 + $0xd8] sm:$0xff] %v186_v7 }
  0x32   :  { %219 = vst [vmem:[%s725_s4 + $0xe0] sm:$0xff] %v187_v20  ;;  %220 = vst [vmem:[%s725_s4 + $0xe8] sm:$0xff] %v188_v21 }
  0x33   :  { %221 = vst [vmem:[%s725_s4 + $0xf0] sm:$0xff] %v189_v15  ;;  %222 = vst [vmem:[%s725_s4 + $0xf8] sm:$0xff] %v190_v8 }

// kernel: encoder_forward.10
= control target key start
LH: loop header
LB: loop body
LE: loop exit
PB: predicated region body
PF: predicated region fallthrough
CT: control target
= control target key end

     0   :  { %s669_s15 = smov 0   ;;  %s671_s16 = smov 0   ;;  %s760_s0 = inlined_call_operand.vmem [shape: f32[32,512], index: 0, kind: input, shape index: {}]   ;;  %s761_s1 = inlined_call_operand.vmem [shape: f32[8,512], index: 1, kind: input, shape index: {}]   ;;  %s762_s2 = inlined_call_operand.vmem [shape: f32[1,512], index: 2, kind: input, shape index: {}]   ;;  %s763_s3 = inlined_call_operand.vmem [shape: f32[1,512], index: 3, kind: input, shape index: {}]   ;;  %s764_s4 = inlined_call_operand.vmem [shape: f32[32,512], index: 4, kind: output, shape index: {}]  }
   0x1   :  { %s673_s17 = smov 0   ;;  %s675_s18 = smov 0  }
   0x2   :  { %s677_s19 = smov 0  }
   0x3 LB: > { %s23_s20 = sadd.s32 1, %s638_s18  ;;  %s540_s21 = sadd.s32 4294967295, %s642_s19   ;;  %s642_s19 = sphi %s677_s19, %s14_s19   ;;  %s638_s18 = sphi %s675_s18, %s769_s18   ;;  %s634_s17 = sphi %s673_s17, %s768_s17   ;;  %s630_s16 = sphi %s671_s16, %s767_s16   ;;  %s626_s15 = sphi %s669_s15, %s766_s15  }
   0x4   : > { %p24_p0 = scmp.ge.s32.totalorder %s23_s20, 2  ;;  %p42_p1 = scmp.ne.s32.totalorder %s630_s16, %s626_s15 }
   0x5   : > { %p43_p2 = scmp.eq.s32.totalorder %s642_s19, 0  ;;  %p152_p4 = scmp.eq.s32.totalorder %s540_s21, 1 }
   0x6   : > { %s771_s20 = smov (%p24_p0, %s23_s20), 0  ;;  %s35_s23 = sadd.s32 1, %s630_s16 }
   0x7   : > { %p44_p3 = por %p43_p2, %p42_p1  ;;  %s31_s22 = ssub.s32 %s638_s18, %s771_s20 }
   0x8   : > { %p33_p5 = scmp.eq.s32.totalorder %s31_s22, 0  ;;  %p704_p6 = por %p152_p4, %p42_p1 }
   0x9   : > { %p543_p7 = scmp.ge.s32.totalorder %s642_s19, 2 }
   0xa   : > { %s709_s25 = scalar_select %p33_p5, %s630_s16, %s35_s23  }
   0xb   : > { %174 = sbr.rel (%p543_p7) target bundleno = 24 (0x18), region = 16 }
  0x10   : > { %177 = sbr.rel (!%p44_p3) target bundleno = 24 (0x18), region = 20  ;;  %s179_s26 = sand.u32 (%p44_p3), 1, %s630_s16  }
  0x11   : > { %s560_s27 = sshll.u32 (%p44_p3), %s638_s18, 4  ;;  %s544_s28 = sshll.u32 (%p44_p3), %s179_s26, 6 }
  0x12   : > { %s187_s5 = scalar_lea.vmem (%p44_p3), %s760_s0, %s560_s27  ;;  %s181_s6 = scalar_lea.vmem (%p44_p3), [#allocation2], %s544_s28 }
  0x13   : > { %v200_v0 = vld [vmem:[%s187_s5] sm:$0xff] (%p44_p3)  ;;  %v202_v1 = vld [vmem:[%s187_s5 + $0x8] sm:$0xff] (%p44_p3) }
  0x14   : > { %v204_v2 = vld [vmem:[%s187_s5 + $0x20] sm:$0xff] (%p44_p3)  ;;  %201 = vst [vmem:[%s181_s6] sm:$0xff] (%p44_p3), %v200_v0  ;;  %203 = vst [vmem:[%s181_s6 + $0x8] sm:$0xff] (%p44_p3), %v202_v1  ;;  %v206_v3 = vld [vmem:[%s187_s5 + $0x28] sm:$0xff] (%p44_p3) }
  0x15   : > { %205 = vst [vmem:[%s181_s6 + $0x10] sm:$0xff] %v204_v2  ;;  %v208_v4 = vld [vmem:[%s187_s5 + $0x40] sm:$0xff]  ;;  %v210_v5 = vld [vmem:[%s187_s5 + $0x48] sm:$0xff]  ;;  %207 = vst [vmem:[%s181_s6 + $0x18] sm:$0xff] %v206_v3 }
  0x16   : > { %209 = vst [vmem:[%s181_s6 + $0x20] sm:$0xff] %v208_v4  ;;  %211 = vst [vmem:[%s181_s6 + $0x28] sm:$0xff] %v210_v5  ;;  %v212_v6 = vld [vmem:[%s187_s5 + $0x60] sm:$0xff]  ;;  %v214_v7 = vld [vmem:[%s187_s5 + $0x68] sm:$0xff] }
  0x17   : > { %213 = vst [vmem:[%s181_s6 + $0x30] sm:$0xff] %v212_v6  ;;  %215 = vst [vmem:[%s181_s6 + $0x38] sm:$0xff] %v214_v7 }
  0x18 PF: > { %p547_p8 = scmp.ge.s32.totalorder %s642_s19, 1  ;;  %p245_p9 = scmp.lt.s32.totalorder %s642_s19, 3 }
  0x1a   : > { %p246_p10 = pnand %p547_p8, %p245_p9 }
  0x1b   : > { %s550_s7 = sshll.u32 (!%p246_p10), %s634_s17, 1  ;;  %s252_s12 = sand.u32 (!%p246_p10), 1, %s626_s15  }
  0x1c   : > { %249 = sbr.rel (%p246_p10) target bundleno = 81 (0x51), region = 55  ;;  %p292_p11 = scmp.lt.s32.totalorder (!%p246_p10), %s550_s7, 3 }
  0x1d   : > { %s727_s13 = sshll.u32 (!%p246_p10), %s252_s12, 6 }
  0x1e   : > { %s254_s28 = scalar_lea.vmem (!%p246_p10), [#allocation2], %s727_s13  ;;  %s288_s15 = scalar_lea.vmem (!%p246_p10), [#allocation3], %s727_s13 }
  0x21   : > { %s773_s7 = smov (!%p292_p11, %s550_s7), 3  ;;  %v330_v15 = vlaneseq  ;;  %v321_v21 = vld [vmem:[%s254_s28] sm:$0xff]  ;;  %v322_v22 = vld [vmem:[%s254_s28 + $0x8] sm:$0xff]  ;;  %v323_v24 = vld [vmem:[%s254_s28 + $0x10] sm:$0xff]  ;;  %s561_s29 = sshll.u32 (%p704_p6), %s634_s17, 4 }
  0x22   : > { %s551_s8 = sshll.u32 %s773_s7, 3  ;;  %s300_s22 = scalar_lea.vmem %s762_s2, %s773_s7  ;;  %v324_v26 = vld [vmem:[%s254_s28 + $0x18] sm:$0xff]  ;;  %v325_v27 = vld [vmem:[%s254_s28 + $0x20] sm:$0xff]  ;;  %v326_v28 = vld [vmem:[%s254_s28 + $0x28] sm:$0xff] }
  0x23   : > { %s295_s11 = scalar_lea.vmem %s761_s1, %s551_s8  ;;  %v331_v17 = vshrl.u32 %v330_v15, 7  ;;  %s305_s27 = scalar_lea.vmem %s763_s3, %s773_s7  ;;  %v319_v25 = vld [vmem:[%s300_s22] sm:$0x3]  ;;  %v327_v29 = vld [vmem:[%s254_s28 + $0x30] sm:$0xff]  ;;  %v328_v30 = vld [vmem:[%s254_s28 + $0x38] sm:$0xff] }
  0x24   : > { %v309_v8 = vld [vmem:[%s295_s11] ss:$8 sm:$0x3]  ;;  %v554_v9 = vld [vmem:[%s295_s11 + $0x1] ss:$8 sm:$0x3]  ;;  %s407_s6 = scalar_lea.vmem (%p704_p6), %s764_s4, %s561_s29 }
  0x25   : > { %v310_v10 = vmul.f32 0.03125, %v309_v8  ;;  %v313_v11 = vmul.f32 0.03125, %v554_v9  ;;  %v332_v18 = vsub.s32 0, %v331_v17  ;;  %v336_v19 = vsub.s32 1, %v331_v17  ;;  %v367_v33 = vld [vmem:[%s305_s27] sm:$0x3] }
  0x27   : > { %v314_v12 = vmul.f32 %v310_v10, %v310_v10  ;;  %v333_v20 = vrot.slane %v310_v10, %v332_v18  ;;  %v337_v23 = vrot.slane %v310_v10, %v336_v19  ;;  %v372_v43 = vrot.slane %v367_v33, %v332_v18 }
  0x28   : > { %v376_v45 = vrot.slane %v367_v33, %v336_v19 }
  0x29   : > { %v315_v13 = vsub.f32 %v313_v11, %v314_v12  ;;  %v340_v32 = vsub.f32 %v321_v21, %v333_v20  ;;  %v341_v35 = vsub.f32 %v322_v22, %v337_v23  ;;  %v342_v36 = vsub.f32 %v323_v24, %v333_v20 }
  0x2a   : > { %v343_v37 = vsub.f32 %v324_v26, %v337_v23  ;;  %v344_v38 = vsub.f32 %v325_v27, %v333_v20  ;;  %v345_v39 = vsub.f32 %v326_v28, %v337_v23  ;;  %v346_v40 = vsub.f32 %v327_v29, %v333_v20 }
  0x2b   : > { %v316_v14 = vmax.f32 %v315_v13, 0.0  ;;  %v347_v41 = vsub.f32 %v328_v30, %v337_v23 }
  0x2d   : > { %v317_v16 = vadd.f32 1e-05, %v316_v14 }
  0x2f   : > { %602 = vrsqrt.f32 %v317_v16 }
  0x3c   : > { %v603_v31 = vpop.eup %602 }
  0x3d   : > { %v320_v34 = vmul.f32 %v603_v31, %v319_v25 }
  0x3f   : > { %v352_v42 = vrot.slane %v320_v34, %v332_v18  ;;  %v356_v44 = vrot.slane %v320_v34, %v336_v19 }
  0x41   : > { %v359_v46 = vmul.f32 %v352_v42, %v340_v32  ;;  %v360_v47 = vmul.f32 %v356_v44, %v341_v35  ;;  %v361_v48 = vmul.f32 %v352_v42, %v342_v36  ;;  %v362_v49 = vmul.f32 %v356_v44, %v343_v37 }
  0x42   : > { %v363_v50 = vmul.f32 %v352_v42, %v344_v38  ;;  %v364_v51 = vmul.f32 %v356_v44, %v345_v39  ;;  %v365_v52 = vmul.f32 %v352_v42, %v346_v40  ;;  %v366_v53 = vmul.f32 %v356_v44, %v347_v41 }
  0x43   : > { %v379_v54 = vadd.f32 %v372_v43, %v359_v46  ;;  %v380_v55 = vadd.f32 %v376_v45, %v360_v47  ;;  %v381_v56 = vadd.f32 %v372_v43, %v361_v48  ;;  %v382_v57 = vadd.f32 %v376_v45, %v362_v49 }
  0x44   : > { %v383_v58 = vadd.f32 %v372_v43, %v363_v50  ;;  %v384_v59 = vadd.f32 %v376_v45, %v364_v51  ;;  %v385_v60 = vadd.f32 %v372_v43, %v365_v52  ;;  %v386_v61 = vadd.f32 %v376_v45, %v366_v53  ;;  %401 = sbr.rel (!%p704_p6) target bundleno = 81 (0x51), region = 63 }
  0x45   : > { %387 = vst [vmem:[%s288_s15] sm:$0xff] %v379_v54  ;;  %388 = vst [vmem:[%s288_s15 + $0x8] sm:$0xff] %v380_v55 }
  0x46   : > { %389 = vst [vmem:[%s288_s15 + $0x10] sm:$0xff] %v381_v56  ;;  %390 = vst [vmem:[%s288_s15 + $0x18] sm:$0xff] %v382_v57 }
  0x47   : > { %391 = vst [vmem:[%s288_s15 + $0x20] sm:$0xff] %v383_v58  ;;  %392 = vst [vmem:[%s288_s15 + $0x28] sm:$0xff] %v384_v59 }
  0x48   : > { %393 = vst [vmem:[%s288_s15 + $0x30] sm:$0xff] %v385_v60  ;;  %394 = vst [vmem:[%s288_s15 + $0x38] sm:$0xff] %v386_v61 }
  0x4c   : > { %v420_v62 = vld [vmem:[%s288_s15] sm:$0xff]  ;;  %v422_v63 = vld [vmem:[%s288_s15 + $0x8] sm:$0xff] }
  0x4d   : > { %v424_v0 = vld [vmem:[%s288_s15 + $0x10] sm:$0xff]  ;;  %v426_v1 = vld [vmem:[%s288_s15 + $0x18] sm:$0xff]  ;;  %421 = vst [vmem:[%s407_s6] sm:$0xff] %v420_v62  ;;  %423 = vst [vmem:[%s407_s6 + $0x8] sm:$0xff] %v422_v63 }
  0x4e   : > { %v428_v2 = vld [vmem:[%s288_s15 + $0x20] sm:$0xff]  ;;  %v430_v3 = vld [vmem:[%s288_s15 + $0x28] sm:$0xff]  ;;  %425 = vst [vmem:[%s407_s6 + $0x20] sm:$0xff] %v424_v0  ;;  %427 = vst [vmem:[%s407_s6 + $0x28] sm:$0xff] %v426_v1 }
  0x4f   : > { %429 = vst [vmem:[%s407_s6 + $0x40] sm:$0xff] %v428_v2  ;;  %431 = vst [vmem:[%s407_s6 + $0x48] sm:$0xff] %v430_v3  ;;  %v432_v4 = vld [vmem:[%s288_s15 + $0x30] sm:$0xff]  ;;  %v434_v5 = vld [vmem:[%s288_s15 + $0x38] sm:$0xff] }
  0x50   : > { %433 = vst [vmem:[%s407_s6 + $0x60] sm:$0xff] %v432_v4  ;;  %435 = vst [vmem:[%s407_s6 + $0x68] sm:$0xff] %v434_v5 }
  0x51 PF: > { %s14_s19 = sadd.s32 1, %s642_s19   ;;  %s766_s15 = smov %s630_s16 }
  0x52   : > { %p11_p12 = scmp.ge.s32.totalorder %s14_s19, 4   ;;  %s767_s16 = smov %s709_s25 }
  0x53   : > { %s768_s17 = smov %s638_s18  ;;  %s769_s18 = smov %s771_s20 }
  0x54   :  { %13 = sbr.rel (!%p11_p12) target bundleno = 3 (0x3), region = 127 }

// kernel: encoder_forward.9
= control target key start
LH: loop header
LB: loop body
LE: loop exit
PB: predicated region body
PF: predicated region fallthrough
CT: control target
= control target key end

     0   :  { %s2231_s0 = inlined_call_operand.vmem [shape: bf16[32,4096], index: 0, kind: input, shape index: {}]   ;;  %s2232_s1 = inlined_call_operand.vmem [shape: bf16[4096,512], index: 1, kind: input, shape index: {}]   ;;  %s2233_s2 = inlined_call_operand.vmem [shape: f32[32,512], index: 2, kind: output, shape index: {0}]   ;;  %s2234_s3 = inlined_call_operand.vmem [shape: f32[8,512], index: 3, kind: output, shape index: {1}]  }
   0x1   :  { %2236 = sst [smem:[#allocation7_spill]] %s2231_s0 }
   0x2   :  { %2237 = sst [smem:[#allocation8_spill]] %s2232_s1 }
   0x3   :  { %s1827_s12 = smov 0   ;;  %s1829_s13 = smov 0  }
   0x4   :  { %s1831_s14 = smov 0   ;;  %s1833_s15 = smov 0  }
   0x5   :  { %s1835_s16 = smov 0   ;;  %s1837_s17 = smov 0  }
   0x6   :  { %s1839_s18 = smov 0   ;;  %s1841_s19 = smov 0  }
   0x7   :  { %s1843_s20 = smov 0   ;;  %s1845_s21 = smov 0  }
   0x8   :  { %s1847_s22 = smov 0  }
   0x9 LB: > { %s1417_s23 = sadd.s32 4294967295, %s1803_s22   ;;  %s26_s24 = sadd.s32 1, %s1795_s20  ;;  %s1803_s22 = sphi %s1847_s22, %s14_s22   ;;  %s1799_s21 = sphi %s1845_s21, %s2254_s21   ;;  %s1795_s20 = sphi %s1843_s20, %s2253_s20   ;;  %s1791_s19 = sphi %s1841_s19, %s2252_s19   ;;  %s1787_s18 = sphi %s1839_s18, %s2251_s18   ;;  %s1783_s17 = sphi %s1837_s17, %s2250_s17   ;;  %s1779_s16 = sphi %s1835_s16, %s2249_s16   ;;  %s1775_s15 = sphi %s1833_s15, %s2248_s15   ;;  %s1771_s14 = sphi %s1831_s14, %s2247_s14   ;;  %s1767_s13 = sphi %s1829_s13, %s2246_s13   ;;  %s1763_s12 = sphi %s1827_s12, %s2245_s12  }
   0xa   : > { %p27_p0 = scmp.ge.s32.totalorder %s26_s24, 8  ;;  %s33_s25 = sadd.s32 1, %s1799_s21 }
   0xb   : > { %s42_s26 = sadd.s32 1, %s1783_s17  ;;  %p49_p1 = scmp.ne.s32.totalorder %s1783_s17, %s1779_s16 }
   0xc   : > { %s2256_s24 = smov (%p27_p0, %s26_s24), 0  ;;  %s2258_s25 = smov (!%p27_p0, %s33_s25), %s1799_s21 }
   0xd   : > { %s38_s27 = ssub.s32 %s1795_s20, %s2256_s24  ;;  %p50_p2 = scmp.eq.s32.totalorder %s1803_s22, 0 }
   0xe   : > { %p35_p3 = scmp.ge.s32.totalorder %s2258_s25, 2  ;;  %p40_p4 = scmp.eq.s32.totalorder %s38_s27, 0 }
   0xf   : > { %p1894_p5 = por %p50_p2, %p49_p1  ;;  %s70_s29 = sadd.s32 1, %s1775_s15 }
  0x10   : > { %s2260_s25 = smov (%p35_p3, %s2258_s25), 0  ;;  %p77_p6 = scmp.ne.s32.totalorder %s1775_s15, %s1771_s14 }
  0x11   : > { %2239 = sst [smem:[#allocation6_spill]] %s2260_s25  ;;  %s66_s4 = ssub.s32 %s1799_s21, %s2260_s25 }
  0x12   : > { %s1902_s30 = scalar_select %p40_p4, %s1783_s17, %s42_s26  }
  0x13   : > { %s67_s5 = sor.u32 %s66_s4, %s38_s27  ;;  %p96_p7 = scmp.eq.s32.totalorder %s66_s4, 0 }
  0x14   : > { %p68_p8 = scmp.eq.s32.totalorder %s67_s5, 0  ;;  %p1908_p9 = por %p77_p6, %p50_p2 }
  0x15   : > { %s98_s7 = sadd.s32 1, %s1767_s13  ;;  %p108_p10 = scmp.ne.s32.totalorder %s1767_s13, %s1763_s12 }
  0x16   : > { %s1916_s8 = scalar_select %p68_p8, %s1775_s15, %s70_s29  }
  0x17   : > { %s1919_s9 = scalar_select %p96_p7, %s1767_s13, %s98_s7  }
  0x18   : > { %p109_p11 = scmp.eq.s32.totalorder %s1417_s23, 15  ;;  %p1420_p13 = scmp.ge.s32.totalorder %s1803_s22, 16 }
  0x1a   : > { %p1921_p12 = por %p109_p11, %p108_p10  ;;  %157 = sbr.rel (%p1420_p13) target bundleno = 87 (0x57), region = 16 }
  0x1f   : > { %160 = sbr.rel (!%p1894_p5) target bundleno = 45 (0x2d), region = 20  ;;  %s162_s11 = sand.u32 (%p1894_p5), 1, %s1783_s17  }
  0x20   : > { %s1515_s26 = sshll.u32 (%p1894_p5), %s1795_s20, 4  ;;  %s1421_s27 = sshll.u32 (%p1894_p5), %s162_s11, 6 }
  0x21   : > { %s2242_s0 = sld [smem:[#allocation7_spill]] (%p1894_p5)  ;;  %s164_s23 = scalar_lea.vmem (%p1894_p5), [#allocation3], %s1421_s27 }
  0x27   : > { %s170_s5 = scalar_lea.vmem %s2242_s0, %s1515_s26 }
  0x28   : > { %v183_v0 = vld [vmem:[%s170_s5] sm:$0xff]  ;;  %v185_v1 = vld [vmem:[%s170_s5 + $0x8] sm:$0xff] }
  0x29   : > { %v187_v2 = vld [vmem:[%s170_s5 + $0x80] sm:$0xff]  ;;  %184 = vst [vmem:[%s164_s23] sm:$0xff] %v183_v0  ;;  %186 = vst [vmem:[%s164_s23 + $0x8] sm:$0xff] %v185_v1  ;;  %v189_v3 = vld [vmem:[%s170_s5 + $0x88] sm:$0xff] }
  0x2a   : > { %188 = vst [vmem:[%s164_s23 + $0x10] sm:$0xff] %v187_v2  ;;  %v191_v4 = vld [vmem:[%s170_s5 + $0x100] sm:$0xff]  ;;  %v193_v5 = vld [vmem:[%s170_s5 + $0x108] sm:$0xff]  ;;  %190 = vst [vmem:[%s164_s23 + $0x18] sm:$0xff] %v189_v3 }
  0x2b   : > { %192 = vst [vmem:[%s164_s23 + $0x20] sm:$0xff] %v191_v4  ;;  %194 = vst [vmem:[%s164_s23 + $0x28] sm:$0xff] %v193_v5  ;;  %v195_v6 = vld [vmem:[%s170_s5 + $0x180] sm:$0xff]  ;;  %v197_v7 = vld [vmem:[%s170_s5 + $0x188] sm:$0xff] }
  0x2c   : > { %196 = vst [vmem:[%s164_s23 + $0x30] sm:$0xff] %v195_v6  ;;  %198 = vst [vmem:[%s164_s23 + $0x38] sm:$0xff] %v197_v7 }
  0x2d PF: > { %204 = sbr.rel (!%p1908_p9) target bundleno = 87 (0x57), region = 43  ;;  %s206_s28 = sand.u32 (%p1908_p9), 1, %s1775_s15  }
  0x2e   : > { %s1426_s7 = sshll.u32 (%p1908_p9), %s1799_s21, 1  ;;  %s1424_s11 = sshll.u32 (%p1908_p9), %s206_s28, 9 }
  0x2f   : > { %s1516_s26 = sshll.u32 (%p1908_p9), %s1795_s20, 8  ;;  %s2243_s1 = sld [smem:[#allocation8_spill]] (%p1908_p9) }
  0x30   : > { %s212_s27 = sadd.s32 (%p1908_p9), %s1516_s26, %s1426_s7  ;;  %s1946_s6 = scalar_lea.vmem (%p1908_p9), [#allocation4], %s1424_s11 }
  0x31   : > { %s1428_s29 = sshll.u32 (%p1908_p9), %s212_s27, 2 }
  0x35   : > { %s1941_s25 = scalar_lea.vmem %s2243_s1, %s1428_s29 }
  0x36   : > { %v369_v8 = vld [vmem:[%s1941_s25] sm:$0xff]  ;;  %v371_v9 = vld [vmem:[%s1941_s25 + $0x10] sm:$0xff] }
  0x37   : > { %v373_v10 = vld [vmem:[%s1941_s25 + $0x20] sm:$0xff]  ;;  %370 = vst [vmem:[%s1946_s6] sm:$0xff] %v369_v8  ;;  %372 = vst [vmem:[%s1946_s6 + $0x8] sm:$0xff] %v371_v9  ;;  %v375_v11 = vld [vmem:[%s1941_s25 + $0x30] sm:$0xff] }
  0x38   : > { %374 = vst [vmem:[%s1946_s6 + $0x10] sm:$0xff] %v373_v10  ;;  %v377_v12 = vld [vmem:[%s1941_s25 + $0x40] sm:$0xff]  ;;  %v379_v13 = vld [vmem:[%s1941_s25 + $0x50] sm:$0xff]  ;;  %376 = vst [vmem:[%s1946_s6 + $0x18] sm:$0xff] %v375_v11 }
  0x39   : > { %378 = vst [vmem:[%s1946_s6 + $0x20] sm:$0xff] %v377_v12  ;;  %380 = vst [vmem:[%s1946_s6 + $0x28] sm:$0xff] %v379_v13  ;;  %v381_v14 = vld [vmem:[%s1941_s25 + $0x60] sm:$0xff]  ;;  %v383_v15 = vld [vmem:[%s1941_s25 + $0x70] sm:$0xff] }
  0x3a   : > { %v385_v16 = vld [vmem:[%s1941_s25 + $0x80] sm:$0xff]  ;;  %382 = vst [vmem:[%s1946_s6 + $0x30] sm:$0xff] %v381_v14  ;;  %384 = vst [vmem:[%s1946_s6 + $0x38] sm:$0xff] %v383_v15  ;;  %v387_v17 = vld [vmem:[%s1941_s25 + $0x90] sm:$0xff] }
  0x3b   : > { %386 = vst [vmem:[%s1946_s6 + $0x40] sm:$0xff] %v385_v16  ;;  %v389_v18 = vld [vmem:[%s1941_s25 + $0xa0] sm:$0xff]  ;;  %v391_v19 = vld [vmem:[%s1941_s25 + $0xb0] sm:$0xff]  ;;  %388 = vst [vmem:[%s1946_s6 + $0x48] sm:$0xff] %v387_v17 }
  0x3c   : > { %390 = vst [vmem:[%s1946_s6 + $0x50] sm:$0xff] %v389_v18  ;;  %392 = vst [vmem:[%s1946_s6 + $0x58] sm:$0xff] %v391_v19  ;;  %v393_v20 = vld [vmem:[%s1941_s25 + $0xc0] sm:$0xff]  ;;  %v395_v21 = vld [vmem:[%s1941_s25 + $0xd0] sm:$0xff] }
  0x3d   : > { %v397_v22 = vld [vmem:[%s1941_s25 + $0xe0] sm:$0xff]  ;;  %394 = vst [vmem:[%s1946_s6 + $0x60] sm:$0xff] %v393_v20  ;;  %396 = vst [vmem:[%s1946_s6 + $0x68] sm:$0xff] %v395_v21  ;;  %v399_v23 = vld [vmem:[%s1941_s25 + $0xf0] sm:$0xff] }
  0x3e   : > { %398 = vst [vmem:[%s1946_s6 + $0x70] sm:$0xff] %v397_v22  ;;  %v401_v24 = vld [vmem:[%s1941_s25 + $0x100] sm:$0xff]  ;;  %v403_v25 = vld [vmem:[%s1941_s25 + $0x110] sm:$0xff]  ;;  %400 = vst [vmem:[%s1946_s6 + $0x78] sm:$0xff] %v399_v23 }
  0x3f   : > { %402 = vst [vmem:[%s1946_s6 + $0x80] sm:$0xff] %v401_v24  ;;  %404 = vst [vmem:[%s1946_s6 + $0x88] sm:$0xff] %v403_v25  ;;  %v405_v26 = vld [vmem:[%s1941_s25 + $0x120] sm:$0xff]  ;;  %v407_v27 = vld [vmem:[%s1941_s25 + $0x130] sm:$0xff] }
  0x40   : > { %v409_v28 = vld [vmem:[%s1941_s25 + $0x140] sm:$0xff]  ;;  %406 = vst [vmem:[%s1946_s6 + $0x90] sm:$0xff] %v405_v26  ;;  %408 = vst [vmem:[%s1946_s6 + $0x98] sm:$0xff] %v407_v27  ;;  %v411_v29 = vld [vmem:[%s1941_s25 + $0x150] sm:$0xff] }
  0x41   : > { %410 = vst [vmem:[%s1946_s6 + $0xa0] sm:$0xff] %v409_v28  ;;  %v413_v30 = vld [vmem:[%s1941_s25 + $0x160] sm:$0xff]  ;;  %v415_v31 = vld [vmem:[%s1941_s25 + $0x170] sm:$0xff]  ;;  %412 = vst [vmem:[%s1946_s6 + $0xa8] sm:$0xff] %v411_v29 }
  0x42   : > { %414 = vst [vmem:[%s1946_s6 + $0xb0] sm:$0xff] %v413_v30  ;;  %416 = vst [vmem:[%s1946_s6 + $0xb8] sm:$0xff] %v415_v31  ;;  %v417_v32 = vld [vmem:[%s1941_s25 + $0x180] sm:$0xff]  ;;  %v419_v33 = vld [vmem:[%s1941_s25 + $0x190] sm:$0xff] }
  0x43   : > { %v421_v34 = vld [vmem:[%s1941_s25 + $0x1a0] sm:$0xff]  ;;  %418 = vst [vmem:[%s1946_s6 + $0xc0] sm:$0xff] %v417_v32  ;;  %420 = vst [vmem:[%s1946_s6 + $0xc8] sm:$0xff] %v419_v33  ;;  %v423_v35 = vld [vmem:[%s1941_s25 + $0x1b0] sm:$0xff] }
  0x44   : > { %422 = vst [vmem:[%s1946_s6 + $0xd0] sm:$0xff] %v421_v34  ;;  %v425_v36 = vld [vmem:[%s1941_s25 + $0x1c0] sm:$0xff]  ;;  %v427_v37 = vld [vmem:[%s1941_s25 + $0x1d0] sm:$0xff]  ;;  %424 = vst [vmem:[%s1946_s6 + $0xd8] sm:$0xff] %v423_v35 }
  0x45   : > { %426 = vst [vmem:[%s1946_s6 + $0xe0] sm:$0xff] %v425_v36  ;;  %428 = vst [vmem:[%s1946_s6 + $0xe8] sm:$0xff] %v427_v37  ;;  %v429_v38 = vld [vmem:[%s1941_s25 + $0x1e0] sm:$0xff]  ;;  %v431_v39 = vld [vmem:[%s1941_s25 + $0x1f0] sm:$0xff] }
  0x46   : > { %v433_v40 = vld [vmem:[%s1941_s25 + $0x200] sm:$0xff]  ;;  %430 = vst [vmem:[%s1946_s6 + $0xf0] sm:$0xff] %v429_v38  ;;  %432 = vst [vmem:[%s1946_s6 + $0xf8] sm:$0xff] %v431_v39  ;;  %v435_v41 = vld [vmem:[%s1941_s25 + $0x210] sm:$0xff] }
  0x47   : > { %434 = vst [vmem:[%s1946_s6 + $0x100] sm:$0xff] %v433_v40  ;;  %v437_v42 = vld [vmem:[%s1941_s25 + $0x220] sm:$0xff]  ;;  %v439_v43 = vld [vmem:[%s1941_s25 + $0x230] sm:$0xff]  ;;  %436 = vst [vmem:[%s1946_s6 + $0x108] sm:$0xff] %v435_v41 }
  0x48   : > { %438 = vst [vmem:[%s1946_s6 + $0x110] sm:$0xff] %v437_v42  ;;  %440 = vst [vmem:[%s1946_s6 + $0x118] sm:$0xff] %v439_v43  ;;  %v441_v44 = vld [vmem:[%s1941_s25 + $0x240] sm:$0xff]  ;;  %v443_v45 = vld [vmem:[%s1941_s25 + $0x250] sm:$0xff] }
  0x49   : > { %v445_v46 = vld [vmem:[%s1941_s25 + $0x260] sm:$0xff]  ;;  %442 = vst [vmem:[%s1946_s6 + $0x120] sm:$0xff] %v441_v44  ;;  %444 = vst [vmem:[%s1946_s6 + $0x128] sm:$0xff] %v443_v45  ;;  %v447_v47 = vld [vmem:[%s1941_s25 + $0x270] sm:$0xff] }
  0x4a   : > { %446 = vst [vmem:[%s1946_s6 + $0x130] sm:$0xff] %v445_v46  ;;  %v449_v48 = vld [vmem:[%s1941_s25 + $0x280] sm:$0xff]  ;;  %v451_v49 = vld [vmem:[%s1941_s25 + $0x290] sm:$0xff]  ;;  %448 = vst [vmem:[%s1946_s6 + $0x138] sm:$0xff] %v447_v47 }
  0x4b   : > { %450 = vst [vmem:[%s1946_s6 + $0x140] sm:$0xff] %v449_v48  ;;  %452 = vst [vmem:[%s1946_s6 + $0x148] sm:$0xff] %v451_v49  ;;  %v453_v50 = vld [vmem:[%s1941_s25 + $0x2a0] sm:$0xff]  ;;  %v455_v51 = vld [vmem:[%s1941_s25 + $0x2b0] sm:$0xff] }
  0x4c   : > { %v457_v52 = vld [vmem:[%s1941_s25 + $0x2c0] sm:$0xff]  ;;  %454 = vst [vmem:[%s1946_s6 + $0x150] sm:$0xff] %v453_v50  ;;  %456 = vst [vmem:[%s1946_s6 + $0x158] sm:$0xff] %v455_v51  ;;  %v459_v53 = vld [vmem:[%s1941_s25 + $0x2d0] sm:$0xff] }
  0x4d   : > { %458 = vst [vmem:[%s1946_s6 + $0x160] sm:$0xff] %v457_v52  ;;  %v461_v54 = vld [vmem:[%s1941_s25 + $0x2e0] sm:$0xff]  ;;  %v463_v55 = vld [vmem:[%s1941_s25 + $0x2f0] sm:$0xff]  ;;  %460 = vst [vmem:[%s1946_s6 + $0x168] sm:$0xff] %v459_v53 }
  0x4e   : > { %462 = vst [vmem:[%s1946_s6 + $0x170] sm:$0xff] %v461_v54  ;;  %464 = vst [vmem:[%s1946_s6 + $0x178] sm:$0xff] %v463_v55  ;;  %v465_v56 = vld [vmem:[%s1941_s25 + $0x300] sm:$0xff]  ;;  %v467_v57 = vld [vmem:[%s1941_s25 + $0x310] sm:$0xff] }
  0x4f   : > { %v469_v58 = vld [vmem:[%s1941_s25 + $0x320] sm:$0xff]  ;;  %466 = vst [vmem:[%s1946_s6 + $0x180] sm:$0xff] %v465_v56  ;;  %468 = vst [vmem:[%s1946_s6 + $0x188] sm:$0xff] %v467_v57  ;;  %v471_v59 = vld [vmem:[%s1941_s25 + $0x330] sm:$0xff] }
  0x50   : > { %470 = vst [vmem:[%s1946_s6 + $0x190] sm:$0xff] %v469_v58  ;;  %v473_v60 = vld [vmem:[%s1941_s25 + $0x340] sm:$0xff]  ;;  %v475_v61 = vld [vmem:[%s1941_s25 + $0x350] sm:$0xff]  ;;  %472 = vst [vmem:[%s1946_s6 + $0x198] sm:$0xff] %v471_v59 }
  0x51   : > { %474 = vst [vmem:[%s1946_s6 + $0x1a0] sm:$0xff] %v473_v60  ;;  %476 = vst [vmem:[%s1946_s6 + $0x1a8] sm:$0xff] %v475_v61  ;;  %v477_v62 = vld [vmem:[%s1941_s25 + $0x360] sm:$0xff]  ;;  %v479_v63 = vld [vmem:[%s1941_s25 + $0x370] sm:$0xff] }
  0x52   : > { %v481_v0 = vld [vmem:[%s1941_s25 + $0x380] sm:$0xff]  ;;  %478 = vst [vmem:[%s1946_s6 + $0x1b0] sm:$0xff] %v477_v62  ;;  %480 = vst [vmem:[%s1946_s6 + $0x1b8] sm:$0xff] %v479_v63  ;;  %v483_v1 = vld [vmem:[%s1941_s25 + $0x390] sm:$0xff] }
  0x53   : > { %482 = vst [vmem:[%s1946_s6 + $0x1c0] sm:$0xff] %v481_v0  ;;  %v485_v2 = vld [vmem:[%s1941_s25 + $0x3a0] sm:$0xff]  ;;  %v487_v3 = vld [vmem:[%s1941_s25 + $0x3b0] sm:$0xff]  ;;  %484 = vst [vmem:[%s1946_s6 + $0x1c8] sm:$0xff] %v483_v1 }
  0x54   : > { %486 = vst [vmem:[%s1946_s6 + $0x1d0] sm:$0xff] %v485_v2  ;;  %488 = vst [vmem:[%s1946_s6 + $0x1d8] sm:$0xff] %v487_v3  ;;  %v489_v4 = vld [vmem:[%s1941_s25 + $0x3c0] sm:$0xff]  ;;  %v491_v5 = vld [vmem:[%s1941_s25 + $0x3d0] sm:$0xff] }
  0x55   : > { %v493_v6 = vld [vmem:[%s1941_s25 + $0x3e0] sm:$0xff]  ;;  %490 = vst [vmem:[%s1946_s6 + $0x1e0] sm:$0xff] %v489_v4  ;;  %492 = vst [vmem:[%s1946_s6 + $0x1e8] sm:$0xff] %v491_v5  ;;  %v495_v7 = vld [vmem:[%s1941_s25 + $0x3f0] sm:$0xff] }
  0x56   : > { %494 = vst [vmem:[%s1946_s6 + $0x1f0] sm:$0xff] %v493_v6  ;;  %496 = vst [vmem:[%s1946_s6 + $0x1f8] sm:$0xff] %v495_v7 }
  0x57 PF: > { %p1429_p0 = scmp.ge.s32.totalorder %s1803_s22, 1  ;;  %p501_p1 = scmp.lt.s32.totalorder %s1803_s22, 17 }
  0x59   : > { %p502_p2 = pnand %p1429_p0, %p501_p1 }
  0x5a   : > { %s508_s0 = sand.u32 (!%p502_p2), 1, %s1779_s16   ;;  %s515_s5 = sand.u32 (!%p502_p2), 1, %s1771_s14  }
  0x5b   : > { %505 = sbr.rel (%p502_p2) target bundleno = 432 (0x1b0), region = 81  ;;  %s1430_s23 = sshll.u32 (!%p502_p2), %s508_s0, 6 }
  0x5c   : > { %s1431_s28 = sshll.u32 (!%p502_p2), %s515_s5, 9  ;;  %s536_s7 = sand.u32 (!%p502_p2), 1, %s1763_s12  }
  0x5d   : > { %s1433_s25 = sshll.u32 (!%p502_p2), %s1791_s19, 1  ;;  %s1432_s11 = sshll.u32 (!%p502_p2), %s536_s7, 6 }
  0x5e   : > { %p553_p3 = scmp.lt.s32.totalorder (!%p502_p2), %s1433_s25, 3  ;;  %p558_p4 = scmp.eq.s32.totalorder (!%p502_p2), %s1787_s18, 0 }
  0x5f   : > { %s2085_s6 = scalar_lea.vmem (!%p502_p2), [#allocation3], %s1430_s23  ;;  %s2087_s1 = scalar_lea.vmem (!%p502_p2), [#allocation4], %s1431_s28 }
  0x60   : > { %s2262_s25 = smov (!%p553_p3, %s1433_s25), 3  ;;  %s2089_s16 = scalar_lea.vmem [#allocation5], %s1432_s11 }
  0x61   : > { %s1434_s26 = sshll.u32 %s2262_s25, 3  ;;  %p1435_p5 = scmp.ne.s32.totalorder %s1787_s18, 0 }
  0x62   : > { %s2083_s4 = scalar_lea.vmem %s2234_s3, %s1434_s26 }
  0x63   : > { %561 = sbr.rel (%p1435_p5) target bundleno = 109 (0x6d), region = 93 }
  0x68   : > { %v1805_v8 = vmov 0.0  }
  0x69   : > { %562 = vst [vmem:[#allocation2 + $0x30] sm:$0xff] %v1805_v8  ;;  %563 = vst [vmem:[#allocation2] sm:$0xff] %v1805_v8 }
  0x6a   : > { %564 = vst [vmem:[#allocation2 + $0x18] sm:$0xff] %v1805_v8  ;;  %565 = vst [vmem:[#allocation2 + $0x10] sm:$0xff] %v1805_v8 }
  0x6b   : > { %566 = vst [vmem:[#allocation2 + $0x8] sm:$0xff] %v1805_v8  ;;  %567 = vst [vmem:[#allocation2 + $0x20] sm:$0xff] %v1805_v8 }
  0x6c   : > { %568 = vst [vmem:[#allocation2 + $0x28] sm:$0xff] %v1805_v8  ;;  %569 = vst [vmem:[#allocation2 + $0x38] sm:$0xff] %v1805_v8 }
  0x6d PF: > { %574 = sbr.rel (!%p558_p4) target bundleno = 114 (0x72), region = 97  ;;  %v1806_v9 = vmov (%p558_p4), 0.0  }
  0x6e   : > { %575 = vst [vmem:[%s2083_s4] sm:$0xff] (%p558_p4), %v1806_v9  ;;  %576 = vst [vmem:[%s2083_s4 + $0x8] sm:$0xff] (%p558_p4), %v1806_v9 }
  0x72 PF: > { %v1609_v10 = vld [vmem:[%s2087_s1 + $0x74] ss:$8 sps:$4 sm:$0xff]   ;;  %v1613_v12 = vld [vmem:[%s2087_s1 + $0x70] ss:$8 sps:$4 sm:$0xff]   ;;  %v1615_v14 = vld [vmem:[%s2087_s1 + $0x64] ss:$8 sps:$4 sm:$0xff]  }
  0x73   : > { %v1611_v11 = vld [vmem:[%s2087_s1 + $0x174] ss:$8 sps:$4 sm:$0xff]   ;;  %1017 = vmatprep.subr.bf16.mxu0 %v1609_v10  ;;  %v1614_v13 = vld [vmem:[%s2087_s1 + $0x170] ss:$8 sps:$4 sm:$0xff]   ;;  %v1617_v15 = vld [vmem:[%s2087_s1 + $0x164] ss:$8 sps:$4 sm:$0xff]  }
  0x74   : > { %1070 = vmatprep.subr.bf16.mxu1 %v1611_v11  ;;  %1018 = vmatpush1.bf16.msra.mxu0 %v1613_v12  ;;  %v1619_v16 = vld [vmem:[%s2087_s1 + $0x60] ss:$8 sps:$4 sm:$0xff]   ;;  %v1621_v18 = vld [vmem:[%s2087_s1 + $0x54] ss:$8 sps:$4 sm:$0xff]   ;;  %v1625_v20 = vld [vmem:[%s2087_s1 + $0x50] ss:$8 sps:$4 sm:$0xff]  }
  0x75   : > { %1071 = vmatpush1.bf16.msra.mxu1 %v1614_v13  ;;  %1019 = vmatprep.subr.bf16.mxu0 %v1615_v14  ;;  %v1620_v17 = vld [vmem:[%s2087_s1 + $0x160] ss:$8 sps:$4 sm:$0xff]   ;;  %v1623_v19 = vld [vmem:[%s2087_s1 + $0x154] ss:$8 sps:$4 sm:$0xff]   ;;  %v1626_v21 = vld [vmem:[%s2087_s1 + $0x150] ss:$8 sps:$4 sm:$0xff]  }
  0x76   : > { %1072 = vmatprep.subr.bf16.mxu1 %v1617_v15  ;;  %v1627_v22 = vld [vmem:[%s2087_s1 + $0x44] ss:$8 sps:$4 sm:$0xff]   ;;  %v1631_v24 = vld [vmem:[%s2087_s1 + $0x40] ss:$8 sps:$4 sm:$0xff]   ;;  %v1633_v26 = vld [vmem:[%s2087_s1 + $0x34] ss:$8 sps:$4 sm:$0xff]  }
  0x77   : > { %v1629_v23 = vld [vmem:[%s2087_s1 + $0x144] ss:$8 sps:$4 sm:$0xff]   ;;  %v1632_v25 = vld [vmem:[%s2087_s1 + $0x140] ss:$8 sps:$4 sm:$0xff]   ;;  %v1635_v27 = vld [vmem:[%s2087_s1 + $0x134] ss:$8 sps:$4 sm:$0xff]  }
  0x78   : > { %1020 = vmatpush1.bf16.msra.mxu0 %v1619_v16  ;;  %v1637_v28 = vld [vmem:[%s2087_s1 + $0x30] ss:$8 sps:$4 sm:$0xff]   ;;  %v1639_v30 = vld [vmem:[%s2087_s1 + $0x24] ss:$8 sps:$4 sm:$0xff]   ;;  %v1643_v32 = vld [vmem:[%s2087_s1 + $0x20] ss:$8 sps:$4 sm:$0xff]  }
  0x79   : > { %1073 = vmatpush1.bf16.msra.mxu1 %v1620_v17  ;;  %1021 = vmatprep.subr.bf16.mxu0 %v1621_v18  ;;  %v1638_v29 = vld [vmem:[%s2087_s1 + $0x130] ss:$8 sps:$4 sm:$0xff]   ;;  %v1641_v31 = vld [vmem:[%s2087_s1 + $0x124] ss:$8 sps:$4 sm:$0xff]   ;;  %v1644_v33 = vld [vmem:[%s2087_s1 + $0x120] ss:$8 sps:$4 sm:$0xff]  }
  0x7a   : > { %1074 = vmatprep.subr.bf16.mxu1 %v1623_v19  ;;  %v1645_v34 = vld [vmem:[%s2087_s1 + $0x14] ss:$8 sps:$4 sm:$0xff]   ;;  %v1649_v36 = vld [vmem:[%s2087_s1 + $0x10] ss:$8 sps:$4 sm:$0xff]   ;;  %v1651_v38 = vld [vmem:[%s2087_s1 + $0x4] ss:$8 sps:$4 sm:$0xff]  }
  0x7b   : > { %v1647_v35 = vld [vmem:[%s2087_s1 + $0x114] ss:$8 sps:$4 sm:$0xff]   ;;  %v1650_v37 = vld [vmem:[%s2087_s1 + $0x110] ss:$8 sps:$4 sm:$0xff]   ;;  %v1653_v39 = vld [vmem:[%s2087_s1 + $0x104] ss:$8 sps:$4 sm:$0xff]  }
  0x7c   : > { %1022 = vmatpush1.bf16.msra.mxu0 %v1625_v20  ;;  %v1655_v40 = vld [vmem:[%s2087_s1] ss:$8 sps:$4 sm:$0xff]   ;;  %v1657_v42 = vld [vmem:[%s2087_s1 + $0xf4] ss:$8 sps:$4 sm:$0xff]   ;;  %v1661_v44 = vld [vmem:[%s2087_s1 + $0xf0] ss:$8 sps:$4 sm:$0xff]  }
  0x7d   : > { %1075 = vmatpush1.bf16.msra.mxu1 %v1626_v21  ;;  %1023 = vmatprep.subr.bf16.mxu0 %v1627_v22  ;;  %v1656_v41 = vld [vmem:[%s2087_s1 + $0x100] ss:$8 sps:$4 sm:$0xff]   ;;  %v1659_v43 = vld [vmem:[%s2087_s1 + $0x1f4] ss:$8 sps:$4 sm:$0xff]   ;;  %v1662_v45 = vld [vmem:[%s2087_s1 + $0x1f0] ss:$8 sps:$4 sm:$0xff]  }
  0x7e   : > { %1076 = vmatprep.subr.bf16.mxu1 %v1629_v23  ;;  %v1663_v46 = vld [vmem:[%s2087_s1 + $0xe4] ss:$8 sps:$4 sm:$0xff]   ;;  %v1667_v48 = vld [vmem:[%s2087_s1 + $0xe0] ss:$8 sps:$4 sm:$0xff]   ;;  %v1669_v50 = vld [vmem:[%s2087_s1 + $0xd4] ss:$8 sps:$4 sm:$0xff]  }
  0x7f   : > { %v1665_v47 = vld [vmem:[%s2087_s1 + $0x1e4] ss:$8 sps:$4 sm:$0xff]   ;;  %v1668_v49 = vld [vmem:[%s2087_s1 + $0x1e0] ss:$8 sps:$4 sm:$0xff]   ;;  %v1671_v51 = vld [vmem:[%s2087_s1 + $0x1d4] ss:$8 sps:$4 sm:$0xff]  }
  0x80   : > { %1024 = vmatpush1.bf16.msra.mxu0 %v1631_v24  ;;  %v1673_v52 = vld [vmem:[%s2087_s1 + $0xd0] ss:$8 sps:$4 sm:$0xff]   ;;  %v1675_v54 = vld [vmem:[%s2087_s1 + $0xc4] ss:$8 sps:$4 sm:$0xff]   ;;  %v1679_v56 = vld [vmem:[%s2087_s1 + $0xc0] ss:$8 sps:$4 sm:$0xff]  }
  0x81   : > { %1077 = vmatpush1.bf16.msra.mxu1 %v1632_v25  ;;  %1025 = vmatprep.subr.bf16.mxu0 %v1633_v26  ;;  %v1674_v53 = vld [vmem:[%s2087_s1 + $0x1d0] ss:$8 sps:$4 sm:$0xff]   ;;  %v1677_v55 = vld [vmem:[%s2087_s1 + $0x1c4] ss:$8 sps:$4 sm:$0xff]   ;;  %v1680_v57 = vld [vmem:[%s2087_s1 + $0x1c0] ss:$8 sps:$4 sm:$0xff]  }
  0x82   : > { %1078 = vmatprep.subr.bf16.mxu1 %v1635_v27  ;;  %v1681_v58 = vld [vmem:[%s2087_s1 + $0xb4] ss:$8 sps:$4 sm:$0xff]   ;;  %v1685_v62 = vld [vmem:[%s2087_s1 + $0xb0] ss:$8 sps:$4 sm:$0xff]   ;;  %v1687_v0 = vld [vmem:[%s2087_s1 + $0xa4] ss:$8 sps:$4 sm:$0xff]  }
  0x83   : > { %v1707_v59 = vld [vmem:[%s2085_s6 + $0x4] ss:$16 sps:$4 sm:$0xff]   ;;  %v1710_v61 = vld [vmem:[%s2085_s6 + $0xc] ss:$16 sps:$4 sm:$0xff]   ;;  %v1686_v63 = vld [vmem:[%s2087_s1 + $0x1b0] ss:$8 sps:$4 sm:$0xff]  }
  0x84   : > { %1026 = vmatpush1.bf16.msra.mxu0 %v1637_v28  ;;  %v1683_v60 = vld [vmem:[%s2087_s1 + $0x1b4] ss:$8 sps:$4 sm:$0xff]   ;;  %1049 = vmatprep.mubr.bf16.mxu0 %v1707_v59  ;;  %v1689_v1 = vld [vmem:[%s2087_s1 + $0x1a4] ss:$8 sps:$4 sm:$0xff]   ;;  %v1691_v2 = vld [vmem:[%s2087_s1 + $0xa0] ss:$8 sps:$4 sm:$0xff]  }
  0x85   : > { %1079 = vmatpush1.bf16.msra.mxu1 %v1638_v29  ;;  %1027 = vmatprep.subr.bf16.mxu0 %v1639_v30  ;;  %v1692_v3 = vld [vmem:[%s2087_s1 + $0x1a0] ss:$8 sps:$4 sm:$0xff]   ;;  %v1693_v4 = vld [vmem:[%s2087_s1 + $0x94] ss:$8 sps:$4 sm:$0xff]   ;;  %v1697_v6 = vld [vmem:[%s2087_s1 + $0x90] ss:$8 sps:$4 sm:$0xff]  }
  0x86   : > { %1080 = vmatprep.subr.bf16.mxu1 %v1641_v31  ;;  %1102 = vmatprep.mubr.bf16.mxu1 %v1710_v61  ;;  %v1695_v5 = vld [vmem:[%s2087_s1 + $0x194] ss:$8 sps:$4 sm:$0xff]   ;;  %v1698_v7 = vld [vmem:[%s2087_s1 + $0x190] ss:$8 sps:$4 sm:$0xff]   ;;  %v1699_v8 = vld [vmem:[%s2087_s1 + $0x84] ss:$8 sps:$4 sm:$0xff]  }
  0x87   : > { %v1701_v9 = vld [vmem:[%s2087_s1 + $0x184] ss:$8 sps:$4 sm:$0xff]   ;;  %v1703_v10 = vld [vmem:[%s2087_s1 + $0x80] ss:$8 sps:$4 sm:$0xff]   ;;  %v577_v19 = vld [vmem:[#allocation2 + $0x30] sm:$0xff]  ;;  %p1509_p6 = scmp.ne.s32.totalorder %s1787_s18, 7 }
  0x88   : > { %1028 = vmatpush1.bf16.msra.mxu0 %v1643_v32  ;;  %v1704_v11 = vld [vmem:[%s2087_s1 + $0x180] ss:$8 sps:$4 sm:$0xff]   ;;  %v1711_v14 = vld [vmem:[%s2085_s6 + $0x24] ss:$16 sps:$4 sm:$0xff]   ;;  %v1713_v15 = vld [vmem:[%s2085_s6 + $0x2c] ss:$16 sps:$4 sm:$0xff]  }
  0x89   : > { %1081 = vmatpush1.bf16.msra.mxu1 %v1644_v33  ;;  %1029 = vmatprep.subr.bf16.mxu0 %v1645_v34  ;;  %v1705_v12 = vld [vmem:[%s2085_s6] ss:$16 sps:$4 sm:$0xff]   ;;  %v1708_v13 = vld [vmem:[%s2085_s6 + $0x8] ss:$16 sps:$4 sm:$0xff]  }
  0x8a   : > { %1082 = vmatprep.subr.bf16.mxu1 %v1647_v35  ;;  %v1715_v16 = vld [vmem:[%s2085_s6 + $0x20] ss:$16 sps:$4 sm:$0xff]   ;;  %v1716_v17 = vld [vmem:[%s2085_s6 + $0x28] ss:$16 sps:$4 sm:$0xff]  }
  0x8b   : > { %v578_v23 = vld [vmem:[#allocation2] sm:$0xff]  ;;  %v579_v28 = vld [vmem:[#allocation2 + $0x18] sm:$0xff]  ;;  %v580_v33 = vld [vmem:[#allocation2 + $0x10] sm:$0xff] }
  0x8c   : > { %1030 = vmatpush1.bf16.msra.mxu0 %v1649_v36 }
  0x8d   : > { %1083 = vmatpush1.bf16.msra.mxu1 %v1650_v37  ;;  %1031 = vmatprep.subr.bf16.mxu0 %v1651_v38  ;;  %v581_v38 = vld [vmem:[#allocation2 + $0x8] sm:$0xff] }
  0x8e   : > { %1084 = vmatprep.subr.bf16.mxu1 %v1653_v39 }
  0x90   : > { %1032 = vmatpush1.bf16.msra.mxu0 %v1655_v40 }
  0x91   : > { %1085 = vmatpush1.bf16.msra.mxu1 %v1656_v41  ;;  %1033 = vmatprep.subr.bf16.mxu0 %v1657_v42 }
  0x92   : > { %1086 = vmatprep.subr.bf16.mxu1 %v1659_v43  ;;  %v582_v43 = vld [vmem:[#allocation2 + $0x20] sm:$0xff] }
  0x94   : > { %1034 = vmatpush2.bf16.msra.mxu0 %v1661_v44 }
  0x95   : > { %1087 = vmatpush2.bf16.msra.mxu1 %v1662_v45  ;;  %1035 = vmatprep.subr.bf16.mxu0 %v1663_v46 }
  0x96   : > { %1088 = vmatprep.subr.bf16.mxu1 %v1665_v47 }
  0x98   : > { %1036 = vmatpush2.bf16.msra.mxu0 %v1667_v48  ;;  %v583_v48 = vld [vmem:[#allocation2 + $0x28] sm:$0xff] }
  0x99   : > { %1089 = vmatpush2.bf16.msra.mxu1 %v1668_v49  ;;  %1037 = vmatprep.subr.bf16.mxu0 %v1669_v50 }
  0x9a   : > { %1090 = vmatprep.subr.bf16.mxu1 %v1671_v51 }
  0x9c   : > { %1038 = vmatpush2.bf16.msra.mxu0 %v1673_v52 }
  0x9d   : > { %1091 = vmatpush2.bf16.msra.mxu1 %v1674_v53  ;;  %1039 = vmatprep.subr.bf16.mxu0 %v1675_v54  ;;  %v584_v53 = vld [vmem:[#allocation2 + $0x38] sm:$0xff] }
  0x9e   : > { %1092 = vmatprep.subr.bf16.mxu1 %v1677_v55 }
  0xa0   : > { %1040 = vmatpush2.bf16.msra.mxu0 %v1679_v56 }
  0xa1   : > { %1093 = vmatpush2.bf16.msra.mxu1 %v1680_v57  ;;  %1041 = vmatprep.subr.bf16.mxu0 %v1681_v58 }
  0xa2   : > { %1094 = vmatprep.subr.bf16.mxu1 %v1683_v60 }
  0xa4   : > { %1042 = vmatpush2.bf16.msra.mxu0 %v1685_v62 }
  0xa5   : > { %1095 = vmatpush2.bf16.msra.mxu1 %v1686_v63  ;;  %1043 = vmatprep.subr.bf16.mxu0 %v1687_v0 }
  0xa6   : > { %1096 = vmatprep.subr.bf16.mxu1 %v1689_v1 }
  0xa8   : > { %1044 = vmatpush2.bf16.msra.mxu0 %v1691_v2 }
  0xa9   : > { %1097 = vmatpush2.bf16.msra.mxu1 %v1692_v3  ;;  %1045 = vmatprep.subr.bf16.mxu0 %v1693_v4 }
  0xaa   : > { %1098 = vmatprep.subr.bf16.mxu1 %v1695_v5 }
  0xac   : > { %1046 = vmatpush2.bf16.msra.mxu0 %v1697_v6 }
  0xad   : > { %1099 = vmatpush2.bf16.msra.mxu1 %v1698_v7  ;;  %1047 = vmatprep.subr.bf16.mxu0 %v1699_v8 }
  0xae   : > { %1100 = vmatprep.subr.bf16.mxu1 %v1701_v9 }
  0xb0   : > { %1048 = vmatpush2.bf16.msra.mxu0 %v1703_v10 }
  0xb1   : > { %1101 = vmatpush2.bf16.msra.mxu1 %v1704_v11 }
  0xb3   : > { %1050 = vmatmul.mubr.bf16.vlgmr.msra.gmra.mxu0 %v1705_v12 }
  0xb4   : > { %1103 = vmatmul.mubr.bf16.vlgmr.msra.gmra.mxu1 %v1708_v13  ;;  %1059 = vmatprep.mubr.bf16.mxu0 %v1711_v14 }
  0xb5   : > { %1112 = vmatprep.mubr.bf16.mxu1 %v1713_v15 }
  0xbb   : > { %1060 = vmatmul.mubr.bf16.gmra.mxu0 %v1715_v16 }
  0xbc   : > { %1113 = vmatmul.mubr.bf16.gmra.mxu1 %v1716_v17 }
 0x173   : > { %v1051_v18 = vpop.f32.mrf.mxu0 }
 0x174   : > { %v1104_v20 = vpop.f32.mrf.mxu1 }
 0x175   : > { %v1105_v21 = vadd.f32 %v1104_v20, %v1051_v18  ;;  %v1053_v22 = vpop.f32.mrf.mxu0 }
 0x176   : > { %v1106_v24 = vpop.f32.mrf.mxu1 }
 0x177   : > { %v1123_v25 = vadd.f32 %v1105_v21, %v577_v19  ;;  %v1107_v26 = vadd.f32 %v1106_v24, %v1053_v22  ;;  %v1055_v27 = vpop.f32.mrf.mxu0 }
 0x178   : > { %v1108_v29 = vpop.f32.mrf.mxu1 }
 0x179   : > { %1131 = vst [vmem:[#allocation2 + $0x30] sm:$0xff] %v1123_v25  ;;  %v1124_v30 = vadd.f32 %v1107_v26, %v578_v23  ;;  %v1109_v31 = vadd.f32 %v1108_v29, %v1055_v27  ;;  %v1057_v32 = vpop.f32.mrf.mxu0 }
 0x17a   : > { %v1110_v34 = vpop.f32.mrf.mxu1 }
 0x17b   : > { %1132 = vst [vmem:[#allocation2] sm:$0xff] %v1124_v30  ;;  %v1125_v35 = vadd.f32 %v1109_v31, %v579_v28  ;;  %v1111_v36 = vadd.f32 %v1110_v34, %v1057_v32  ;;  %v1061_v37 = vpop.f32.mrf.mxu0 }
 0x17c   : > { %v1114_v39 = vpop.f32.mrf.mxu1 }
 0x17d   : > { %1133 = vst [vmem:[#allocation2 + $0x18] sm:$0xff] %v1125_v35  ;;  %v1126_v40 = vadd.f32 %v1111_v36, %v580_v33  ;;  %v1115_v41 = vadd.f32 %v1114_v39, %v1061_v37  ;;  %v1063_v42 = vpop.f32.mrf.mxu0 }
 0x17e   : > { %v1116_v44 = vpop.f32.mrf.mxu1 }
 0x17f   : > { %1134 = vst [vmem:[#allocation2 + $0x10] sm:$0xff] %v1126_v40  ;;  %v1127_v45 = vadd.f32 %v1115_v41, %v581_v38  ;;  %v1117_v46 = vadd.f32 %v1116_v44, %v1063_v42  ;;  %v1065_v47 = vpop.f32.mrf.mxu0 }
 0x180   : > { %v1118_v49 = vpop.f32.mrf.mxu1 }
 0x181   : > { %1135 = vst [vmem:[#allocation2 + $0x8] sm:$0xff] %v1127_v45  ;;  %v1128_v50 = vadd.f32 %v1117_v46, %v582_v43  ;;  %v1119_v51 = vadd.f32 %v1118_v49, %v1065_v47  ;;  %v1067_v52 = vpop.f32.mrf.mxu0 }
 0x182   : > { %v1120_v54 = vpop.f32.mrf.mxu1 }
 0x183   : > { %1136 = vst [vmem:[#allocation2 + $0x20] sm:$0xff] %v1128_v50  ;;  %v1129_v55 = vadd.f32 %v1119_v51, %v583_v48  ;;  %v1121_v56 = vadd.f32 %v1120_v54, %v1067_v52  ;;  %1142 = sbr.rel (%p1509_p6) target bundleno = 426 (0x1aa), region = 101 }
 0x185   : > { %1137 = vst [vmem:[#allocation2 + $0x28] sm:$0xff] %v1129_v55  ;;  %v1130_v57 = vadd.f32 %v1121_v56, %v584_v53 }
 0x187   : > { %1138 = vst [vmem:[#allocation2 + $0x38] sm:$0xff] %v1130_v57 }
 0x188   : > { %v1143_v58 = vld [vmem:[#allocation2 + $0x30] sm:$0xff]  ;;  %v1145_v59 = vld [vmem:[#allocation2 + $0x18] sm:$0xff]  ;;  %v1147_v60 = vld [vmem:[#allocation2 + $0x8] sm:$0xff]  ;;  %v1227_v38 = vlaneseq }
 0x189   : > { %vm1151_vm0 = vcmp.ge.f32.partialorder %v1143_v58, 0.0  ;;  %vm1153_vm1 = vcmp.ge.f32.partialorder %v1145_v59, 0.0  ;;  %vm1155_vm2 = vcmp.ge.f32.partialorder %v1147_v60, 0.0  ;;  %v1159_v62 = vmul.f32 0.2, %v1143_v58  ;;  %v1144_v3 = vld [vmem:[#allocation2] sm:$0xff] }
 0x18a   : > { %v1161_v63 = vmul.f32 0.2, %v1145_v59  ;;  %v1163_v0 = vmul.f32 0.2, %v1147_v60  ;;  %v1146_v7 = vld [vmem:[#allocation2 + $0x10] sm:$0xff]  ;;  %v1148_v12 = vld [vmem:[#allocation2 + $0x20] sm:$0xff] }
 0x18b   : > { %v1167_v2 = vsel %vm1151_vm0, %v1143_v58, %v1159_v62  ;;  %vm1152_vm4 = vcmp.ge.f32.partialorder %v1144_v3, 0.0  ;;  %v1160_v15 = vmul.f32 0.2, %v1144_v3  ;;  %vm1154_vm5 = vcmp.ge.f32.partialorder %v1146_v7, 0.0 }
 0x18c   : > { %v1149_v61 = vld [vmem:[#allocation2 + $0x28] sm:$0xff]  ;;  %v1169_v4 = vsel %vm1153_vm1, %v1145_v59, %v1161_v63  ;;  %v1171_v5 = vsel %vm1155_vm2, %v1147_v60, %v1163_v0  ;;  %v1201_v6 = vmul.f32 %v1167_v2, %v1167_v2  ;;  %1175 = vst [vmem:[%s2089_s16] sm:$0xff] %v1167_v2  ;;  %v1162_v18 = vmul.f32 0.2, %v1146_v7  ;;  %v1235_v59 = vld [vmem:[%s2083_s4] sm:$0xff] }
 0x18d   : > { %vm1157_vm3 = vcmp.ge.f32.partialorder %v1149_v61, 0.0  ;;  %v1165_v1 = vmul.f32 0.2, %v1149_v61  ;;  %v1183_v9 = vadd.f32 %v1169_v4, %v1167_v2  ;;  %v1203_v10 = vmul.f32 %v1169_v4, %v1169_v4  ;;  %1177 = vst [vmem:[%s2089_s16 + $0x10] sm:$0xff] %v1169_v4  ;;  %1179 = vst [vmem:[%s2089_s16 + $0x20] sm:$0xff] %v1171_v5  ;;  %v1236_v0 = vld [vmem:[%s2083_s4 + $0x8] sm:$0xff] }
 0x18e   : > { %v1205_v11 = vmul.f32 %v1171_v5, %v1171_v5  ;;  %v1150_v13 = vld [vmem:[#allocation2 + $0x38] sm:$0xff]  ;;  %v1168_v19 = vsel %vm1152_vm4, %v1144_v3, %v1160_v15  ;;  %vm1156_vm6 = vcmp.ge.f32.partialorder %v1148_v12, 0.0  ;;  %v1164_v20 = vmul.f32 0.2, %v1148_v12 }
 0x18f   : > { %v1173_v8 = vsel %vm1157_vm3, %v1149_v61, %v1165_v1  ;;  %v1184_v16 = vadd.f32 %v1183_v9, %v1171_v5  ;;  %v1209_v17 = vadd.f32 %v1203_v10, %v1201_v6  ;;  %vm1158_vm7 = vcmp.ge.f32.partialorder %v1150_v13, 0.0  ;;  %1176 = vst [vmem:[%s2089_s16 + $0x8] sm:$0xff] %v1168_v19 }
 0x190   : > { %v1207_v14 = vmul.f32 %v1173_v8, %v1173_v8  ;;  %1181 = vst [vmem:[%s2089_s16 + $0x30] sm:$0xff] %v1173_v8  ;;  %v1202_v23 = vmul.f32 %v1168_v19, %v1168_v19  ;;  %v1170_v24 = vsel %vm1154_vm5, %v1146_v7, %v1162_v18  ;;  %v1172_v27 = vsel %vm1156_vm6, %v1148_v12, %v1164_v20 }
 0x191   : > { %v1185_v21 = vadd.f32 %v1184_v16, %v1173_v8  ;;  %v1210_v22 = vadd.f32 %v1209_v17, %v1205_v11  ;;  %1178 = vst [vmem:[%s2089_s16 + $0x18] sm:$0xff] %v1170_v24  ;;  %v1192_v25 = vadd.f32 %v1170_v24, %v1168_v19  ;;  %v1204_v26 = vmul.f32 %v1170_v24, %v1170_v24 }
 0x192   : > { %v1166_v28 = vmul.f32 0.2, %v1150_v13  ;;  %1180 = vst [vmem:[%s2089_s16 + $0x28] sm:$0xff] %v1172_v27  ;;  %v1206_v31 = vmul.f32 %v1172_v27, %v1172_v27  ;;  %v1228_v47 = vshrl.u32 %v1227_v38, 7 }
 0x193   : > { %v1186_v29 = vrot.slane %v1185_v21, 4  ;;  %v1211_v30 = vadd.f32 %v1210_v22, %v1207_v14  ;;  %v1218_v32 = vadd.f32 %v1204_v26, %v1202_v23  ;;  %v1193_v33 = vadd.f32 %v1192_v25, %v1172_v27 }
 0x194   : > { %v1174_v34 = vsel %vm1158_vm7, %v1150_v13, %v1166_v28  ;;  %vm1230_vm8 = vcmp.eq.s32.totalorder %v1228_v47, 1  ;;  %vm1229_vm9 = vcmp.eq.s32.totalorder %v1228_v47, 0 }
 0x195   : > { %v1187_v35 = vadd.f32 %v1186_v29, %v1185_v21  ;;  %v1212_v36 = vrot.slane %v1211_v30, 4  ;;  %1182 = vst [vmem:[%s2089_s16 + $0x38] sm:$0xff] %v1174_v34  ;;  %v1208_v37 = vmul.f32 %v1174_v34, %v1174_v34  ;;  %v1219_v39 = vadd.f32 %v1218_v32, %v1206_v31 }
 0x196   : > { %v1194_v40 = vadd.f32 %v1193_v33, %v1174_v34 }
 0x197   : > { %v1188_v41 = vrot.slane %v1187_v35, 2  ;;  %v1213_v42 = vadd.f32 %v1212_v36, %v1211_v30  ;;  %v1220_v44 = vadd.f32 %v1219_v39, %v1208_v37 }
 0x198   : > { %v1195_v43 = vrot.slane %v1194_v40, 4 }
 0x199   : > { %v1189_v45 = vadd.f32 %v1188_v41, %v1187_v35  ;;  %v1214_v46 = vrot.slane %v1213_v42, 2  ;;  %v1221_v49 = vrot.slane %v1220_v44, 4 }
 0x19a   : > { %v1196_v48 = vadd.f32 %v1195_v43, %v1194_v40 }
 0x19b   : > { %v1190_v50 = vrot.slane %v1189_v45, 1  ;;  %v1215_v51 = vadd.f32 %v1214_v46, %v1213_v42  ;;  %v1222_v53 = vadd.f32 %v1221_v49, %v1220_v44 }
 0x19c   : > { %v1197_v52 = vrot.slane %v1196_v48, 2 }
 0x19d   : > { %v1216_v54 = vrot.slane %v1215_v51, 1  ;;  %v1191_v55 = vadd.f32 %v1190_v50, %v1189_v45  ;;  %v1223_v57 = vrot.slane %v1222_v53, 2 }
 0x19e   : > { %v1198_v56 = vadd.f32 %v1197_v52, %v1196_v48 }
 0x19f   : > { %v1217_v58 = vadd.f32 %v1216_v54, %v1215_v51  ;;  %v1224_v61 = vadd.f32 %v1223_v57, %v1222_v53 }
 0x1a0   : > { %v1199_v60 = vrot.slane %v1198_v56, 1 }
 0x1a1   : > { %v1231_v62 = vsel %vm1230_vm8, %v1217_v58, 0.0  ;;  %v1225_v1 = vrot.slane %v1224_v61, 1 }
 0x1a2   : > { %v1233_v63 = vsel %vm1229_vm9, %v1191_v55, %v1231_v62  ;;  %v1200_v3 = vadd.f32 %v1199_v60, %v1198_v56 }
 0x1a3   : > { %v1237_v2 = vadd.f32 %v1235_v59, %v1233_v63  ;;  %v1226_v4 = vadd.f32 %v1225_v1, %v1224_v61 }
 0x1a5   : > { %1239 = vst [vmem:[%s2083_s4] sm:$0xff] %v1237_v2  ;;  %v1232_v5 = vsel %vm1230_vm8, %v1226_v4, 0.0 }
 0x1a6   : > { %v1234_v6 = vsel %vm1229_vm9, %v1200_v3, %v1232_v5 }
 0x1a7   : > { %v1238_v7 = vadd.f32 %v1236_v0, %v1234_v6 }
 0x1a9   : > { %1240 = vst [vmem:[%s2083_s4 + $0x8] sm:$0xff] %v1238_v7 }
 0x1aa PF: > { %1252 = sbr.rel (!%p1921_p12) target bundleno = 432 (0x1b0), region = 105  ;;  %s1518_s1 = sshll.u32 (%p1921_p12), %s1791_s19, 4  ;;  %v1271_v8 = vld [vmem:[%s2089_s16] sm:$0xff] (%p1921_p12)  ;;  %v1273_v9 = vld [vmem:[%s2089_s16 + $0x8] sm:$0xff] (%p1921_p12)  ;;  %v1275_v10 = vld [vmem:[%s2089_s16 + $0x10] sm:$0xff] (%p1921_p12) }
 0x1ab   : > { %s1258_s18 = scalar_lea.vmem (%p1921_p12), %s2233_s2, %s1518_s1  ;;  %v1277_v11 = vld [vmem:[%s2089_s16 + $0x18] sm:$0xff] (%p1921_p12)  ;;  %v1279_v12 = vld [vmem:[%s2089_s16 + $0x20] sm:$0xff] (%p1921_p12)  ;;  %v1281_v13 = vld [vmem:[%s2089_s16 + $0x28] sm:$0xff] (%p1921_p12) }
 0x1ac   : > { %1272 = vst [vmem:[%s1258_s18] sm:$0xff] (%p1921_p12), %v1271_v8  ;;  %1274 = vst [vmem:[%s1258_s18 + $0x8] sm:$0xff] (%p1921_p12), %v1273_v9  ;;  %v1283_v14 = vld [vmem:[%s2089_s16 + $0x30] sm:$0xff] (%p1921_p12)  ;;  %v1285_v15 = vld [vmem:[%s2089_s16 + $0x38] sm:$0xff] (%p1921_p12) }
 0x1ad   : > { %1276 = vst [vmem:[%s1258_s18 + $0x20] sm:$0xff] (%p1921_p12), %v1275_v10  ;;  %1278 = vst [vmem:[%s1258_s18 + $0x28] sm:$0xff] (%p1921_p12), %v1277_v11 }
 0x1ae   : > { %1280 = vst [vmem:[%s1258_s18 + $0x40] sm:$0xff] (%p1921_p12), %v1279_v12  ;;  %1282 = vst [vmem:[%s1258_s18 + $0x48] sm:$0xff] (%p1921_p12), %v1281_v13 }
 0x1af   : > { %1284 = vst [vmem:[%s1258_s18 + $0x60] sm:$0xff] %v1283_v14  ;;  %1286 = vst [vmem:[%s1258_s18 + $0x68] sm:$0xff] %v1285_v15 }
 0x1b0 PF: > { %s14_s22 = sadd.s32 1, %s1803_s22   ;;  %s2244_s10 = sld [smem:[#allocation6_spill]] }
 0x1b1   : > { %p11_p7 = scmp.ge.s32.totalorder %s14_s22, 18   ;;  %s2245_s12 = smov %s1767_s13 }
 0x1b2   : > { %s2246_s13 = smov %s1919_s9  ;;  %s2247_s14 = smov %s1775_s15 }
 0x1b3   : > { %s2248_s15 = smov %s1916_s8  ;;  %s2249_s16 = smov %s1783_s17 }
 0x1b4   : > { %s2250_s17 = smov %s1902_s30  ;;  %s2251_s18 = smov %s1795_s20 }
 0x1b5   : > { %s2252_s19 = smov %s1799_s21  ;;  %s2253_s20 = smov %s2256_s24 }
 0x1b6   : > { %s2254_s21 = smov %s2244_s10  ;;  %13 = sbr.rel (!%p11_p7) target bundleno = 9 (0x9), region = 179 }

// kernel: encoder_forward.11
= control target key start
LH: loop header
LB: loop body
LE: loop exit
PB: predicated region body
PF: predicated region fallthrough
CT: control target
= control target key end

     0   :  { %s1092_s24 = smov 0   ;;  %s1234_s0 = inlined_call_operand.vmem [shape: bf16[8,8192], index: 0, kind: input, shape index: {}]   ;;  %s1235_s1 = inlined_call_operand.vmem [shape: bf16[8192,128], index: 1, kind: input, shape index: {}]   ;;  %s1236_s2 = inlined_call_operand.vmem [shape: f32[1,128], index: 2, kind: input, shape index: {}]   ;;  %s1237_s3 = inlined_call_operand.vmem [shape: f32[1,128], index: 3, kind: input, shape index: {}]   ;;  %s1238_s4 = inlined_call_operand.vmem [shape: f32[1,128], index: 4, kind: input, shape index: {}]   ;;  %s1239_s5 = inlined_call_operand.vmem [shape: f32[128,128], index: 5, kind: input, shape index: {}]   ;;  %s1240_s6 = inlined_call_operand.vmem [shape: f32[1,128], index: 6, kind: input, shape index: {}]   ;;  %s1241_s7 = inlined_call_operand.vmem [shape: f32[8,128], index: 7, kind: output, shape index: {}]  }
   0x1 LB: > { %s1098_s25 = sadd.s32 4294967295, %s1047_s24   ;;  %p846_p0 = scmp.ge.s32.totalorder %s1047_s24, 1  ;;  %s1047_s24 = sphi %s1092_s24, %s17_s24  }
   0x2   : > { %p244_p1 = scmp.lt.s32.totalorder %s1047_s24, 17 }
   0x4   : > { %p245_p2 = pnand %p846_p0, %p244_p1 }
   0x5   : > { %s847_s26 = sshll.u32 (!%p245_p2), %s1098_s25, 2  ;;  %s849_s27 = sshll.u32 (!%p245_p2), %s1098_s25, 6 }
   0x6   : > { %248 = sbr.rel (%p245_p2) target bundleno = 510 (0x1fe), region = 48  ;;  %p277_p3 = scmp.lt.s32.totalorder (!%p245_p2), %s847_s26, 63 }
   0x7   : > { %p283_p4 = scmp.lt.s32.totalorder (!%p245_p2), %s849_s27, 1023  ;;  %p851_p5 = scmp.ne.s32.totalorder (!%p245_p2), %s1098_s25, 0 }
   0xb   : > { %s1243_s26 = smov (!%p277_p3, %s847_s26), 63  ;;  %s1245_s27 = smov (!%p283_p4, %s849_s27), 1023 }
   0xc   : > { %s848_s28 = sshll.u32 %s1243_s26, 2  ;;  %s850_s9 = sshll.u32 %s1245_s27, 2 }
   0xd   : > { %s1107_s8 = scalar_lea.vmem %s1234_s0, %s848_s28  ;;  %s1112_s12 = scalar_lea.vmem %s1235_s1, %s850_s9 }
   0xe   : > { %292 = sbr.rel (%p851_p5) target bundleno = 21 (0x15), region = 52 }
  0x13   : > { %v1049_v0 = vmov 0.0  }
  0x14   : > { %293 = vst [vmem:[#allocation2] sm:$0xff] %v1049_v0 }
  0x15 PF: > { %v1003_v1 = vld [vmem:[%s1112_s12 + $0x78] sm:$0xff]   ;;  %v1007_v5 = vld [vmem:[%s1112_s12 + $0x70] sm:$0xff]   ;;  %v1011_v9 = vld [vmem:[%s1112_s12 + $0x68] sm:$0xff]   ;;  %p888_p6 = scmp.ne.s32.totalorder %s1098_s25, 15 }
  0x16   : > { %v1004_v2 = vld [vmem:[%s1112_s12 + $0xf8] sm:$0xff]   ;;  %896 = vmatprep.subr.bf16.mxu0 %v1003_v1  ;;  %v1008_v6 = vld [vmem:[%s1112_s12 + $0xf0] sm:$0xff]   ;;  %v1012_v10 = vld [vmem:[%s1112_s12 + $0xe8] sm:$0xff]  }
  0x17   : > { %v1005_v3 = vld [vmem:[%s1112_s12 + $0x38] sm:$0xff]   ;;  %918 = vmatprep.subr.bf16.mxu1 %v1004_v2  ;;  %v1009_v7 = vld [vmem:[%s1112_s12 + $0x30] sm:$0xff]   ;;  %v1013_v11 = vld [vmem:[%s1112_s12 + $0x28] sm:$0xff]  }
  0x18   : > { %v1006_v4 = vld [vmem:[%s1112_s12 + $0xb8] sm:$0xff]   ;;  %897 = vmatpush3.bf16.msra.mxu0 %v1005_v3  ;;  %v1010_v8 = vld [vmem:[%s1112_s12 + $0xb0] sm:$0xff]   ;;  %v1014_v12 = vld [vmem:[%s1112_s12 + $0xa8] sm:$0xff]  }
  0x19   : > { %919 = vmatpush3.bf16.msra.mxu1 %v1006_v4  ;;  %898 = vmatprep.subr.bf16.mxu0 %v1007_v5  ;;  %v1015_v13 = vld [vmem:[%s1112_s12 + $0x60] sm:$0xff]   ;;  %v1019_v17 = vld [vmem:[%s1112_s12 + $0x58] sm:$0xff]   ;;  %v1023_v21 = vld [vmem:[%s1112_s12 + $0x50] sm:$0xff]  }
  0x1a   : > { %920 = vmatprep.subr.bf16.mxu1 %v1008_v6  ;;  %v1016_v14 = vld [vmem:[%s1112_s12 + $0xe0] sm:$0xff]   ;;  %v1020_v18 = vld [vmem:[%s1112_s12 + $0xd8] sm:$0xff]   ;;  %v1024_v22 = vld [vmem:[%s1112_s12 + $0xd0] sm:$0xff]  }
  0x1b   : > { %v1017_v15 = vld [vmem:[%s1112_s12 + $0x20] sm:$0xff]   ;;  %v1021_v19 = vld [vmem:[%s1112_s12 + $0x18] sm:$0xff]   ;;  %v1025_v23 = vld [vmem:[%s1112_s12 + $0x10] sm:$0xff]  }
  0x1c   : > { %899 = vmatpush3.bf16.msra.mxu0 %v1009_v7  ;;  %v1018_v16 = vld [vmem:[%s1112_s12 + $0xa0] sm:$0xff]   ;;  %v1022_v20 = vld [vmem:[%s1112_s12 + $0x98] sm:$0xff]   ;;  %v1026_v24 = vld [vmem:[%s1112_s12 + $0x90] sm:$0xff]  }
  0x1d   : > { %921 = vmatpush3.bf16.msra.mxu1 %v1010_v8  ;;  %900 = vmatprep.subr.bf16.mxu0 %v1011_v9  ;;  %v1027_v25 = vld [vmem:[%s1112_s12 + $0x48] sm:$0xff]   ;;  %v1031_v29 = vld [vmem:[%s1112_s12 + $0x40] sm:$0xff]  }
  0x1e   : > { %922 = vmatprep.subr.bf16.mxu1 %v1012_v10  ;;  %v1028_v26 = vld [vmem:[%s1112_s12 + $0xc8] sm:$0xff]   ;;  %v1032_v30 = vld [vmem:[%s1112_s12 + $0xc0] sm:$0xff]  }
  0x1f   : > { %v1029_v27 = vld [vmem:[%s1112_s12 + $0x8] sm:$0xff]   ;;  %v1033_v31 = vld [vmem:[%s1112_s12] sm:$0xff]  }
  0x20   : > { %901 = vmatpush3.bf16.msra.mxu0 %v1013_v11  ;;  %v1030_v28 = vld [vmem:[%s1112_s12 + $0x88] sm:$0xff]   ;;  %v1034_v32 = vld [vmem:[%s1112_s12 + $0x80] sm:$0xff]  }
  0x21   : > { %923 = vmatpush3.bf16.msra.mxu1 %v1014_v12  ;;  %902 = vmatprep.subr.bf16.mxu0 %v1015_v13  ;;  %v295_v33 = vld [vmem:[%s1107_s8] sm:$0xff]  ;;  %v296_v34 = vld [vmem:[%s1107_s8 + $0x8] sm:$0xff] }
  0x22   : > { %924 = vmatprep.subr.bf16.mxu1 %v1016_v14  ;;  %v852_v35 = vcombine.low %v295_v33, %v295_v33  ;;  %v853_v36 = vcombine.high %v295_v33, %v295_v33  ;;  %v854_v37 = vcombine.low %v296_v34, %v296_v34  ;;  %v855_v38 = vcombine.high %v296_v34, %v296_v34  ;;  %v294_v45 = vld [vmem:[#allocation2] sm:$0xff] }
  0x24   : > { %903 = vmatpush3.bf16.msra.mxu0 %v1017_v15  ;;  %599 = vmatprep.mubr.bf16.mxu0 %v853_v36 }
  0x25   : > { %925 = vmatpush3.bf16.msra.mxu1 %v1018_v16  ;;  %904 = vmatprep.subr.bf16.mxu0 %v1019_v17 }
  0x26   : > { %926 = vmatprep.subr.bf16.mxu1 %v1020_v18  ;;  %639 = vmatprep.mubr.bf16.mxu1 %v855_v38 }
  0x28   : > { %905 = vmatpush3.bf16.msra.mxu0 %v1021_v19 }
  0x29   : > { %927 = vmatpush3.bf16.msra.mxu1 %v1022_v20  ;;  %906 = vmatprep.subr.bf16.mxu0 %v1023_v21 }
  0x2a   : > { %928 = vmatprep.subr.bf16.mxu1 %v1024_v22 }
  0x2c   : > { %907 = vmatpush3.bf16.msra.mxu0 %v1025_v23 }
  0x2d   : > { %929 = vmatpush3.bf16.msra.mxu1 %v1026_v24  ;;  %908 = vmatprep.subr.bf16.mxu0 %v1027_v25 }
  0x2e   : > { %930 = vmatprep.subr.bf16.mxu1 %v1028_v26 }
  0x30   : > { %909 = vmatpush3.bf16.msra.mxu0 %v1029_v27 }
  0x31   : > { %931 = vmatpush3.bf16.msra.mxu1 %v1030_v28  ;;  %910 = vmatprep.subr.bf16.mxu0 %v1031_v29 }
  0x32   : > { %932 = vmatprep.subr.bf16.mxu1 %v1032_v30 }
  0x34   : > { %911 = vmatpush3.bf16.msra.mxu0 %v1033_v31 }
  0x35   : > { %933 = vmatpush3.bf16.msra.mxu1 %v1034_v32 }
  0x37   : > { %600 = vmatmul.mubr.bf16.vlgmr.msra.gmra.mxu0 %v852_v35 }
  0x38   : > { %640 = vmatmul.mubr.bf16.vlgmr.msra.gmra.mxu1 %v854_v37 }
  0xf7   : > { %v912_v39 = vpop.f32.mrf.mxu0 }
  0xf8   : > { %v934_v40 = vpop.f32.mrf.mxu1 }
  0xf9   : > { %v913_v41 = vpop.f32.mrf.mxu0 }
  0xfa   : > { %v935_v42 = vpop.f32.mrf.mxu1  ;;  %v914_v43 = vadd.f32 %v913_v41, %v912_v39 }
  0xfb   : > { %v936_v44 = vadd.f32 %v935_v42, %v934_v40  ;;  %v915_v46 = vpop.f32.mrf.mxu0 }
  0xfc   : > { %v937_v47 = vpop.f32.mrf.mxu1 }
  0xfd   : > { %v642_v48 = vadd.f32 %v936_v44, %v914_v43  ;;  %v916_v49 = vpop.f32.mrf.mxu0  ;;  %652 = sbr.rel (%p888_p6) target bundleno = 510 (0x1fe), region = 56 }
  0xfe   : > { %v938_v50 = vpop.f32.mrf.mxu1 }
  0xff   : > { %v647_v51 = vadd.f32 %v642_v48, %v294_v45 }
 0x101   : > { %648 = vst [vmem:[#allocation2] sm:$0xff] %v647_v51 }
 0x102   : > { %v724_v52 = vld [vmem:[%s1239_s5 + $0x78] sm:$0xff]  ;;  %v665_v53 = vlaneseq  ;;  %v1050_v54 = vmov 0.0   ;;  %v723_v55 = vld [vmem:[%s1239_s5 + $0x70] sm:$0xff]  ;;  %vm1051_vm0 = vmmov 0   ;;  %v722_v57 = vld [vmem:[%s1239_s5 + $0x68] sm:$0xff] }
 0x103   : > { %957 = vmatprep.subr.mxu0 %v1050_v54  ;;  %989 = vmatprep.mubr.msk.f32.mxu0 %vm1051_vm0, %v1050_v54  ;;  %v721_v58 = vld [vmem:[%s1239_s5 + $0x60] sm:$0xff]  ;;  %v720_v62 = vld [vmem:[%s1239_s5 + $0x58] sm:$0xff]  ;;  %v719_v1 = vld [vmem:[%s1239_s5 + $0x50] sm:$0xff] }
 0x104   : > { %958 = vmatpush3.msra.mxu0 %v724_v52  ;;  %v666_v56 = vshrl.u32 %v665_v53, 7  ;;  %v889_v60 = vld [vmem:[%s1236_s2] ss:$0 sm:$0xff]  ;;  %v718_v3 = vld [vmem:[%s1239_s5 + $0x48] sm:$0xff]  ;;  %v716_v8 = vld [vmem:[%s1239_s5 + $0x38] sm:$0xff] }
 0x105   : > { %959 = vmatprep.subr.mxu0 %v1050_v54  ;;  %v717_v5 = vld [vmem:[%s1239_s5 + $0x40] sm:$0xff]  ;;  %v715_v11 = vld [vmem:[%s1239_s5 + $0x30] sm:$0xff]  ;;  %v714_v14 = vld [vmem:[%s1239_s5 + $0x28] sm:$0xff] }
 0x106   : > { %960 = vmatpush3.msra.mxu0 %v723_v55  ;;  %vm667_vm1 = vcmp.lt.s32.totalorder %v666_v56, 2  ;;  %v713_v17 = vld [vmem:[%s1239_s5 + $0x20] sm:$0xff]  ;;  %v712_v20 = vld [vmem:[%s1239_s5 + $0x18] sm:$0xff]  ;;  %v711_v23 = vld [vmem:[%s1239_s5 + $0x10] sm:$0xff] }
 0x107   : > { %961 = vmatprep.subr.mxu0 %v1050_v54  ;;  %v890_v0 = vsel %vm667_vm1, 1.0, %v1050_v54  ;;  %v710_v26 = vld [vmem:[%s1239_s5 + $0x8] sm:$0xff]  ;;  %v709_v29 = vld [vmem:[%s1239_s5] sm:$0xff] }
 0x108   : > { %v653_v59 = vld [vmem:[#allocation2] sm:$0xff]  ;;  %962 = vmatpush3.msra.mxu0 %v722_v57 }
 0x109   : > { %v661_v61 = vadd.f32 %v889_v60, %v653_v59  ;;  %963 = vmatprep.subr.mxu0 %v1050_v54  ;;  %v891_v35 = vld [vmem:[%s1237_s3] ss:$0 sm:$0xff] }
 0x10a   : > { %964 = vmatpush3.msra.mxu0 %v721_v58  ;;  %v892_v37 = vld [vmem:[%s1238_s4] ss:$0 sm:$0xff] }
 0x10b   : > { %vm662_vm2 = vcmp.ge.f32.partialorder %v661_v61, 0.0  ;;  %v663_v63 = vmul.f32 0.2, %v661_v61  ;;  %965 = vmatprep.subr.mxu0 %v1050_v54  ;;  %v893_v40 = vld [vmem:[%s1240_s6] ss:$0 sm:$0xff] }
 0x10c   : > { %966 = vmatpush3.msra.mxu0 %v720_v62 }
 0x10d   : > { %v664_v2 = vsel %vm662_vm2, %v661_v61, %v663_v63  ;;  %967 = vmatprep.subr.mxu0 %v1050_v54 }
 0x10e   : > { %v670_v4 = vmul.f32 %v890_v0, %v664_v2  ;;  %968 = vmatpush3.msra.mxu0 %v719_v1 }
 0x10f   : > { %969 = vmatprep.subr.mxu0 %v1050_v54 }
 0x110   : > { %v671_v6 = vrot.slane %v670_v4, 4  ;;  %v678_v7 = vmul.f32 %v670_v4, %v670_v4  ;;  %970 = vmatpush3.msra.mxu0 %v718_v3 }
 0x111   : > { %971 = vmatprep.subr.mxu0 %v1050_v54 }
 0x112   : > { %v672_v9 = vadd.f32 %v671_v6, %v670_v4  ;;  %v679_v10 = vrot.slane %v678_v7, 4  ;;  %972 = vmatpush3.msra.mxu0 %v717_v5 }
 0x113   : > { %973 = vmatprep.subr.mxu0 %v1050_v54 }
 0x114   : > { %v673_v12 = vrot.slane %v672_v9, 2  ;;  %v680_v13 = vadd.f32 %v679_v10, %v678_v7  ;;  %974 = vmatpush3.msra.mxu0 %v716_v8 }
 0x115   : > { %975 = vmatprep.subr.mxu0 %v1050_v54 }
 0x116   : > { %v674_v15 = vadd.f32 %v673_v12, %v672_v9  ;;  %v681_v16 = vrot.slane %v680_v13, 2  ;;  %976 = vmatpush3.msra.mxu0 %v715_v11 }
 0x117   : > { %977 = vmatprep.subr.mxu0 %v1050_v54 }
 0x118   : > { %v675_v18 = vrot.slane %v674_v15, 1  ;;  %v682_v19 = vadd.f32 %v681_v16, %v680_v13  ;;  %978 = vmatpush3.msra.mxu0 %v714_v14 }
 0x119   : > { %979 = vmatprep.subr.mxu0 %v1050_v54 }
 0x11a   : > { %v676_v21 = vadd.f32 %v675_v18, %v674_v15  ;;  %v683_v22 = vrot.slane %v682_v19, 1  ;;  %980 = vmatpush3.msra.mxu0 %v713_v17 }
 0x11b   : > { %981 = vmatprep.subr.mxu0 %v1050_v54 }
 0x11c   : > { %v677_v24 = vmul.f32 0.5, %v676_v21  ;;  %v684_v25 = vadd.f32 %v683_v22, %v682_v19  ;;  %982 = vmatpush3.msra.mxu0 %v712_v20 }
 0x11d   : > { %983 = vmatprep.subr.mxu0 %v1050_v54 }
 0x11e   : > { %v685_v27 = vmul.f32 0.5, %v684_v25  ;;  %v686_v28 = vmul.f32 %v677_v24, %v677_v24  ;;  %984 = vmatpush3.msra.mxu0 %v711_v23  ;;  %v689_v33 = vsub.f32 %v664_v2, %v677_v24 }
 0x11f   : > { %985 = vmatprep.subr.mxu0 %v1050_v54 }
 0x120   : > { %v687_v30 = vsub.f32 %v685_v27, %v686_v28  ;;  %986 = vmatpush3.msra.mxu0 %v710_v26 }
 0x121   : > { %987 = vmatprep.subr.mxu0 %v1050_v54 }
 0x122   : > { %v688_v31 = vmax.f32 %v687_v30, 0.0  ;;  %988 = vmatpush3.msra.mxu0 %v709_v29 }
 0x124   : > { %v690_v32 = vadd.f32 1e-05, %v688_v31 }
 0x126   : > { %1039 = vrsqrt.f32 %v690_v32 }
 0x133   : > { %v1040_v34 = vpop.eup %1039 }
 0x134   : > { %v692_v36 = vmul.f32 %v1040_v34, %v689_v33 }
 0x136   : > { %v700_v38 = vmul.f32 %v891_v35, %v692_v36 }
 0x138   : > { %v708_v39 = vadd.f32 %v892_v37, %v700_v38 }
 0x13a   : > { %990 = vmatmul.mubr.f32.vlgmr.msra.gmra.mxu0 %v708_v39 }
 0x1fa   : > { %v798_v41 = vpop.f32.mrf.mxu0 }
 0x1fb   : > { %v799_v42 = vadd.f32 %v893_v40, %v798_v41 }
 0x1fc   : > { %v991_v43 = vpop.f32.mrf.mxu0 }
 0x1fd   : > { %802 = vst [vmem:[%s1241_s7] sm:$0xff] %v799_v42 }
 0x1fe PF: > { %s17_s24 = sadd.s32 1, %s1047_s24  }
 0x1ff   : > { %p14_p7 = scmp.ge.s32.totalorder %s17_s24, 18  }
 0x201   :  { %16 = sbr.rel (!%p14_p7) target bundleno = 1 (0x1), region = 85 }

</bundles_post_ra>
